<compile_context>
chip_gen: v7x
topology: tpu7x:2x2x1
jax: 0.10.0
libtpu: 0.0.40
codegen_flags: <defaults>
</compile_context>

<pallas_src>
import functools

import jax
import jax.numpy as jnp
from jax import lax
from jax.experimental import pallas as pl
from jax.experimental.pallas import tpu as pltpu

EPS = 1e-5  # nn.InstanceNorm2d default eps
KH = KW = 3


def _mblock_kernel(x_ref, w_ref, b_ref, o_ref, *, matmul_dtype):
    """One block of Nb batch elements per grid step.

    x_ref: (Nb, H, W, C)      input tile (NHWC)
    w_ref: (KH*KW*C, C)       conv weights, im2col layout (9C, C)
    b_ref: (1, C)             conv bias
    o_ref: (Nb, Ho*Wo, C)     output slab, Ho = H-2, Wo = W-2
    """
    Nb, H, W, C = x_ref.shape
    Ho = H - (KH - 1)
    Wo = W - (KW - 1)

    x = x_ref[...]  # (Nb, H, W, C)

    # im2col: one (Nb*Ho*Wo, 9*C) patch tensor, built with a single lane-dim
    # concat of the 9 shifted views.  Tap index = kh*KW + kw matches the
    # wrapper-side weight reshape.
    taps = []
    for kh in range(KH):
        for kw in range(KW):
            taps.append(x[:, kh:kh + Ho, kw:kw + Wo, :])
    patches = jnp.concatenate(taps, axis=-1)              # (Nb, Ho, Wo, 9C)
    patches = patches.reshape(Nb * Ho * Wo, KH * KW * C)  # (M, 9C)

    w = w_ref[...]                                        # (9C, C)
    if matmul_dtype is not None:
        # bf16 MXU operands (v6e/v7x); accumulation stays f32.
        patches = patches.astype(matmul_dtype)
        w = w.astype(matmul_dtype)

    # Single fused conv matmul, f32 accumulation on the MXU.
    y = jnp.dot(patches, w, preferred_element_type=jnp.float32)  # (M, C)
    y = y + b_ref[...]                                    # bias (1, C) broadcast

    # InstanceNorm2d (affine=False): per-(sample, channel) stats over the full
    # spatial extent, biased variance, eps inside the rsqrt.  All in f32.
    y = y.reshape(Nb, Ho * Wo, C)
    mean = jnp.mean(y, axis=1, keepdims=True)                      # (Nb, 1, C)
    var = jnp.mean(jnp.square(y - mean), axis=1, keepdims=True)    # (Nb, 1, C)
    y = (y - mean) * lax.rsqrt(var + EPS)

    # ReLU + store (lane-dense when C >= 128).
    o_ref[...] = jnp.maximum(y, 0.0).astype(o_ref.dtype)


def _roundup(x, m):
    return (x + m - 1) // m * m


def _vmem_estimate_bytes(nb, H, W, C, Ho, Wo):
    """Rough f32 VMEM footprint of one grid step (padded to (8,128) tiles)."""
    cl = _roundup(C, 128)
    kcl = _roundup(KH * KW * C, 128)
    in_blk = nb * H * _roundup(W, 8) * cl * 4
    out_blk = nb * _roundup(Ho * Wo, 8) * cl * 4
    w_blk = _roundup(KH * KW * C, 8) * cl * 4
    bias_blk = 8 * cl * 4
    patches = nb * _roundup(Ho * Wo, 8) * kcl * 4       # im2col tensor
    temps = 3 * out_blk                                  # conv result + norm temps
    # Inputs/outputs/weights are double-buffered by the pipeline.
    return 2 * (in_blk + out_blk + w_blk + bias_blk) + patches + temps


def _pick_block_n(N, H, W, C, Ho, Wo, budget_bytes=28 << 20):
    """Largest divisor of N whose per-step footprint fits the VMEM budget."""
    best = 1
    for nb in range(1, N + 1):
        if N % nb == 0 and _vmem_estimate_bytes(nb, H, W, C, Ho, Wo) <= budget_bytes:
            best = nb
    return best


@functools.partial(jax.jit, static_argnames=("matmul_dtype",))
def mblock_forward(x_nchw, w_oihw, bias, matmul_dtype=None):
    """MBlock.forward. x_nchw: (N, C, H, W) float32 -> (N, C, H-2, W-2)."""
    N, C, H, W = x_nchw.shape
    Ho, Wo = H - (KH - 1), W - (KW - 1)

    # Layout plumbing (PyTorch semantics are NCHW in / NCHW out).
    x_nhwc = jnp.transpose(x_nchw, (0, 2, 3, 1))                   # NCHW -> NHWC
    # OIHW -> (KH, KW, I, O) -> (KH*KW*I, O): row = (kh*KW + kw)*C + ci,
    # matching the kernel's im2col tap/channel ordering.
    w_mat = jnp.transpose(w_oihw, (2, 3, 1, 0)).reshape(KH * KW * C, C)
    b2d = bias.reshape(1, C)

    block_n = _pick_block_n(N, H, W, C, Ho, Wo)
    vmem_limit = min(
        max(int(1.5 * _vmem_estimate_bytes(block_n, H, W, C, Ho, Wo)), 32 << 20),
        64 << 20,
    )

    kernel = functools.partial(_mblock_kernel, matmul_dtype=matmul_dtype)

    out_flat = pl.pallas_call(
        kernel,
        out_shape=jax.ShapeDtypeStruct((N, Ho * Wo, C), x_nchw.dtype),
        grid_spec=pltpu.PrefetchScalarGridSpec(
            num_scalar_prefetch=0,
            grid=(N // block_n,),
            in_specs=[
                pl.BlockSpec((block_n, H, W, C), lambda n: (n, 0, 0, 0)),
                pl.BlockSpec((KH * KW * C, C), lambda n: (0, 0)),
                pl.BlockSpec((1, C), lambda n: (0, 0)),
            ],
            out_specs=pl.BlockSpec((block_n, Ho * Wo, C), lambda n: (n, 0, 0)),
        ),
        compiler_params=pltpu.CompilerParams(
            dimension_semantics=("parallel",),
            vmem_limit_bytes=vmem_limit,
        ),
    )(x_nhwc, w_mat, b2d)

    # (N, Ho*Wo, C) -> NCHW
    out = jnp.transpose(out_flat, (0, 2, 1)).reshape(N, C, Ho, Wo)
    return out


def _reference(x_nchw, w_oihw, bias):
    """Pure-JAX reference (matches PyTorch Conv2d + InstanceNorm2d + ReLU)."""
    y = lax.conv_general_dilated(
        x_nchw, w_oihw, window_strides=(1, 1), padding="VALID",
        dimension_numbers=("NCHW", "OIHW", "NCHW"),
    ) + bias.reshape(1, -1, 1, 1)
    mean = jnp.mean(y, axis=(2, 3), keepdims=True)
    var = jnp.var(y, axis=(2, 3), keepdims=True)
    y = (y - mean) * lax.rsqrt(var + EPS)
    return jnp.maximum(y, 0.0)


if __name__ == "__main__":
    key = jax.random.PRNGKey(0)
    k_x, k_w, k_b = jax.random.split(key, 3)

    N, C, H, W = 2, 4, 16, 16
    x = jax.random.normal(k_x, (N, C, H, W), dtype=jnp.float32)

    # Deterministic parameter init (same shapes as nn.Conv2d(C, C, 3)).
    fan_in = C * KH * KW
    bound = 1.0 / (fan_in ** 0.5)
    w = jax.random.uniform(k_w, (C, C, KH, KW), jnp.float32, -bound, bound)
    b = jax.random.uniform(k_b, (C,), jnp.float32, -bound, bound)

    ref = _reference(x, w, b)

    # f32 MXU path.
    out = jax.block_until_ready(mblock_forward(x, w, b))
    assert out.shape == (N, C, H - 2, W - 2), out.shape
    assert jnp.allclose(out, ref, atol=1e-3, rtol=1e-3), (
        float(jnp.max(jnp.abs(out - ref)))
    )

    # bf16 MXU-operand fast path (v6e/v7x); elementwise math stays f32.
    out_bf16 = jax.block_until_ready(
        mblock_forward(x, w, b, matmul_dtype=jnp.bfloat16))
    assert out_bf16.shape == (N, C, H - 2, W - 2), out_bf16.shape
    assert jnp.allclose(out_bf16, ref, atol=5e-2, rtol=5e-2), (
        float(jnp.max(jnp.abs(out_bf16 - ref)))
    )

    print("KERNEL_OK")
</pallas_src>

<mosaic_0001>
module attributes {stable_mosaic.version = 11 : i64} {
  func.func @_mblock_kernel(%arg0: i32, %arg1: memref<2x16x16x4xf32, #tpu.memory_space<vmem>>, %arg2: memref<36x4xf32, #tpu.memory_space<vmem>>, %arg3: memref<1x4xf32, #tpu.memory_space<vmem>>, %arg4: memref<2x196x4xf32, #tpu.memory_space<vmem>>) attributes {dimension_semantics = [#tpu.dimension_semantics<parallel>], iteration_bounds = array<i64: 1>, scalar_prefetch = 0 : i64, scratch_operands = 0 : i64, tpu.core_type = #tpu.core_type<tc>, window_params = [{transform_indices = @transform_0, window_bounds = array<i64: 2, 16, 16, 4>}, {pipeline_mode = #tpu.pipeline_mode<synchronous>, transform_indices = @transform_1, window_bounds = array<i64: 36, 4>}, {pipeline_mode = #tpu.pipeline_mode<synchronous>, transform_indices = @transform_2, window_bounds = array<i64: 1, 4>}, {transform_indices = @transform_3, window_bounds = array<i64: 2, 196, 4>}]} {
    %c0 = arith.constant 0 : index
    %c0_0 = arith.constant 0 : index
    %c0_1 = arith.constant 0 : index
    %c0_2 = arith.constant 0 : index
    %0 = vector.load %arg1[%c0, %c0_0, %c0_1, %c0_2] : memref<2x16x16x4xf32, #tpu.memory_space<vmem>>, vector<2x16x16x4xf32>
    %1 = vector.extract_strided_slice %0 {offsets = [0, 0, 0, 0], sizes = [2, 14, 14, 4], strides = [1, 1, 1, 1]} : vector<2x16x16x4xf32> to vector<2x14x14x4xf32>
    %2 = vector.extract_strided_slice %0 {offsets = [0, 0, 1, 0], sizes = [2, 14, 14, 4], strides = [1, 1, 1, 1]} : vector<2x16x16x4xf32> to vector<2x14x14x4xf32>
    %3 = vector.extract_strided_slice %0 {offsets = [0, 0, 2, 0], sizes = [2, 14, 14, 4], strides = [1, 1, 1, 1]} : vector<2x16x16x4xf32> to vector<2x14x14x4xf32>
    %4 = vector.extract_strided_slice %0 {offsets = [0, 1, 0, 0], sizes = [2, 14, 14, 4], strides = [1, 1, 1, 1]} : vector<2x16x16x4xf32> to vector<2x14x14x4xf32>
    %5 = vector.extract_strided_slice %0 {offsets = [0, 1, 1, 0], sizes = [2, 14, 14, 4], strides = [1, 1, 1, 1]} : vector<2x16x16x4xf32> to vector<2x14x14x4xf32>
    %6 = vector.extract_strided_slice %0 {offsets = [0, 1, 2, 0], sizes = [2, 14, 14, 4], strides = [1, 1, 1, 1]} : vector<2x16x16x4xf32> to vector<2x14x14x4xf32>
    %7 = vector.extract_strided_slice %0 {offsets = [0, 2, 0, 0], sizes = [2, 14, 14, 4], strides = [1, 1, 1, 1]} : vector<2x16x16x4xf32> to vector<2x14x14x4xf32>
    %8 = vector.extract_strided_slice %0 {offsets = [0, 2, 1, 0], sizes = [2, 14, 14, 4], strides = [1, 1, 1, 1]} : vector<2x16x16x4xf32> to vector<2x14x14x4xf32>
    %9 = vector.extract_strided_slice %0 {offsets = [0, 2, 2, 0], sizes = [2, 14, 14, 4], strides = [1, 1, 1, 1]} : vector<2x16x16x4xf32> to vector<2x14x14x4xf32>
    %10 = tpu.concatenate %1, %2, %3, %4, %5, %6, %7, %8, %9 in 3 : vector<2x14x14x4xf32>, vector<2x14x14x4xf32>, vector<2x14x14x4xf32>, vector<2x14x14x4xf32>, vector<2x14x14x4xf32>, vector<2x14x14x4xf32>, vector<2x14x14x4xf32>, vector<2x14x14x4xf32>, vector<2x14x14x4xf32> -> vector<2x14x14x36xf32>
    %11 = vector.shape_cast %10 : vector<2x14x14x36xf32> to vector<392x36xf32>
    %c0_3 = arith.constant 0 : index
    %c0_4 = arith.constant 0 : index
    %12 = vector.load %arg2[%c0_3, %c0_4] : memref<36x4xf32, #tpu.memory_space<vmem>>, vector<36x4xf32>
    %cst = arith.constant dense<0.000000e+00> : vector<392x4xf32>
    %13 = tpu.matmul %11, %12, %cst {dimension_numbers = #tpu.dot_dimension_numbers<[1], [0], [0], [1], [0, 0, 1, 1], [], []>} : vector<392x36xf32>, vector<36x4xf32>, vector<392x4xf32> -> vector<392x4xf32>
    %c0_5 = arith.constant 0 : index
    %c0_6 = arith.constant 0 : index
    %14 = vector.load %arg3[%c0_5, %c0_6] : memref<1x4xf32, #tpu.memory_space<vmem>>, vector<1x4xf32>
    %15 = vector.broadcast %14 : vector<1x4xf32> to vector<392x4xf32>
    %16 = arith.addf %13, %15 : vector<392x4xf32>
    %17 = vector.shape_cast %16 : vector<392x4xf32> to vector<2x196x4xf32>
    %cst_7 = arith.constant dense<0.000000e+00> : vector<2x4xf32>
    %18 = vector.multi_reduction <add>, %17, %cst_7 [1] : vector<2x196x4xf32> to vector<2x4xf32>
    %19 = vector.shape_cast %18 : vector<2x4xf32> to vector<2x1x4xf32>
    %cst_8 = arith.constant 1.960000e+02 : f32
    %20 = vector.broadcast %cst_8 : f32 to vector<2x1x4xf32>
    %21 = arith.divf %19, %20 : vector<2x1x4xf32>
    %22 = vector.broadcast %21 : vector<2x1x4xf32> to vector<2x196x4xf32>
    %23 = arith.subf %17, %22 : vector<2x196x4xf32>
    %24 = arith.mulf %23, %23 : vector<2x196x4xf32>
    %cst_9 = arith.constant dense<0.000000e+00> : vector<2x4xf32>
    %25 = vector.multi_reduction <add>, %24, %cst_9 [1] : vector<2x196x4xf32> to vector<2x4xf32>
    %26 = vector.shape_cast %25 : vector<2x4xf32> to vector<2x1x4xf32>
    %cst_10 = arith.constant 1.960000e+02 : f32
    %27 = vector.broadcast %cst_10 : f32 to vector<2x1x4xf32>
    %28 = arith.divf %26, %27 : vector<2x1x4xf32>
    %29 = vector.broadcast %21 : vector<2x1x4xf32> to vector<2x196x4xf32>
    %30 = arith.subf %17, %29 : vector<2x196x4xf32>
    %cst_11 = arith.constant 9.99999974E-6 : f32
    %31 = vector.broadcast %cst_11 : f32 to vector<2x1x4xf32>
    %32 = arith.addf %28, %31 : vector<2x1x4xf32>
    %33 = math.rsqrt %32 : vector<2x1x4xf32>
    %34 = vector.broadcast %33 : vector<2x1x4xf32> to vector<2x196x4xf32>
    %35 = arith.mulf %30, %34 : vector<2x196x4xf32>
    %cst_12 = arith.constant 0.000000e+00 : f32
    %36 = vector.broadcast %cst_12 : f32 to vector<2x196x4xf32>
    %37 = arith.maximumf %35, %36 : vector<2x196x4xf32>
    %c0_13 = arith.constant 0 : index
    %c0_14 = arith.constant 0 : index
    %c0_15 = arith.constant 0 : index
    %38 = vector.load %arg4[%c0_13, %c0_14, %c0_15] : memref<2x196x4xf32, #tpu.memory_space<vmem>>, vector<2x196x4xf32>
    tpu.vector_store %arg4[%c0_13, %c0_14, %c0_15], %37 {strides = array<i32>} : memref<2x196x4xf32, #tpu.memory_space<vmem>>, vector<2x196x4xf32>,
    return
  }
  func.func @transform_0(%arg0: i32) -> (i32, i32, i32, i32) {
    %c0_i32 = arith.constant 0 : i32
    %c0_i32_0 = arith.constant 0 : i32
    %c0_i32_1 = arith.constant 0 : i32
    %c0_i32_2 = arith.constant 0 : i32
    return %arg0, %c0_i32, %c0_i32_0, %c0_i32_1 : i32, i32, i32, i32
  }
  func.func @transform_1(%arg0: i32) -> (i32, i32) {
    %c0_i32 = arith.constant 0 : i32
    %c0_i32_0 = arith.constant 0 : i32
    %c0_i32_1 = arith.constant 0 : i32
    return %c0_i32, %c0_i32_0 : i32, i32
  }
  func.func @transform_2(%arg0: i32) -> (i32, i32) {
    %c0_i32 = arith.constant 0 : i32
    %c0_i32_0 = arith.constant 0 : i32
    %c0_i32_1 = arith.constant 0 : i32
    return %c0_i32, %c0_i32_0 : i32, i32
  }
  func.func @transform_3(%arg0: i32) -> (i32, i32, i32) {
    %c0_i32 = arith.constant 0 : i32
    %c0_i32_0 = arith.constant 0 : i32
    %c0_i32_1 = arith.constant 0 : i32
    return %arg0, %c0_i32, %c0_i32_0 : i32, i32, i32
  }
}

</mosaic_0001>

<bundles_post_ra>
// kernel: mblock_forward.1
= control target key start
LH: loop header
LB: loop body
LE: loop exit
PB: predicated region body
PF: predicated region fallthrough
CT: control target
= control target key end

     0   :  { %vm134_vm0 = vcmask 1046528   ;;  %s6065_s24 = smov 4   ;;  %vm387_vm1 = vcmask 1045504   ;;  %s6066_s20 = smov 8   ;;  %vm4060_vm2 = vcmask 1043456   ;;  %vm6074_vm3 = vmmov 0   ;;  %s11430_s0 = inlined_call_operand.vmem [shape: f32[2,16,16,4], index: 0, kind: input, shape index: {}]   ;;  %s11431_s1 = inlined_call_operand.vmem [shape: f32[36,4], index: 1, kind: input, shape index: {}]   ;;  %s11432_s2 = inlined_call_operand.vmem [shape: f32[1,4], index: 2, kind: input, shape index: {}]   ;;  %s11433_s3 = inlined_call_operand.vmem [shape: f32[2,196,4], index: 3, kind: output, shape index: {}]  }
   0x1   :  { %v6100_v0 = vld [vmem:[%s11430_s0 + $0x18] sm:$0xff]  ;;  %v6105_v1 = vld [vmem:[%s11430_s0 + $0x8] sm:$0xff]  ;;  %v6110_v2 = vld [vmem:[%s11430_s0 + $0x10] sm:$0xff]  ;;  %s6068_s30 = smov 16   ;;  %s6070_s8 = smov 20   ;;  %vm1737_vm4 = vcmask 64512  }
   0x2   :  { %v6113_v3 = vrot.slane %v6100_v0, 1  ;;  %v136_v4 = vrot.slane %v6105_v1, 1  ;;  %v138_v5 = vrot.slane %v6110_v2, 1  ;;  %v6120_v6 = vld [vmem:[%s11430_s0] sm:$0xff]  ;;  %v6125_v7 = vld [vmem:[%s11430_s0 + $0x28] sm:$0xff]  ;;  %v6148_v14 = vld [vmem:[%s11430_s0 + $0x38] sm:$0xff] }
   0x3   :  { %v6130_v8 = vld [vmem:[%s11430_s0 + $0x20] sm:$0xff]  ;;  %v135_v9 = vrot.slane %v6120_v6, 1  ;;  %v6142_v12 = vrot.slane %v6125_v7, 1  ;;  %v6153_v15 = vld [vmem:[%s11430_s0 + $0x30] sm:$0xff]  ;;  %v6163_v17 = vrot.slane %v6148_v14, 1  ;;  %v6169_v19 = vld [vmem:[%s11430_s0 + $0x48] sm:$0xff] }
   0x4   :  { %11723 = vst [vmem:[#allocation2_spill] sm:$0xff] %v6113_v3  ;;  %225 = vrot.lane.b32.xlu1 %v6113_v3, %s6065_s24  ;;  %221 = vrot.lane.b32.xlu0 %v136_v4, %s6065_s24  ;;  %v6138_v10 = vsel %vm134_vm0, %v138_v5, %v6113_v3  ;;  %v141_v13 = vrot.slane %v6130_v8, 1  ;;  %v144_v18 = vrot.slane %v6153_v15, 1  ;;  %v6174_v20 = vld [vmem:[%s11430_s0 + $0x40] sm:$0xff]  ;;  %v6185_v22 = vrot.slane %v6169_v19, 1  ;;  %v6191_v24 = vld [vmem:[%s11430_s0 + $0x58] sm:$0xff] }
   0x5   :  { %11724 = vst [vmem:[#allocation3_spill] sm:$0xff] %v6138_v10  ;;  %v137_v11 = vsel %vm134_vm0, %v135_v9, %v136_v4  ;;  %11725 = vst [vmem:[#allocation4_spill] sm:$0xff] %v6142_v12  ;;  %v147_v23 = vrot.slane %v6174_v20, 1  ;;  %v6196_v25 = vld [vmem:[%s11430_s0 + $0x50] sm:$0xff]  ;;  %v6207_v27 = vrot.slane %v6191_v24, 1  ;;  %v6213_v29 = vld [vmem:[%s11430_s0 + $0x68] sm:$0xff] }
   0x6   :  { %v6160_v16 = vsel %vm134_vm0, %v141_v13, %v6142_v12  ;;  %11727 = vst [vmem:[#allocation6_spill] sm:$0xff] %v6163_v17  ;;  %v6182_v21 = vsel %vm134_vm0, %v144_v18, %v6163_v17  ;;  %11729 = vst [vmem:[#allocation8_spill] sm:$0xff] %v6185_v22  ;;  %v150_v28 = vrot.slane %v6196_v25, 1  ;;  %v6218_v30 = vld [vmem:[%s11430_s0 + $0x60] sm:$0xff]  ;;  %v6229_v32 = vrot.slane %v6213_v29, 1  ;;  %v6235_v34 = vld [vmem:[%s11430_s0 + $0x78] sm:$0xff] }
   0x7   :  { %11726 = vst [vmem:[#allocation5_spill] sm:$0xff] %v6160_v16  ;;  %11728 = vst [vmem:[#allocation7_spill] sm:$0xff] %v6182_v21  ;;  %v6204_v26 = vsel %vm134_vm0, %v147_v23, %v6185_v22  ;;  %v153_v33 = vrot.slane %v6218_v30, 1  ;;  %v6240_v35 = vld [vmem:[%s11430_s0 + $0x70] sm:$0xff]  ;;  %v6251_v37 = vrot.slane %v6235_v34, 1  ;;  %v6257_v39 = vld [vmem:[%s11430_s0 + $0x88] sm:$0xff] }
   0x8   :  { %223 = vrot.lane.b32.xlu1 %v6138_v10, %s6065_s24  ;;  %219 = vrot.lane.b32.xlu0 %v137_v11, %s6065_s24  ;;  %11730 = vst [vmem:[#allocation9_spill] sm:$0xff] %v6204_v26  ;;  %11731 = vst [vmem:[#allocation10_spill] sm:$0xff] %v6207_v27  ;;  %v6226_v31 = vsel %vm134_vm0, %v150_v28, %v6207_v27  ;;  %v156_v38 = vrot.slane %v6240_v35, 1  ;;  %v6262_v40 = vld [vmem:[%s11430_s0 + $0x80] sm:$0xff]  ;;  %v6273_v42 = vrot.slane %v6257_v39, 1  ;;  %v6279_v44 = vld [vmem:[%s11430_s0 + $0x98] sm:$0xff] }
   0x9   :  { %11732 = vst [vmem:[#allocation11_spill] sm:$0xff] %v6226_v31  ;;  %11733 = vst [vmem:[#allocation12_spill] sm:$0xff] %v6229_v32  ;;  %v6248_v36 = vsel %vm134_vm0, %v153_v33, %v6229_v32  ;;  %v159_v43 = vrot.slane %v6262_v40, 1  ;;  %v6284_v45 = vld [vmem:[%s11430_s0 + $0x90] sm:$0xff]  ;;  %v6295_v47 = vrot.slane %v6279_v44, 1  ;;  %v6301_v49 = vld [vmem:[%s11430_s0 + $0xa8] sm:$0xff] }
   0xa   :  { %11734 = vst [vmem:[#allocation13_spill] sm:$0xff] %v6248_v36  ;;  %11735 = vst [vmem:[#allocation14_spill] sm:$0xff] %v6251_v37  ;;  %v6270_v41 = vsel %vm134_vm0, %v156_v38, %v6251_v37  ;;  %v162_v48 = vrot.slane %v6284_v45, 1  ;;  %v6306_v50 = vld [vmem:[%s11430_s0 + $0xa0] sm:$0xff]  ;;  %v6317_v52 = vrot.slane %v6301_v49, 1  ;;  %v6323_v54 = vld [vmem:[%s11430_s0 + $0xb8] sm:$0xff] }
   0xb   :  { %11736 = vst [vmem:[#allocation15_spill] sm:$0xff] %v6270_v41  ;;  %11737 = vst [vmem:[#allocation16_spill] sm:$0xff] %v6273_v42  ;;  %v6292_v46 = vsel %vm134_vm0, %v159_v43, %v6273_v42  ;;  %v165_v53 = vrot.slane %v6306_v50, 1  ;;  %v6328_v55 = vld [vmem:[%s11430_s0 + $0xb0] sm:$0xff]  ;;  %v6339_v57 = vrot.slane %v6323_v54, 1  ;;  %v6345_v59 = vld [vmem:[%s11430_s0 + $0xc8] sm:$0xff] }
   0xc   :  { %229 = vrot.lane.b32.xlu1 %v6142_v12, %s6065_s24  ;;  %227 = vrot.lane.b32.xlu0 %v6160_v16, %s6065_s24  ;;  %11738 = vst [vmem:[#allocation17_spill] sm:$0xff] %v6292_v46  ;;  %11739 = vst [vmem:[#allocation18_spill] sm:$0xff] %v6295_v47  ;;  %v6314_v51 = vsel %vm134_vm0, %v162_v48, %v6295_v47  ;;  %v168_v58 = vrot.slane %v6328_v55, 1  ;;  %v6350_v60 = vld [vmem:[%s11430_s0 + $0xc0] sm:$0xff]  ;;  %v6361_v62 = vrot.slane %v6345_v59, 1  ;;  %v6367_v4 = vld [vmem:[%s11430_s0 + $0xd8] sm:$0xff] }
   0xd   :  { %11740 = vst [vmem:[#allocation19_spill] sm:$0xff] %v6314_v51  ;;  %11741 = vst [vmem:[#allocation20_spill] sm:$0xff] %v6317_v52  ;;  %v6336_v56 = vsel %vm134_vm0, %v165_v53, %v6317_v52  ;;  %v171_v63 = vrot.slane %v6350_v60, 1  ;;  %v6372_v5 = vld [vmem:[%s11430_s0 + $0xd0] sm:$0xff]  ;;  %v6383_v11 = vrot.slane %v6367_v4, 1  ;;  %v6389_v18 = vld [vmem:[%s11430_s0 + $0x108] sm:$0xff] }
   0xe   :  { %11742 = vst [vmem:[#allocation21_spill] sm:$0xff] %v6336_v56  ;;  %11743 = vst [vmem:[#allocation22_spill] sm:$0xff] %v6339_v57  ;;  %v6358_v61 = vsel %vm134_vm0, %v168_v58, %v6339_v57  ;;  %v174_v13 = vrot.slane %v6372_v5, 1  ;;  %v6394_v23 = vld [vmem:[%s11430_s0 + $0x100] sm:$0xff]  ;;  %v178_v33 = vrot.slane %v6389_v18, 1  ;;  %v6409_v43 = vld [vmem:[%s11430_s0 + $0x118] sm:$0xff] }
   0xf   :  { %11744 = vst [vmem:[#allocation23_spill] sm:$0xff] %v6358_v61  ;;  %11745 = vst [vmem:[#allocation24_spill] sm:$0xff] %v6361_v62  ;;  %v6380_v9 = vsel %vm134_vm0, %v171_v63, %v6361_v62  ;;  %v177_v38 = vrot.slane %v6394_v23, 1  ;;  %v6414_v48 = vld [vmem:[%s11430_s0 + $0x110] sm:$0xff]  ;;  %v6422_v58 = vrot.slane %v6409_v43, 1  ;;  %v6668_v12 = vld [vmem:[%s11430_s0 + $0x1d8] sm:$0xff] }
  0x10   :  { %233 = vrot.lane.b32.xlu1 %v6163_v17, %s6065_s24  ;;  %231 = vrot.lane.b32.xlu0 %v6182_v21, %s6065_s24  ;;  %11746 = vst [vmem:[#allocation25_spill] sm:$0xff] %v6372_v5  ;;  %11747 = vst [vmem:[#allocation26_spill] sm:$0xff] %v6380_v9  ;;  %v6402_v28 = vsel %vm134_vm0, %v174_v13, %v6383_v11  ;;  %v180_v63 = vrot.slane %v6414_v48, 1  ;;  %v6428_v13 = vld [vmem:[%s11430_s0 + $0x128] sm:$0xff]  ;;  %v6703_v3 = vrot.slane %v6100_v0, 2  ;;  %s6071_s13 = smov 28  }
  0x11   :  { %11748 = vst [vmem:[#allocation27_spill] sm:$0xff] %v6383_v11  ;;  %11749 = vst [vmem:[#allocation28_spill] sm:$0xff] %v6402_v28  ;;  %v179_v53 = vsel %vm134_vm0, %v177_v38, %v178_v33  ;;  %v6646_v17 = vld [vmem:[%s11430_s0 + $0x1c8] sm:$0xff]  ;;  %s6072_s16 = smov 24   ;;  %s6075_s19 = smov 32   ;;  %vm1680_vm5 = vcmask 31744  }
  0x12   :  { %11750 = vst [vmem:[#allocation29_spill] sm:$0xff] %v6422_v58  ;;  %v6439_v38 = vsel %vm134_vm0, %v180_v63, %v6422_v58  ;;  %11776 = vst [vmem:[#allocation55_spill] sm:$0xff] %v6703_v3  ;;  %vm1794_vm6 = vcmask 97280   ;;  %vm1851_vm7 = vcmask 130048   ;;  %vm1908_vm8 = vcmask 162816  }
  0x13   :  { %11751 = vst [vmem:[#allocation30_spill] sm:$0xff] %v6439_v38  ;;  %vm1965_vm9 = vcmask 195584   ;;  %vm2022_vm10 = vcmask 228352   ;;  %vm2079_vm11 = vcmask 261120   ;;  %vm3961_vm12 = vcmask 293888  }
  0x14   :  { %237 = vrot.lane.b32.xlu1 %v6185_v22, %s6065_s24  ;;  %235 = vrot.lane.b32.xlu0 %v6204_v26, %s6065_s24  ;;  %v6624_v22 = vld [vmem:[%s11430_s0 + $0x1b8] sm:$0xff]  ;;  %vm4664_vm13 = vcmask 27648  }
  0x18   :  { %241 = vrot.lane.b32.xlu1 %v6207_v27, %s6065_s24  ;;  %239 = vrot.lane.b32.xlu0 %v6226_v31, %s6065_s24  ;;  %v6602_v31 = vld [vmem:[%s11430_s0 + $0x1a8] sm:$0xff] }
  0x1c   :  { %245 = vrot.lane.b32.xlu1 %v6229_v32, %s6065_s24  ;;  %243 = vrot.lane.b32.xlu0 %v6248_v36, %s6065_s24  ;;  %v6580_v36 = vld [vmem:[%s11430_s0 + $0x198] sm:$0xff] }
  0x20   :  { %249 = vrot.lane.b32.xlu1 %v6251_v37, %s6065_s24  ;;  %247 = vrot.lane.b32.xlu0 %v6270_v41, %s6065_s24  ;;  %v6558_v41 = vld [vmem:[%s11430_s0 + $0x188] sm:$0xff] }
  0x24   :  { %253 = vrot.lane.b32.xlu1 %v6273_v42, %s6065_s24  ;;  %251 = vrot.lane.b32.xlu0 %v6292_v46, %s6065_s24  ;;  %v6536_v46 = vld [vmem:[%s11430_s0 + $0x178] sm:$0xff] }
  0x28   :  { %257 = vrot.lane.b32.xlu1 %v6295_v47, %s6065_s24  ;;  %255 = vrot.lane.b32.xlu0 %v6314_v51, %s6065_s24  ;;  %v6492_v51 = vld [vmem:[%s11430_s0 + $0x158] sm:$0xff] }
  0x2c   :  { %261 = vrot.lane.b32.xlu1 %v6317_v52, %s6065_s24  ;;  %259 = vrot.lane.b32.xlu0 %v6336_v56, %s6065_s24  ;;  %v6475_v52 = vld [vmem:[%s11430_s0 + $0x140] sm:$0xff] }
  0x2d   :  { %v189_v47 = vrot.slane %v6475_v52, 1 }
  0x30   :  { %265 = vrot.lane.b32.xlu1 %v6339_v57, %s6065_s24  ;;  %263 = vrot.lane.b32.xlu0 %v6358_v61, %s6065_s24  ;;  %v6470_v61 = vld [vmem:[%s11430_s0 + $0x148] sm:$0xff] }
  0x31   :  { %v6486_v56 = vrot.slane %v6470_v61, 1 }
  0x33   :  { %11756 = vst [vmem:[#allocation35_spill] sm:$0xff] %v6486_v56 }
  0x34   :  { %269 = vrot.lane.b32.xlu1 %v6361_v62, %s6065_s24  ;;  %267 = vrot.lane.b32.xlu0 %v6380_v9, %s6065_s24  ;;  %v6433_v62 = vld [vmem:[%s11430_s0 + $0x120] sm:$0xff]  ;;  %v6448_v9 = vld [vmem:[%s11430_s0 + $0x138] sm:$0xff] }
  0x35   :  { %v6464_v63 = vrot.slane %v6448_v9, 1 }
  0x37   :  { %11754 = vst [vmem:[#allocation33_spill] sm:$0xff] %v6464_v63 }
  0x38   :  { %273 = vrot.lane.b32.xlu1 %v6383_v11, %s6065_s24  ;;  %271 = vrot.lane.b32.xlu0 %v6402_v28, %s6065_s24  ;;  %v6442_v11 = vrot.slane %v6428_v13, 1  ;;  %v183_v28 = vrot.slane %v6433_v62, 1 }
  0x3a   :  { %11752 = vst [vmem:[#allocation31_spill] sm:$0xff] %v6442_v11 }
  0x3c   :  { %277 = vrot.lane.b32.xlu1 %v178_v33, %s6065_s24  ;;  %275 = vrot.lane.b32.xlu0 %v179_v53, %s6065_s24  ;;  %v6453_v33 = vld [vmem:[%s11430_s0 + $0x130] sm:$0xff]  ;;  %v6461_v53 = vsel %vm134_vm0, %v183_v28, %v6442_v11 }
  0x3d   :  { %11753 = vst [vmem:[#allocation32_spill] sm:$0xff] %v6461_v53  ;;  %v186_v57 = vrot.slane %v6453_v33, 1 }
  0x3f   :  { %v6483_v28 = vsel %vm134_vm0, %v186_v57, %v6464_v63  ;;  %v6505_v57 = vsel %vm134_vm0, %v189_v47, %v6486_v56 }
  0x40   :  { %281 = vrot.lane.b32.xlu1 %v6422_v58, %s6065_s24  ;;  %279 = vrot.lane.b32.xlu0 %v6439_v38, %s6065_s24  ;;  %11755 = vst [vmem:[#allocation34_spill] sm:$0xff] %v6483_v28  ;;  %11757 = vst [vmem:[#allocation36_spill] sm:$0xff] %v6505_v57  ;;  %v6514_v38 = vld [vmem:[%s11430_s0 + $0x168] sm:$0xff] }
  0x44   :  { %285 = vrot.lane.b32.xlu1 %v6442_v11, %s6065_s24  ;;  %283 = vrot.lane.b32.xlu0 %v6461_v53, %s6065_s24  ;;  %v6497_v11 = vld [vmem:[%s11430_s0 + $0x150] sm:$0xff]  ;;  %v6508_v53 = vrot.slane %v6492_v51, 1 }
  0x45   :  { %v192_v58 = vrot.slane %v6497_v11, 1 }
  0x46   :  { %11758 = vst [vmem:[#allocation37_spill] sm:$0xff] %v6508_v53 }
  0x47   :  { %v6527_v47 = vsel %vm134_vm0, %v192_v58, %v6508_v53 }
  0x48   :  { %289 = vrot.lane.b32.xlu1 %v6464_v63, %s6065_s24  ;;  %287 = vrot.lane.b32.xlu0 %v6483_v28, %s6065_s24  ;;  %v6519_v63 = vld [vmem:[%s11430_s0 + $0x160] sm:$0xff]  ;;  %11759 = vst [vmem:[#allocation38_spill] sm:$0xff] %v6527_v47  ;;  %v6530_v28 = vrot.slane %v6514_v38, 1 }
  0x49   :  { %v195_v42 = vrot.slane %v6519_v63, 1 }
  0x4a   :  { %11760 = vst [vmem:[#allocation39_spill] sm:$0xff] %v6530_v28 }
  0x4b   :  { %v6549_v58 = vsel %vm134_vm0, %v195_v42, %v6530_v28 }
  0x4c   :  { %293 = vrot.lane.b32.xlu1 %v6486_v56, %s6065_s24  ;;  %291 = vrot.lane.b32.xlu0 %v6505_v57, %s6065_s24  ;;  %v6541_v56 = vld [vmem:[%s11430_s0 + $0x170] sm:$0xff]  ;;  %11761 = vst [vmem:[#allocation40_spill] sm:$0xff] %v6549_v58  ;;  %v6552_v57 = vrot.slane %v6536_v46, 1 }
  0x4d   :  { %v198_v37 = vrot.slane %v6541_v56, 1 }
  0x4e   :  { %11762 = vst [vmem:[#allocation41_spill] sm:$0xff] %v6552_v57 }
  0x4f   :  { %v6571_v42 = vsel %vm134_vm0, %v198_v37, %v6552_v57 }
  0x50   :  { %297 = vrot.lane.b32.xlu1 %v6508_v53, %s6065_s24  ;;  %295 = vrot.lane.b32.xlu0 %v6527_v47, %s6065_s24  ;;  %v6563_v53 = vld [vmem:[%s11430_s0 + $0x180] sm:$0xff]  ;;  %11763 = vst [vmem:[#allocation42_spill] sm:$0xff] %v6571_v42  ;;  %v6574_v47 = vrot.slane %v6558_v41, 1 }
  0x51   :  { %v201_v32 = vrot.slane %v6563_v53, 1 }
  0x52   :  { %11764 = vst [vmem:[#allocation43_spill] sm:$0xff] %v6574_v47 }
  0x53   :  { %v6593_v37 = vsel %vm134_vm0, %v201_v32, %v6574_v47 }
  0x54   :  { %301 = vrot.lane.b32.xlu1 %v6530_v28, %s6065_s24  ;;  %299 = vrot.lane.b32.xlu0 %v6549_v58, %s6065_s24  ;;  %v6585_v28 = vld [vmem:[%s11430_s0 + $0x190] sm:$0xff]  ;;  %11765 = vst [vmem:[#allocation44_spill] sm:$0xff] %v6593_v37  ;;  %v6596_v58 = vrot.slane %v6580_v36, 1 }
  0x55   :  { %v204_v27 = vrot.slane %v6585_v28, 1 }
  0x56   :  { %11766 = vst [vmem:[#allocation45_spill] sm:$0xff] %v6596_v58 }
  0x57   :  { %v6615_v32 = vsel %vm134_vm0, %v204_v27, %v6596_v58 }
  0x58   :  { %305 = vrot.lane.b32.xlu1 %v6552_v57, %s6065_s24  ;;  %303 = vrot.lane.b32.xlu0 %v6571_v42, %s6065_s24  ;;  %v6607_v57 = vld [vmem:[%s11430_s0 + $0x1a0] sm:$0xff]  ;;  %11767 = vst [vmem:[#allocation46_spill] sm:$0xff] %v6615_v32  ;;  %v6618_v42 = vrot.slane %v6602_v31, 1 }
  0x59   :  { %v207_v26 = vrot.slane %v6607_v57, 1 }
  0x5a   :  { %11768 = vst [vmem:[#allocation47_spill] sm:$0xff] %v6618_v42 }
  0x5b   :  { %v6637_v27 = vsel %vm134_vm0, %v207_v26, %v6618_v42 }
  0x5c   :  { %309 = vrot.lane.b32.xlu1 %v6574_v47, %s6065_s24  ;;  %307 = vrot.lane.b32.xlu0 %v6593_v37, %s6065_s24  ;;  %v6629_v47 = vld [vmem:[%s11430_s0 + $0x1b0] sm:$0xff]  ;;  %11769 = vst [vmem:[#allocation48_spill] sm:$0xff] %v6637_v27  ;;  %v6640_v37 = vrot.slane %v6624_v22, 1 }
  0x5d   :  { %v210_v21 = vrot.slane %v6629_v47, 1 }
  0x5e   :  { %11770 = vst [vmem:[#allocation49_spill] sm:$0xff] %v6640_v37 }
  0x5f   :  { %v6659_v26 = vsel %vm134_vm0, %v210_v21, %v6640_v37 }
  0x60   :  { %313 = vrot.lane.b32.xlu1 %v6596_v58, %s6065_s24  ;;  %311 = vrot.lane.b32.xlu0 %v6615_v32, %s6065_s24  ;;  %v6651_v58 = vld [vmem:[%s11430_s0 + $0x1c0] sm:$0xff]  ;;  %11771 = vst [vmem:[#allocation50_spill] sm:$0xff] %v6659_v26  ;;  %v6662_v32 = vrot.slane %v6646_v17, 1 }
  0x61   :  { %v213_v16 = vrot.slane %v6651_v58, 1 }
  0x62   :  { %11772 = vst [vmem:[#allocation51_spill] sm:$0xff] %v6662_v32 }
  0x63   :  { %v6681_v21 = vsel %vm134_vm0, %v213_v16, %v6662_v32  ;;  %v388_v16 = vrot.slane %v6120_v6, 2  ;;  %v6713_v6 = vrot.slane %v6125_v7, 2 }
  0x64   :  { %317 = vrot.lane.b32.xlu1 %v6618_v42, %s6065_s24  ;;  %315 = vrot.lane.b32.xlu0 %v6637_v27, %s6065_s24  ;;  %v6673_v42 = vld [vmem:[%s11430_s0 + $0x1d0] sm:$0xff]  ;;  %11773 = vst [vmem:[#allocation52_spill] sm:$0xff] %v6681_v21  ;;  %v6684_v27 = vrot.slane %v6668_v12, 1 }
  0x65   :  { %v216_v10 = vrot.slane %v6673_v42, 1  ;;  %11778 = vst [vmem:[#allocation57_spill] sm:$0xff] %v6713_v6 }
  0x66   :  { %11774 = vst [vmem:[#allocation53_spill] sm:$0xff] %v6684_v27 }
  0x68   :  { %321 = vrot.lane.b32.xlu1 %v6640_v37, %s6065_s24  ;;  %319 = vrot.lane.b32.xlu0 %v6659_v26, %s6065_s24  ;;  %v6693_v37 = vsel %vm134_vm0, %v216_v10, %v6684_v27  ;;  %v389_v26 = vrot.slane %v6105_v1, 2  ;;  %v394_v10 = vrot.slane %v6130_v8, 2 }
  0x69   :  { %11775 = vst [vmem:[#allocation54_spill] sm:$0xff] %v6693_v37 }
  0x6c   :  { %325 = vrot.lane.b32.xlu1 %v6662_v32, %s6065_s24  ;;  %323 = vrot.lane.b32.xlu0 %v6681_v21, %s6065_s24  ;;  %v390_v32 = vsel %vm387_vm1, %v388_v16, %v389_v26  ;;  %v391_v21 = vrot.slane %v6110_v2, 2 }
  0x6e   :  { %v6710_v1 = vsel %vm387_vm1, %v391_v21, %v6703_v3  ;;  %v397_v21 = vrot.slane %v6153_v15, 2 }
  0x6f   :  { %11777 = vst [vmem:[#allocation56_spill] sm:$0xff] %v6710_v1 }
  0x70   :  { %329 = vrot.lane.b32.xlu1 %v6684_v27, %s6065_s24  ;;  %327 = vrot.lane.b32.xlu0 %v6693_v37, %s6065_s24  ;;  %s6067_s24 = smov 12  }
  0x74   :  { %474 = vrot.lane.b32.xlu1 %v389_v26, %s6066_s20  ;;  %472 = vrot.lane.b32.xlu0 %v390_v32, %s6066_s20  ;;  %v6726_v32 = vsel %vm387_vm1, %v394_v10, %v6713_v6  ;;  %v6729_v26 = vrot.slane %v6148_v14, 2  ;;  %v6745_v10 = vrot.slane %v6169_v19, 2 }
  0x75   :  { %11781 = vst [vmem:[#allocation60_spill] sm:$0xff] %v6726_v32 }
  0x76   :  { %v6716_v16 = vpop.permute.xlu1 %225  ;;  %v6718_v27 = vpop.permute.xlu0 %221  ;;  %11782 = vst [vmem:[#allocation61_spill] sm:$0xff] %v6729_v26  ;;  %11786 = vst [vmem:[#allocation65_spill] sm:$0xff] %v6745_v10 }
  0x77   :  { %11779 = vst [vmem:[#allocation58_spill] sm:$0xff] %v6716_v16  ;;  %11780 = vst [vmem:[#allocation59_spill] sm:$0xff] %v6718_v27  ;;  %v6742_v27 = vsel %vm387_vm1, %v397_v21, %v6729_v26  ;;  %v6761_v21 = vrot.slane %v6191_v24, 2 }
  0x78   :  { %478 = vrot.lane.b32.xlu1 %v6703_v3, %s6066_s20  ;;  %476 = vrot.lane.b32.xlu0 %v6710_v1, %s6066_s20  ;;  %11785 = vst [vmem:[#allocation64_spill] sm:$0xff] %v6742_v27  ;;  %v400_v3 = vrot.slane %v6174_v20, 2 }
  0x79   :  { %11790 = vst [vmem:[#allocation69_spill] sm:$0xff] %v6761_v21 }
  0x7a   :  { %v6732_v37 = vpop.permute.xlu1 %223  ;;  %v6734_v16 = vpop.permute.xlu0 %219 }
  0x7b   :  { %11783 = vst [vmem:[#allocation62_spill] sm:$0xff] %v6732_v37  ;;  %11784 = vst [vmem:[#allocation63_spill] sm:$0xff] %v6734_v16  ;;  %v6758_v16 = vsel %vm387_vm1, %v400_v3, %v6745_v10  ;;  %v6777_v3 = vrot.slane %v6213_v29, 2 }
  0x7c   :  { %482 = vrot.lane.b32.xlu1 %v6713_v6, %s6066_s20  ;;  %480 = vrot.lane.b32.xlu0 %v6726_v32, %s6066_s20  ;;  %11789 = vst [vmem:[#allocation68_spill] sm:$0xff] %v6758_v16  ;;  %v403_v6 = vrot.slane %v6196_v25, 2 }
  0x7d   :  { %11794 = vst [vmem:[#allocation73_spill] sm:$0xff] %v6777_v3 }
  0x7e   :  { %v6748_v1 = vpop.permute.xlu1 %229  ;;  %v6750_v37 = vpop.permute.xlu0 %227 }
  0x7f   :  { %11787 = vst [vmem:[#allocation66_spill] sm:$0xff] %v6748_v1  ;;  %11788 = vst [vmem:[#allocation67_spill] sm:$0xff] %v6750_v37  ;;  %v6774_v37 = vsel %vm387_vm1, %v403_v6, %v6761_v21  ;;  %v6793_v6 = vrot.slane %v6235_v34, 2 }
  0x80   :  { %486 = vrot.lane.b32.xlu1 %v6729_v26, %s6066_s20  ;;  %484 = vrot.lane.b32.xlu0 %v6742_v27, %s6066_s20  ;;  %11793 = vst [vmem:[#allocation72_spill] sm:$0xff] %v6774_v37  ;;  %v406_v26 = vrot.slane %v6218_v30, 2 }
  0x81   :  { %11798 = vst [vmem:[#allocation77_spill] sm:$0xff] %v6793_v6 }
  0x82   :  { %v6764_v32 = vpop.permute.xlu1 %233  ;;  %v6766_v1 = vpop.permute.xlu0 %231 }
  0x83   :  { %11791 = vst [vmem:[#allocation70_spill] sm:$0xff] %v6764_v32  ;;  %11792 = vst [vmem:[#allocation71_spill] sm:$0xff] %v6766_v1  ;;  %v6790_v1 = vsel %vm387_vm1, %v406_v26, %v6777_v3  ;;  %v6809_v26 = vrot.slane %v6257_v39, 2 }
  0x84   :  { %490 = vrot.lane.b32.xlu1 %v6745_v10, %s6066_s20  ;;  %488 = vrot.lane.b32.xlu0 %v6758_v16, %s6066_s20  ;;  %11797 = vst [vmem:[#allocation76_spill] sm:$0xff] %v6790_v1  ;;  %v409_v10 = vrot.slane %v6240_v35, 2 }
  0x85   :  { %11802 = vst [vmem:[#allocation81_spill] sm:$0xff] %v6809_v26 }
  0x86   :  { %v6780_v27 = vpop.permute.xlu1 %237  ;;  %v6782_v32 = vpop.permute.xlu0 %235 }
  0x87   :  { %11795 = vst [vmem:[#allocation74_spill] sm:$0xff] %v6780_v27  ;;  %11796 = vst [vmem:[#allocation75_spill] sm:$0xff] %v6782_v32  ;;  %v6806_v32 = vsel %vm387_vm1, %v409_v10, %v6793_v6  ;;  %v6825_v10 = vrot.slane %v6279_v44, 2 }
  0x88   :  { %494 = vrot.lane.b32.xlu1 %v6761_v21, %s6066_s20  ;;  %492 = vrot.lane.b32.xlu0 %v6774_v37, %s6066_s20  ;;  %11801 = vst [vmem:[#allocation80_spill] sm:$0xff] %v6806_v32  ;;  %v412_v21 = vrot.slane %v6262_v40, 2 }
  0x89   :  { %11806 = vst [vmem:[#allocation85_spill] sm:$0xff] %v6825_v10 }
  0x8a   :  { %v6796_v16 = vpop.permute.xlu1 %241  ;;  %v6798_v27 = vpop.permute.xlu0 %239 }
  0x8b   :  { %11799 = vst [vmem:[#allocation78_spill] sm:$0xff] %v6796_v16  ;;  %11800 = vst [vmem:[#allocation79_spill] sm:$0xff] %v6798_v27  ;;  %v6822_v27 = vsel %vm387_vm1, %v412_v21, %v6809_v26  ;;  %v6841_v21 = vrot.slane %v6301_v49, 2 }
  0x8c   :  { %498 = vrot.lane.b32.xlu1 %v6777_v3, %s6066_s20  ;;  %496 = vrot.lane.b32.xlu0 %v6790_v1, %s6066_s20  ;;  %11805 = vst [vmem:[#allocation84_spill] sm:$0xff] %v6822_v27  ;;  %v415_v3 = vrot.slane %v6284_v45, 2 }
  0x8d   :  { %11810 = vst [vmem:[#allocation89_spill] sm:$0xff] %v6841_v21 }
  0x8e   :  { %v6812_v37 = vpop.permute.xlu1 %245  ;;  %v6814_v16 = vpop.permute.xlu0 %243 }
  0x8f   :  { %11803 = vst [vmem:[#allocation82_spill] sm:$0xff] %v6812_v37  ;;  %11804 = vst [vmem:[#allocation83_spill] sm:$0xff] %v6814_v16  ;;  %v6838_v16 = vsel %vm387_vm1, %v415_v3, %v6825_v10  ;;  %v6857_v3 = vrot.slane %v6323_v54, 2 }
  0x90   :  { %502 = vrot.lane.b32.xlu1 %v6793_v6, %s6066_s20  ;;  %500 = vrot.lane.b32.xlu0 %v6806_v32, %s6066_s20  ;;  %11809 = vst [vmem:[#allocation88_spill] sm:$0xff] %v6838_v16  ;;  %v418_v6 = vrot.slane %v6306_v50, 2 }
  0x91   :  { %11814 = vst [vmem:[#allocation93_spill] sm:$0xff] %v6857_v3 }
  0x92   :  { %v6828_v1 = vpop.permute.xlu1 %249  ;;  %v6830_v37 = vpop.permute.xlu0 %247 }
  0x93   :  { %11807 = vst [vmem:[#allocation86_spill] sm:$0xff] %v6828_v1  ;;  %11808 = vst [vmem:[#allocation87_spill] sm:$0xff] %v6830_v37  ;;  %v6854_v37 = vsel %vm387_vm1, %v418_v6, %v6841_v21  ;;  %v6873_v6 = vrot.slane %v6345_v59, 2 }
  0x94   :  { %506 = vrot.lane.b32.xlu1 %v6809_v26, %s6066_s20  ;;  %504 = vrot.lane.b32.xlu0 %v6822_v27, %s6066_s20  ;;  %11813 = vst [vmem:[#allocation92_spill] sm:$0xff] %v6854_v37  ;;  %v421_v26 = vrot.slane %v6328_v55, 2 }
  0x95   :  { %11818 = vst [vmem:[#allocation97_spill] sm:$0xff] %v6873_v6 }
  0x96   :  { %v6844_v32 = vpop.permute.xlu1 %253  ;;  %v6846_v1 = vpop.permute.xlu0 %251 }
  0x97   :  { %11811 = vst [vmem:[#allocation90_spill] sm:$0xff] %v6844_v32  ;;  %11812 = vst [vmem:[#allocation91_spill] sm:$0xff] %v6846_v1  ;;  %v6870_v1 = vsel %vm387_vm1, %v421_v26, %v6857_v3  ;;  %v6889_v26 = vrot.slane %v6367_v4, 2 }
  0x98   :  { %510 = vrot.lane.b32.xlu1 %v6825_v10, %s6066_s20  ;;  %508 = vrot.lane.b32.xlu0 %v6838_v16, %s6066_s20  ;;  %11817 = vst [vmem:[#allocation96_spill] sm:$0xff] %v6870_v1  ;;  %v424_v10 = vrot.slane %v6350_v60, 2 }
  0x99   :  { %11822 = vst [vmem:[#allocation101_spill] sm:$0xff] %v6889_v26 }
  0x9a   :  { %v6860_v27 = vpop.permute.xlu1 %257  ;;  %v6862_v32 = vpop.permute.xlu0 %255 }
  0x9b   :  { %11815 = vst [vmem:[#allocation94_spill] sm:$0xff] %v6860_v27  ;;  %11816 = vst [vmem:[#allocation95_spill] sm:$0xff] %v6862_v32  ;;  %v6886_v32 = vsel %vm387_vm1, %v424_v10, %v6873_v6  ;;  %v431_v10 = vrot.slane %v6389_v18, 2 }
  0x9c   :  { %514 = vrot.lane.b32.xlu1 %v6841_v21, %s6066_s20  ;;  %512 = vrot.lane.b32.xlu0 %v6854_v37, %s6066_s20  ;;  %11821 = vst [vmem:[#allocation100_spill] sm:$0xff] %v6886_v32  ;;  %v427_v21 = vrot.slane %v6372_v5, 2 }
  0x9e   :  { %v6876_v16 = vpop.permute.xlu1 %261  ;;  %v6878_v27 = vpop.permute.xlu0 %259 }
  0x9f   :  { %11819 = vst [vmem:[#allocation98_spill] sm:$0xff] %v6876_v16  ;;  %11820 = vst [vmem:[#allocation99_spill] sm:$0xff] %v6878_v27  ;;  %v6902_v27 = vsel %vm387_vm1, %v427_v21, %v6889_v26  ;;  %v433_v21 = vrot.slane %v6414_v48, 2 }
  0xa0   :  { %518 = vrot.lane.b32.xlu1 %v6857_v3, %s6066_s20  ;;  %516 = vrot.lane.b32.xlu0 %v6870_v1, %s6066_s20  ;;  %11825 = vst [vmem:[#allocation104_spill] sm:$0xff] %v6902_v27  ;;  %v430_v3 = vrot.slane %v6394_v23, 2 }
  0xa2   :  { %v6892_v37 = vpop.permute.xlu1 %265  ;;  %v6894_v16 = vpop.permute.xlu0 %263 }
  0xa3   :  { %11823 = vst [vmem:[#allocation102_spill] sm:$0xff] %v6892_v37  ;;  %11824 = vst [vmem:[#allocation103_spill] sm:$0xff] %v6894_v16  ;;  %v432_v37 = vsel %vm387_vm1, %v430_v3, %v431_v10  ;;  %v6916_v16 = vrot.slane %v6409_v43, 2  ;;  %v436_v3 = vrot.slane %v6433_v62, 2 }
  0xa4   :  { %522 = vrot.lane.b32.xlu1 %v6873_v6, %s6066_s20  ;;  %520 = vrot.lane.b32.xlu0 %v6886_v32, %s6066_s20 }
  0xa6   :  { %v6906_v1 = vpop.permute.xlu1 %269  ;;  %v6908_v5 = vpop.permute.xlu0 %267 }
  0xa7   :  { %11826 = vst [vmem:[#allocation105_spill] sm:$0xff] %v6906_v1  ;;  %11827 = vst [vmem:[#allocation106_spill] sm:$0xff] %v6908_v5  ;;  %v6927_v1 = vsel %vm387_vm1, %v433_v21, %v6916_v16  ;;  %v6930_v5 = vrot.slane %v6428_v13, 2  ;;  %v439_v21 = vrot.slane %v6453_v33, 2 }
  0xa8   :  { %526 = vrot.lane.b32.xlu1 %v6889_v26, %s6066_s20  ;;  %524 = vrot.lane.b32.xlu0 %v6902_v27, %s6066_s20 }
  0xa9   :  { %11830 = vst [vmem:[#allocation109_spill] sm:$0xff] %v6930_v5 }
  0xaa   :  { %v6919_v18 = vpop.permute.xlu1 %273  ;;  %v6921_v23 = vpop.permute.xlu0 %271 }
  0xab   :  { %11828 = vst [vmem:[#allocation107_spill] sm:$0xff] %v6919_v18  ;;  %11829 = vst [vmem:[#allocation108_spill] sm:$0xff] %v6921_v23 }
  0xac   :  { %530 = vrot.lane.b32.xlu1 %v431_v10, %s6066_s20  ;;  %528 = vrot.lane.b32.xlu0 %v432_v37, %s6066_s20  ;;  %v6943_v37 = vsel %vm387_vm1, %v436_v3, %v6930_v5  ;;  %v6946_v10 = vrot.slane %v6448_v9, 2  ;;  %v6962_v3 = vrot.slane %v6470_v61, 2 }
  0xae   :  { %v6933_v26 = vpop.permute.xlu1 %277  ;;  %v6935_v27 = vpop.permute.xlu0 %275  ;;  %11833 = vst [vmem:[#allocation112_spill] sm:$0xff] %v6946_v10  ;;  %v6959_v6 = vsel %vm387_vm1, %v439_v21, %v6946_v10  ;;  %11837 = vst [vmem:[#allocation116_spill] sm:$0xff] %v6962_v3  ;;  %v6978_v21 = vrot.slane %v6492_v51, 2 }
  0xaf   :  { %11831 = vst [vmem:[#allocation110_spill] sm:$0xff] %v6933_v26  ;;  %11832 = vst [vmem:[#allocation111_spill] sm:$0xff] %v6935_v27  ;;  %v442_v26 = vrot.slane %v6475_v52, 2  ;;  %v445_v27 = vrot.slane %v6497_v11, 2 }
  0xb0   :  { %534 = vrot.lane.b32.xlu1 %v6916_v16, %s6066_s20  ;;  %532 = vrot.lane.b32.xlu0 %v6927_v1, %s6066_s20  ;;  %11836 = vst [vmem:[#allocation115_spill] sm:$0xff] %v6959_v6  ;;  %11841 = vst [vmem:[#allocation120_spill] sm:$0xff] %v6978_v21 }
  0xb2   :  { %v6949_v18 = vpop.permute.xlu1 %281  ;;  %v6951_v23 = vpop.permute.xlu0 %279 }
  0xb3   :  { %11834 = vst [vmem:[#allocation113_spill] sm:$0xff] %v6949_v18  ;;  %11835 = vst [vmem:[#allocation114_spill] sm:$0xff] %v6951_v23  ;;  %v6975_v23 = vsel %vm387_vm1, %v442_v26, %v6962_v3  ;;  %v6994_v26 = vrot.slane %v6514_v38, 2 }
  0xb4   :  { %538 = vrot.lane.b32.xlu1 %v6930_v5, %s6066_s20  ;;  %536 = vrot.lane.b32.xlu0 %v6943_v37, %s6066_s20  ;;  %11840 = vst [vmem:[#allocation119_spill] sm:$0xff] %v6975_v23 }
  0xb5   :  { %11845 = vst [vmem:[#allocation124_spill] sm:$0xff] %v6994_v26 }
  0xb6   :  { %v6965_v32 = vpop.permute.xlu1 %285  ;;  %v6967_v18 = vpop.permute.xlu0 %283 }
  0xb7   :  { %11838 = vst [vmem:[#allocation117_spill] sm:$0xff] %v6965_v32  ;;  %11839 = vst [vmem:[#allocation118_spill] sm:$0xff] %v6967_v18  ;;  %v6991_v18 = vsel %vm387_vm1, %v445_v27, %v6978_v21  ;;  %v7010_v27 = vrot.slane %v6536_v46, 2 }
  0xb8   :  { %542 = vrot.lane.b32.xlu1 %v6946_v10, %s6066_s20  ;;  %540 = vrot.lane.b32.xlu0 %v6959_v6, %s6066_s20  ;;  %11844 = vst [vmem:[#allocation123_spill] sm:$0xff] %v6991_v18  ;;  %v448_v10 = vrot.slane %v6519_v63, 2 }
  0xb9   :  { %11849 = vst [vmem:[#allocation128_spill] sm:$0xff] %v7010_v27 }
  0xba   :  { %v6981_v5 = vpop.permute.xlu1 %289  ;;  %v6983_v32 = vpop.permute.xlu0 %287 }
  0xbb   :  { %11842 = vst [vmem:[#allocation121_spill] sm:$0xff] %v6981_v5  ;;  %11843 = vst [vmem:[#allocation122_spill] sm:$0xff] %v6983_v32  ;;  %v7007_v32 = vsel %vm387_vm1, %v448_v10, %v6994_v26  ;;  %v7026_v10 = vrot.slane %v6558_v41, 2 }
  0xbc   :  { %546 = vrot.lane.b32.xlu1 %v6962_v3, %s6066_s20  ;;  %544 = vrot.lane.b32.xlu0 %v6975_v23, %s6066_s20  ;;  %11848 = vst [vmem:[#allocation127_spill] sm:$0xff] %v7007_v32  ;;  %v451_v3 = vrot.slane %v6541_v56, 2 }
  0xbd   :  { %11853 = vst [vmem:[#allocation132_spill] sm:$0xff] %v7026_v10 }
  0xbe   :  { %v6997_v6 = vpop.permute.xlu1 %293  ;;  %v6999_v5 = vpop.permute.xlu0 %291 }
  0xbf   :  { %11846 = vst [vmem:[#allocation125_spill] sm:$0xff] %v6997_v6  ;;  %11847 = vst [vmem:[#allocation126_spill] sm:$0xff] %v6999_v5  ;;  %v7023_v5 = vsel %vm387_vm1, %v451_v3, %v7010_v27  ;;  %v7042_v3 = vrot.slane %v6580_v36, 2 }
  0xc0   :  { %550 = vrot.lane.b32.xlu1 %v6978_v21, %s6066_s20  ;;  %548 = vrot.lane.b32.xlu0 %v6991_v18, %s6066_s20  ;;  %11852 = vst [vmem:[#allocation131_spill] sm:$0xff] %v7023_v5  ;;  %v454_v21 = vrot.slane %v6563_v53, 2 }
  0xc1   :  { %11857 = vst [vmem:[#allocation136_spill] sm:$0xff] %v7042_v3 }
  0xc2   :  { %v7013_v23 = vpop.permute.xlu1 %297  ;;  %v7015_v6 = vpop.permute.xlu0 %295 }
  0xc3   :  { %11850 = vst [vmem:[#allocation129_spill] sm:$0xff] %v7013_v23  ;;  %11851 = vst [vmem:[#allocation130_spill] sm:$0xff] %v7015_v6  ;;  %v7039_v6 = vsel %vm387_vm1, %v454_v21, %v7026_v10  ;;  %v7058_v21 = vrot.slane %v6602_v31, 2 }
  0xc4   :  { %554 = vrot.lane.b32.xlu1 %v6994_v26, %s6066_s20  ;;  %552 = vrot.lane.b32.xlu0 %v7007_v32, %s6066_s20  ;;  %11856 = vst [vmem:[#allocation135_spill] sm:$0xff] %v7039_v6  ;;  %v457_v26 = vrot.slane %v6585_v28, 2 }
  0xc5   :  { %11861 = vst [vmem:[#allocation140_spill] sm:$0xff] %v7058_v21 }
  0xc6   :  { %v7029_v18 = vpop.permute.xlu1 %301  ;;  %v7031_v23 = vpop.permute.xlu0 %299 }
  0xc7   :  { %11854 = vst [vmem:[#allocation133_spill] sm:$0xff] %v7029_v18  ;;  %11855 = vst [vmem:[#allocation134_spill] sm:$0xff] %v7031_v23  ;;  %v7055_v23 = vsel %vm387_vm1, %v457_v26, %v7042_v3  ;;  %v7074_v26 = vrot.slane %v6624_v22, 2 }
  0xc8   :  { %558 = vrot.lane.b32.xlu1 %v7010_v27, %s6066_s20  ;;  %556 = vrot.lane.b32.xlu0 %v7023_v5, %s6066_s20  ;;  %11860 = vst [vmem:[#allocation139_spill] sm:$0xff] %v7055_v23  ;;  %v460_v27 = vrot.slane %v6607_v57, 2 }
  0xc9   :  { %11865 = vst [vmem:[#allocation144_spill] sm:$0xff] %v7074_v26 }
  0xca   :  { %v7045_v32 = vpop.permute.xlu1 %305  ;;  %v7047_v18 = vpop.permute.xlu0 %303 }
  0xcb   :  { %11858 = vst [vmem:[#allocation137_spill] sm:$0xff] %v7045_v32  ;;  %11859 = vst [vmem:[#allocation138_spill] sm:$0xff] %v7047_v18  ;;  %v7071_v18 = vsel %vm387_vm1, %v460_v27, %v7058_v21  ;;  %v7090_v27 = vrot.slane %v6646_v17, 2 }
  0xcc   :  { %562 = vrot.lane.b32.xlu1 %v7026_v10, %s6066_s20  ;;  %560 = vrot.lane.b32.xlu0 %v7039_v6, %s6066_s20  ;;  %11864 = vst [vmem:[#allocation143_spill] sm:$0xff] %v7071_v18  ;;  %v463_v10 = vrot.slane %v6629_v47, 2 }
  0xcd   :  { %11869 = vst [vmem:[#allocation148_spill] sm:$0xff] %v7090_v27 }
  0xce   :  { %v7061_v5 = vpop.permute.xlu1 %309  ;;  %v7063_v32 = vpop.permute.xlu0 %307 }
  0xcf   :  { %11862 = vst [vmem:[#allocation141_spill] sm:$0xff] %v7061_v5  ;;  %11863 = vst [vmem:[#allocation142_spill] sm:$0xff] %v7063_v32  ;;  %v7087_v32 = vsel %vm387_vm1, %v463_v10, %v7074_v26  ;;  %v7106_v10 = vrot.slane %v6668_v12, 2 }
  0xd0   :  { %566 = vrot.lane.b32.xlu1 %v7042_v3, %s6066_s20  ;;  %564 = vrot.lane.b32.xlu0 %v7055_v23, %s6066_s20  ;;  %11868 = vst [vmem:[#allocation147_spill] sm:$0xff] %v7087_v32  ;;  %v466_v3 = vrot.slane %v6651_v58, 2 }
  0xd1   :  { %11873 = vst [vmem:[#allocation152_spill] sm:$0xff] %v7106_v10 }
  0xd2   :  { %v7077_v6 = vpop.permute.xlu1 %313  ;;  %v7079_v5 = vpop.permute.xlu0 %311 }
  0xd3   :  { %11866 = vst [vmem:[#allocation145_spill] sm:$0xff] %v7077_v6  ;;  %11867 = vst [vmem:[#allocation146_spill] sm:$0xff] %v7079_v5  ;;  %v7103_v5 = vsel %vm387_vm1, %v466_v3, %v7090_v27 }
  0xd4   :  { %570 = vrot.lane.b32.xlu1 %v7058_v21, %s6066_s20  ;;  %568 = vrot.lane.b32.xlu0 %v7071_v18, %s6066_s20  ;;  %11872 = vst [vmem:[#allocation151_spill] sm:$0xff] %v7103_v5  ;;  %v469_v21 = vrot.slane %v6673_v42, 2 }
  0xd6   :  { %v7093_v23 = vpop.permute.xlu1 %317  ;;  %v7095_v6 = vpop.permute.xlu0 %315 }
  0xd7   :  { %11870 = vst [vmem:[#allocation149_spill] sm:$0xff] %v7093_v23  ;;  %11871 = vst [vmem:[#allocation150_spill] sm:$0xff] %v7095_v6  ;;  %v7119_v6 = vsel %vm387_vm1, %v469_v21, %v7106_v10 }
  0xd8   :  { %574 = vrot.lane.b32.xlu1 %v7074_v26, %s6066_s20  ;;  %572 = vrot.lane.b32.xlu0 %v7087_v32, %s6066_s20  ;;  %11876 = vst [vmem:[#allocation155_spill] sm:$0xff] %v7119_v6  ;;  %v7452_v32 = vld [vmem:[%s11430_s0 + $0x28] sm:$0xff] }
  0xda   :  { %v7109_v18 = vpop.permute.xlu1 %321  ;;  %v7111_v23 = vpop.permute.xlu0 %319 }
  0xdb   :  { %11874 = vst [vmem:[#allocation153_spill] sm:$0xff] %v7109_v18  ;;  %11875 = vst [vmem:[#allocation154_spill] sm:$0xff] %v7111_v23 }
  0xdc   :  { %578 = vrot.lane.b32.xlu1 %v7090_v27, %s6066_s20  ;;  %576 = vrot.lane.b32.xlu0 %v7103_v5, %s6066_s20  ;;  %v11934_v27 = vld [vmem:[#allocation11_spill] sm:$0xff]  ;;  %v11936_v5 = vld [vmem:[#allocation60_spill] sm:$0xff] }
  0xde   :  { %v7121_v3 = vpop.permute.xlu1 %325  ;;  %v7123_v26 = vpop.permute.xlu0 %323 }
  0xdf   :  { %11877 = vst [vmem:[#allocation156_spill] sm:$0xff] %v7121_v3  ;;  %11878 = vst [vmem:[#allocation157_spill] sm:$0xff] %v7123_v26 }
  0xe0   :  { %582 = vrot.lane.b32.xlu1 %v7106_v10, %s6066_s20  ;;  %580 = vrot.lane.b32.xlu0 %v7119_v6, %s6066_s20 }
  0xe2   :  { %v7129_v18 = vpop.permute.xlu1 %329  ;;  %v7131_v23 = vpop.permute.xlu0 %327 }
  0xe3   :  { %11879 = vst [vmem:[#allocation158_spill] sm:$0xff] %v7129_v18  ;;  %11880 = vst [vmem:[#allocation159_spill] sm:$0xff] %v7131_v23 }
  0xe4   :  { %646 = vrot.lane.b32.xlu1 %v6100_v0, %s6067_s24  ;;  %644 = vrot.lane.b32.xlu0 %v6110_v2, %s6067_s24 }
  0xe6   :  { %v7137_v21 = vpop.permute.xlu1 %474  ;;  %v7139_v3 = vpop.permute.xlu0 %472 }
  0xe8   :  { %650 = vrot.lane.b32.xlu1 %v6125_v7, %s6067_s24  ;;  %648 = vrot.lane.b32.xlu0 %v6130_v8, %s6067_s24 }
  0xea   :  { %v7145_v18 = vpop.permute.xlu1 %478  ;;  %v7147_v23 = vpop.permute.xlu0 %476 }
  0xec   :  { %654 = vrot.lane.b32.xlu1 %v6148_v14, %s6067_s24  ;;  %652 = vrot.lane.b32.xlu0 %v6153_v15, %s6067_s24 }
  0xee   :  { %v7153_v0 = vpop.permute.xlu1 %482  ;;  %v7155_v2 = vpop.permute.xlu0 %480 }
  0xf0   :  { %658 = vrot.lane.b32.xlu1 %v6169_v19, %s6067_s24  ;;  %656 = vrot.lane.b32.xlu0 %v6174_v20, %s6067_s24 }
  0xf2   :  { %v7161_v7 = vpop.permute.xlu1 %486  ;;  %v7163_v8 = vpop.permute.xlu0 %484 }
  0xf4   :  { %662 = vrot.lane.b32.xlu1 %v6191_v24, %s6067_s24  ;;  %660 = vrot.lane.b32.xlu0 %v6196_v25, %s6067_s24 }
  0xf6   :  { %v7169_v14 = vpop.permute.xlu1 %490  ;;  %v7171_v15 = vpop.permute.xlu0 %488 }
  0xf8   :  { %666 = vrot.lane.b32.xlu1 %v6213_v29, %s6067_s24  ;;  %664 = vrot.lane.b32.xlu0 %v6218_v30, %s6067_s24 }
  0xfa   :  { %v7177_v19 = vpop.permute.xlu1 %494  ;;  %v7179_v20 = vpop.permute.xlu0 %492 }
  0xfc   :  { %670 = vrot.lane.b32.xlu1 %v6235_v34, %s6067_s24  ;;  %668 = vrot.lane.b32.xlu0 %v6240_v35, %s6067_s24 }
  0xfe   :  { %v7185_v24 = vpop.permute.xlu1 %498  ;;  %v7187_v25 = vpop.permute.xlu0 %496 }
  0xff   :  { %11881 = vst [vmem:[#allocation160_spill] sm:$0xff] %v7185_v24 }
 0x100   :  { %674 = vrot.lane.b32.xlu1 %v6257_v39, %s6067_s24  ;;  %672 = vrot.lane.b32.xlu0 %v6262_v40, %s6067_s24 }
 0x102   :  { %v7193_v29 = vpop.permute.xlu1 %502  ;;  %v7195_v30 = vpop.permute.xlu0 %500 }
 0x103   :  { %11882 = vst [vmem:[#allocation161_spill] sm:$0xff] %v7193_v29  ;;  %11883 = vst [vmem:[#allocation162_spill] sm:$0xff] %v7195_v30  ;;  %v2196_v29 = vlaneseq }
 0x104   :  { %678 = vrot.lane.b32.xlu1 %v6279_v44, %s6067_s24  ;;  %676 = vrot.lane.b32.xlu0 %v6284_v45, %s6067_s24 }
 0x106   :  { %v7201_v34 = vpop.permute.xlu1 %506  ;;  %v7203_v35 = vpop.permute.xlu0 %504 }
 0x107   :  { %11884 = vst [vmem:[#allocation163_spill] sm:$0xff] %v7201_v34  ;;  %11885 = vst [vmem:[#allocation164_spill] sm:$0xff] %v7203_v35  ;;  %v6076_v35 = vmov 1983009808  }
 0x108   :  { %682 = vrot.lane.b32.xlu1 %v6301_v49, %s6067_s24  ;;  %680 = vrot.lane.b32.xlu0 %v6306_v50, %s6067_s24 }
 0x10a   :  { %v7209_v39 = vpop.permute.xlu1 %510  ;;  %v7211_v40 = vpop.permute.xlu0 %508 }
 0x10b   :  { %11886 = vst [vmem:[#allocation165_spill] sm:$0xff] %v7209_v39  ;;  %11887 = vst [vmem:[#allocation166_spill] sm:$0xff] %v7211_v40  ;;  %v11973_v40 = vld [vmem:[#allocation13_spill] sm:$0xff] }
 0x10c   :  { %686 = vrot.lane.b32.xlu1 %v6323_v54, %s6067_s24  ;;  %684 = vrot.lane.b32.xlu0 %v6328_v55, %s6067_s24  ;;  %v11892_v54 = vld [vmem:[#allocation25_spill] sm:$0xff]  ;;  %v43_v55 = vld [vmem:[%s11430_s0 + $0xe8] sm:$0xff] }
 0x10e   :  { %v7217_v44 = vpop.permute.xlu1 %514  ;;  %v7219_v45 = vpop.permute.xlu0 %512 }
 0x10f   :  { %11888 = vst [vmem:[#allocation167_spill] sm:$0xff] %v7217_v44  ;;  %11889 = vst [vmem:[#allocation168_spill] sm:$0xff] %v7219_v45 }
 0x110   :  { %690 = vrot.lane.b32.xlu1 %v6345_v59, %s6067_s24  ;;  %688 = vrot.lane.b32.xlu0 %v6350_v60, %s6067_s24  ;;  %v42_v59 = vld [vmem:[%s11430_s0 + $0xe0] sm:$0xff] }
 0x112   :  { %v7225_v49 = vpop.permute.xlu1 %518  ;;  %v7227_v50 = vpop.permute.xlu0 %516 }
 0x113   :  { %11890 = vst [vmem:[#allocation169_spill] sm:$0xff] %v7225_v49  ;;  %11891 = vst [vmem:[#allocation170_spill] sm:$0xff] %v7227_v50  ;;  %v11942_v49 = vld [vmem:[#allocation57_spill] sm:$0xff] }
 0x114   :  { %694 = vrot.lane.b32.xlu1 %v6367_v4, %s6067_s24  ;;  %692 = vrot.lane.b32.xlu0 %v11892_v54, %s6067_s24 }
 0x116   :  { %v7239_v26 = vpop.permute.xlu1 %522  ;;  %v7241_v60 = vpop.permute.xlu0 %520 }
 0x117   :  { %11893 = vst [vmem:[#allocation25_spill] sm:$0xff] %v7239_v26  ;;  %11894 = vst [vmem:[#allocation171_spill] sm:$0xff] %v7241_v60 }
 0x118   :  { %698 = vrot.lane.b32.xlu1 %v43_v55, %s6067_s24  ;;  %696 = vrot.lane.b32.xlu0 %v42_v59, %s6067_s24 }
 0x11a   :  { %v7245_v4 = vpop.permute.xlu1 %526  ;;  %v7247_v10 = vpop.permute.xlu0 %524 }
 0x11b   :  { %11895 = vst [vmem:[#allocation172_spill] sm:$0xff] %v7245_v4  ;;  %11896 = vst [vmem:[#allocation173_spill] sm:$0xff] %v7247_v10  ;;  %v6069_v4 = vmov 0.0|0.0   ;;  %v11933_v10 = vld [vmem:[#allocation56_spill] sm:$0xff] }
 0x11c   :  { %702 = vrot.lane.b32.xlu1 %v6409_v43, %s6067_s24  ;;  %700 = vrot.lane.b32.xlu0 %v6414_v48, %s6067_s24 }
 0x11d   :  { %5951 = vmatprep.subr.bf16.mxu0 %v6069_v4  ;;  %5957 = vmatprep.subr.bf16.mxu1 %v6069_v4 }
 0x11e   :  { %v7253_v54 = vpop.permute.xlu1 %530  ;;  %v7255_v6 = vpop.permute.xlu0 %528 }
 0x11f   :  { %11897 = vst [vmem:[#allocation174_spill] sm:$0xff] %v7253_v54  ;;  %11898 = vst [vmem:[#allocation175_spill] sm:$0xff] %v7255_v6 }
 0x120   :  { %706 = vrot.lane.b32.xlu1 %v6428_v13, %s6067_s24  ;;  %704 = vrot.lane.b32.xlu0 %v6433_v62, %s6067_s24 }
 0x122   :  { %v7261_v55 = vpop.permute.xlu1 %534  ;;  %v7263_v59 = vpop.permute.xlu0 %532 }
 0x123   :  { %11899 = vst [vmem:[#allocation176_spill] sm:$0xff] %v7261_v55  ;;  %11900 = vst [vmem:[#allocation177_spill] sm:$0xff] %v7263_v59  ;;  %v11998_v55 = vld [vmem:[#allocation17_spill] sm:$0xff] }
 0x124   :  { %710 = vrot.lane.b32.xlu1 %v6448_v9, %s6067_s24  ;;  %708 = vrot.lane.b32.xlu0 %v6453_v33, %s6067_s24 }
 0x126   :  { %v7269_v43 = vpop.permute.xlu1 %538  ;;  %v7271_v48 = vpop.permute.xlu0 %536 }
 0x127   :  { %11901 = vst [vmem:[#allocation178_spill] sm:$0xff] %v7269_v43  ;;  %11902 = vst [vmem:[#allocation179_spill] sm:$0xff] %v7271_v48  ;;  %v11993_v48 = vld [vmem:[#allocation80_spill] sm:$0xff] }
 0x128   :  { %714 = vrot.lane.b32.xlu1 %v6470_v61, %s6067_s24  ;;  %712 = vrot.lane.b32.xlu0 %v6475_v52, %s6067_s24 }
 0x12a   :  { %v7277_v62 = vpop.permute.xlu1 %542  ;;  %v7279_v13 = vpop.permute.xlu0 %540 }
 0x12b   :  { %11903 = vst [vmem:[#allocation180_spill] sm:$0xff] %v7277_v62  ;;  %11904 = vst [vmem:[#allocation181_spill] sm:$0xff] %v7279_v13  ;;  %v11955_v13 = vld [vmem:[#allocation68_spill] sm:$0xff] }
 0x12c   :  { %718 = vrot.lane.b32.xlu1 %v6492_v51, %s6067_s24  ;;  %716 = vrot.lane.b32.xlu0 %v6497_v11, %s6067_s24 }
 0x12e   :  { %v7285_v9 = vpop.permute.xlu1 %546  ;;  %v7287_v33 = vpop.permute.xlu0 %544 }
 0x12f   :  { %11905 = vst [vmem:[#allocation182_spill] sm:$0xff] %v7285_v9  ;;  %11906 = vst [vmem:[#allocation183_spill] sm:$0xff] %v7287_v33  ;;  %v11945_v33 = vld [vmem:[#allocation64_spill] sm:$0xff] }
 0x130   :  { %722 = vrot.lane.b32.xlu1 %v6514_v38, %s6067_s24  ;;  %720 = vrot.lane.b32.xlu0 %v6519_v63, %s6067_s24 }
 0x132   :  { %v7293_v52 = vpop.permute.xlu1 %550  ;;  %v7295_v61 = vpop.permute.xlu0 %548 }
 0x133   :  { %11907 = vst [vmem:[#allocation184_spill] sm:$0xff] %v7293_v52  ;;  %11908 = vst [vmem:[#allocation185_spill] sm:$0xff] %v7295_v61 }
 0x134   :  { %726 = vrot.lane.b32.xlu1 %v6536_v46, %s6067_s24  ;;  %724 = vrot.lane.b32.xlu0 %v6541_v56, %s6067_s24 }
 0x136   :  { %v7301_v51 = vpop.permute.xlu1 %554  ;;  %v7303_v11 = vpop.permute.xlu0 %552 }
 0x137   :  { %11909 = vst [vmem:[#allocation186_spill] sm:$0xff] %v7301_v51  ;;  %11910 = vst [vmem:[#allocation187_spill] sm:$0xff] %v7303_v11 }
 0x138   :  { %730 = vrot.lane.b32.xlu1 %v6558_v41, %s6067_s24  ;;  %728 = vrot.lane.b32.xlu0 %v6563_v53, %s6067_s24 }
 0x13a   :  { %v7309_v38 = vpop.permute.xlu1 %558  ;;  %v7311_v63 = vpop.permute.xlu0 %556 }
 0x13b   :  { %11911 = vst [vmem:[#allocation188_spill] sm:$0xff] %v7309_v38  ;;  %11912 = vst [vmem:[#allocation189_spill] sm:$0xff] %v7311_v63 }
 0x13c   :  { %734 = vrot.lane.b32.xlu1 %v6580_v36, %s6067_s24  ;;  %732 = vrot.lane.b32.xlu0 %v6585_v28, %s6067_s24 }
 0x13e   :  { %v7317_v46 = vpop.permute.xlu1 %562  ;;  %v7319_v56 = vpop.permute.xlu0 %560 }
 0x13f   :  { %11913 = vst [vmem:[#allocation190_spill] sm:$0xff] %v7317_v46  ;;  %11914 = vst [vmem:[#allocation191_spill] sm:$0xff] %v7319_v56  ;;  %v3116_v46 = vld [vmem:[%s11431_s1] sm:$0xff]  ;;  %v3117_v56 = vld [vmem:[%s11431_s1 + $0x8] sm:$0xff] }
 0x140   :  { %738 = vrot.lane.b32.xlu1 %v6602_v31, %s6067_s24  ;;  %736 = vrot.lane.b32.xlu0 %v6607_v57, %s6067_s24  ;;  %v5952_v38 = vpack.c.bf16 %v3117_v56, %v3116_v46  ;;  %v3118_v46 = vld [vmem:[%s11431_s1 + $0x10] sm:$0xff]  ;;  %v3119_v56 = vld [vmem:[%s11431_s1 + $0x18] sm:$0xff] }
 0x141   :  { %v5955_v26 = vpack.c.bf16 %v3119_v56, %v3118_v46  ;;  %v11935_v56 = vld [vmem:[#allocation55_spill] sm:$0xff] }
 0x142   :  { %v7325_v41 = vpop.permute.xlu1 %566  ;;  %v7327_v53 = vpop.permute.xlu0 %564  ;;  %5953 = vmatpush3.bf16.msra.mxu0 %v5952_v38  ;;  %5960 = vmatpush3.bf16.msra.mxu1 %v5952_v38 }
 0x143   :  { %11915 = vst [vmem:[#allocation192_spill] sm:$0xff] %v7325_v41  ;;  %11916 = vst [vmem:[#allocation193_spill] sm:$0xff] %v7327_v53  ;;  %v11931_v41 = vld [vmem:[#allocation8_spill] sm:$0xff]  ;;  %v11932_v53 = vld [vmem:[#allocation9_spill] sm:$0xff]  ;;  %5954 = vmatprep.subr.bf16.mxu0 %v6069_v4  ;;  %5958 = vmatprep.subr.bf16.mxu1 %v6069_v4  ;;  %v11631_v4 = vmov 0.0  }
 0x144   :  { %742 = vrot.lane.b32.xlu1 %v6624_v22, %s6067_s24  ;;  %740 = vrot.lane.b32.xlu0 %v6629_v47, %s6067_s24  ;;  %v75_v22 = vld [vmem:[%s11430_s0 + $0x1e8] sm:$0xff] }
 0x145   :  { %5804 = vmatprep.mubr.msk.f32.mxu0 %vm6074_vm3, %v11631_v4  ;;  %5879 = vmatprep.mubr.msk.f32.mxu1 %vm6074_vm3, %v11631_v4 }
 0x146   :  { %v7333_v36 = vpop.permute.xlu1 %570  ;;  %v7335_v28 = vpop.permute.xlu0 %568  ;;  %5956 = vmatpush3.bf16.msra.mxu0 %v5955_v26  ;;  %5961 = vmatpush3.bf16.msra.mxu1 %v5955_v26 }
 0x147   :  { %11917 = vst [vmem:[#allocation194_spill] sm:$0xff] %v7333_v36  ;;  %11918 = vst [vmem:[#allocation195_spill] sm:$0xff] %v7335_v28  ;;  %5802 = vmatprep.subr.mxu0 %v11631_v4  ;;  %5959 = vmatprep.subr.mxu1 %v11631_v4  ;;  %v7463_v4 = vld [vmem:[%s11430_s0 + $0x30] sm:$0xff] }
 0x148   :  { %746 = vrot.lane.b32.xlu1 %v6646_v17, %s6067_s24  ;;  %744 = vrot.lane.b32.xlu0 %v6651_v58, %s6067_s24  ;;  %v74_v17 = vld [vmem:[%s11430_s0 + $0x1e0] sm:$0xff] }
 0x14a   :  { %v7341_v31 = vpop.permute.xlu1 %574  ;;  %v7343_v57 = vpop.permute.xlu0 %572 }
 0x14b   :  { %11919 = vst [vmem:[#allocation196_spill] sm:$0xff] %v7341_v31  ;;  %11920 = vst [vmem:[#allocation197_spill] sm:$0xff] %v7343_v57  ;;  %v11926_v57 = vld [vmem:[#allocation3_spill] sm:$0xff] }
 0x14c   :  { %750 = vrot.lane.b32.xlu1 %v6668_v12, %s6067_s24  ;;  %748 = vrot.lane.b32.xlu0 %v6673_v42, %s6067_s24  ;;  %v11925_v42 = vld [vmem:[#allocation2_spill] sm:$0xff] }
 0x14e   :  { %v7355_v47 = vpop.permute.xlu1 %578  ;;  %v7357_v58 = vpop.permute.xlu0 %576 }
 0x14f   :  { %11921 = vst [vmem:[#allocation198_spill] sm:$0xff] %v7355_v47  ;;  %11922 = vst [vmem:[#allocation199_spill] sm:$0xff] %v7357_v58  ;;  %v11927_v58 = vld [vmem:[#allocation4_spill] sm:$0xff] }
 0x150   :  { %754 = vrot.lane.b32.xlu1 %v75_v22, %s6067_s24  ;;  %752 = vrot.lane.b32.xlu0 %v74_v17, %s6067_s24  ;;  %v11928_v22 = vld [vmem:[#allocation5_spill] sm:$0xff] }
 0x152   :  { %v7361_v12 = vpop.permute.xlu1 %582  ;;  %v7363_v31 = vpop.permute.xlu0 %580 }
 0x153   :  { %11923 = vst [vmem:[#allocation200_spill] sm:$0xff] %v7361_v12  ;;  %11924 = vst [vmem:[#allocation201_spill] sm:$0xff] %v7363_v31  ;;  %v11929_v31 = vld [vmem:[#allocation6_spill] sm:$0xff] }
 0x154   :  { %820 = vrot.lane.b32.xlu1 %v11925_v42, %s6068_s30  ;;  %818 = vrot.lane.b32.xlu0 %v11926_v57, %s6068_s30  ;;  %v11930_v42 = vld [vmem:[#allocation7_spill] sm:$0xff] }
 0x156   :  { %v7369_v36 = vpop.permute.xlu1 %646  ;;  %v7371_v47 = vpop.permute.xlu0 %644 }
 0x158   :  { %824 = vrot.lane.b32.xlu1 %v11927_v58, %s6068_s30  ;;  %822 = vrot.lane.b32.xlu0 %v11928_v22, %s6068_s30 }
 0x15a   :  { %v7377_v17 = vpop.permute.xlu1 %650  ;;  %v7379_v12 = vpop.permute.xlu0 %648 }
 0x15c   :  { %828 = vrot.lane.b32.xlu1 %v11929_v31, %s6068_s30  ;;  %826 = vrot.lane.b32.xlu0 %v11930_v42, %s6068_s30 }
 0x15e   :  { %v7385_v57 = vpop.permute.xlu1 %654  ;;  %v7387_v28 = vpop.permute.xlu0 %652 }
 0x160   :  { %832 = vrot.lane.b32.xlu1 %v11931_v41, %s6068_s30  ;;  %830 = vrot.lane.b32.xlu0 %v11932_v53, %s6068_s30 }
 0x162   :  { %v7399_v63 = vpop.permute.xlu1 %658  ;;  %v7401_v51 = vpop.permute.xlu0 %656 }
 0x164   :  { %992 = vrot.lane.b32.xlu1 %v11933_v10, %s6070_s8  ;;  %834 = vrot.lane.b32.xlu0 %v11934_v27, %s6068_s30  ;;  %v7422_v10 = vld [vmem:[%s11430_s0 + $0x20] sm:$0xff] }
 0x166   :  { %v7413_v11 = vpop.permute.xlu1 %662  ;;  %v7415_v38 = vpop.permute.xlu0 %660 }
 0x168   :  { %1338 = vrot.lane.b32.xlu1 %v11928_v22, %s6071_s13  ;;  %1164 = vrot.lane.b32.xlu0 %v7422_v10, %s6072_s16  ;;  %v3120_v22 = vld [vmem:[%s11431_s1 + $0x20] sm:$0xf] }
 0x169   :  { %5803 = vmatpush3.msk.msra.mxu0 %vm4060_vm2, %v3120_v22  ;;  %5962 = vmatpush3.msk.msra.mxu1 %vm4060_vm2, %v3120_v22 }
 0x16a   :  { %v7428_v46 = vpop.permute.xlu1 %666  ;;  %v7430_v26 = vpop.permute.xlu0 %664 }
 0x16c   :  { %994 = vrot.lane.b32.xlu1 %v11935_v56, %s6070_s8  ;;  %1512 = vrot.lane.b32.xlu0 %v11936_v5, %s6075_s19 }
 0x16e   :  { %v7443_v52 = vpop.permute.xlu1 %670  ;;  %v7445_v61 = vpop.permute.xlu0 %668 }
 0x16f   :  { %11937 = vst [vmem:[#allocation2_spill] sm:$0xff] %v7443_v52 }
 0x170   :  { %996 = vrot.lane.b32.xlu1 %v11936_v5, %s6070_s8  ;;  %1166 = vrot.lane.b32.xlu0 %v7452_v32, %s6072_s16 }
 0x172   :  { %v7456_v56 = vpop.permute.xlu1 %674  ;;  %v7458_v22 = vpop.permute.xlu0 %672 }
 0x173   :  { %11938 = vst [vmem:[#allocation3_spill] sm:$0xff] %v7456_v56  ;;  %11939 = vst [vmem:[#allocation4_spill] sm:$0xff] %v7458_v22  ;;  %v2194_v56 = vunpack.c.l.s4 %v6076_v35 }
 0x174   :  { %1168 = vrot.lane.b32.xlu1 %v7463_v4, %s6072_s16  ;;  %1340 = vrot.lane.b32.xlu0 %v11927_v58, %s6071_s13 }
 0x176   :  { %v7469_v5 = vpop.permute.xlu1 %678  ;;  %v7471_v60 = vpop.permute.xlu0 %676 }
 0x177   :  { %11940 = vst [vmem:[#allocation5_spill] sm:$0xff] %v7469_v5  ;;  %11941 = vst [vmem:[#allocation6_spill] sm:$0xff] %v7471_v60 }
 0x178   :  { %1342 = vrot.lane.b32.xlu1 %v11930_v42, %s6071_s13  ;;  %1514 = vrot.lane.b32.xlu0 %v11942_v49, %s6075_s19  ;;  %v7494_v42 = vld [vmem:[%s11430_s0 + $0x38] sm:$0xff] }
 0x17a   :  { %v7477_v9 = vpop.permute.xlu1 %682  ;;  %v7479_v50 = vpop.permute.xlu0 %680 }
 0x17b   :  { %11943 = vst [vmem:[#allocation7_spill] sm:$0xff] %v7477_v9  ;;  %11944 = vst [vmem:[#allocation8_spill] sm:$0xff] %v7479_v50  ;;  %v7557_v9 = vld [vmem:[%s11430_s0 + $0x50] sm:$0xff]  ;;  %v7578_v50 = vld [vmem:[%s11430_s0 + $0x58] sm:$0xff] }
 0x17c   :  { %998 = vrot.lane.b32.xlu1 %v11942_v49, %s6070_s8  ;;  %1516 = vrot.lane.b32.xlu0 %v11945_v33, %s6075_s19 }
 0x17e   :  { %v7485_v58 = vpop.permute.xlu1 %686  ;;  %v7487_v44 = vpop.permute.xlu0 %684 }
 0x17f   :  { %11946 = vst [vmem:[#allocation9_spill] sm:$0xff] %v7485_v58  ;;  %11947 = vst [vmem:[#allocation56_spill] sm:$0xff] %v7487_v44  ;;  %v7505_v58 = vld [vmem:[%s11430_s0 + $0x40] sm:$0xff] }
 0x180   :  { %1000 = vrot.lane.b32.xlu1 %v11945_v33, %s6070_s8  ;;  %1170 = vrot.lane.b32.xlu0 %v7494_v42, %s6072_s16 }
 0x182   :  { %v7498_v62 = vpop.permute.xlu1 %690  ;;  %v7500_v49 = vpop.permute.xlu0 %688 }
 0x183   :  { %11948 = vst [vmem:[#allocation11_spill] sm:$0xff] %v7498_v62  ;;  %11949 = vst [vmem:[#allocation55_spill] sm:$0xff] %v7500_v49  ;;  %v11952_v62 = vld [vmem:[#allocation61_spill] sm:$0xff] }
 0x184   :  { %1172 = vrot.lane.b32.xlu1 %v7505_v58, %s6072_s16  ;;  %1344 = vrot.lane.b32.xlu0 %v11929_v31, %s6071_s13 }
 0x186   :  { %v7511_v33 = vpop.permute.xlu1 %694  ;;  %v7513_v44 = vpop.permute.xlu0 %692 }
 0x187   :  { %11950 = vst [vmem:[#allocation60_spill] sm:$0xff] %v7511_v33  ;;  %11951 = vst [vmem:[#allocation57_spill] sm:$0xff] %v7513_v44 }
 0x188   :  { %1346 = vrot.lane.b32.xlu1 %v11932_v53, %s6071_s13  ;;  %1518 = vrot.lane.b32.xlu0 %v11952_v62, %s6075_s19  ;;  %v7536_v53 = vld [vmem:[%s11430_s0 + $0x48] sm:$0xff] }
 0x18a   :  { %v7519_v49 = vpop.permute.xlu1 %698  ;;  %v7521_v45 = vpop.permute.xlu0 %696 }
 0x18b   :  { %11953 = vst [vmem:[#allocation64_spill] sm:$0xff] %v7519_v49  ;;  %11954 = vst [vmem:[#allocation61_spill] sm:$0xff] %v7521_v45  ;;  %v11960_v45 = vld [vmem:[#allocation65_spill] sm:$0xff] }
 0x18c   :  { %1002 = vrot.lane.b32.xlu1 %v11952_v62, %s6070_s8  ;;  %1520 = vrot.lane.b32.xlu0 %v11955_v13, %s6075_s19 }
 0x18e   :  { %v7527_v31 = vpop.permute.xlu1 %702  ;;  %v7529_v33 = vpop.permute.xlu0 %700 }
 0x18f   :  { %11956 = vst [vmem:[#allocation68_spill] sm:$0xff] %v7527_v31  ;;  %11957 = vst [vmem:[#allocation202_spill] sm:$0xff] %v7529_v33  ;;  %v12001_v31 = vld [vmem:[#allocation63_spill] sm:$0xff] }
 0x190   :  { %1348 = vrot.lane.b32.xlu1 %v11931_v41, %s6071_s13  ;;  %1174 = vrot.lane.b32.xlu0 %v7536_v53, %s6072_s16 }
 0x192   :  { %v7540_v49 = vpop.permute.xlu1 %706  ;;  %v7542_v62 = vpop.permute.xlu0 %704 }
 0x193   :  { %11958 = vst [vmem:[#allocation203_spill] sm:$0xff] %v7540_v49  ;;  %11959 = vst [vmem:[#allocation204_spill] sm:$0xff] %v7542_v62  ;;  %v11999_v62 = vld [vmem:[#allocation77_spill] sm:$0xff] }
 0x194   :  { %1004 = vrot.lane.b32.xlu1 %v11955_v13, %s6070_s8  ;;  %1522 = vrot.lane.b32.xlu0 %v11960_v45, %s6075_s19 }
 0x196   :  { %v7548_v44 = vpop.permute.xlu1 %710  ;;  %v7550_v41 = vpop.permute.xlu0 %708 }
 0x197   :  { %11961 = vst [vmem:[#allocation65_spill] sm:$0xff] %v7548_v44  ;;  %11962 = vst [vmem:[#allocation205_spill] sm:$0xff] %v7550_v41  ;;  %v11965_v44 = vld [vmem:[#allocation72_spill] sm:$0xff] }
 0x198   :  { %1350 = vrot.lane.b32.xlu1 %v11934_v27, %s6071_s13  ;;  %1176 = vrot.lane.b32.xlu0 %v7557_v9, %s6072_s16  ;;  %v11977_v41 = vld [vmem:[#allocation76_spill] sm:$0xff] }
 0x19a   :  { %v7561_v43 = vpop.permute.xlu1 %714  ;;  %v7563_v13 = vpop.permute.xlu0 %712 }
 0x19b   :  { %11963 = vst [vmem:[#allocation206_spill] sm:$0xff] %v7561_v43  ;;  %11964 = vst [vmem:[#allocation207_spill] sm:$0xff] %v7563_v13 }
 0x19c   :  { %1006 = vrot.lane.b32.xlu1 %v11960_v45, %s6070_s8  ;;  %1524 = vrot.lane.b32.xlu0 %v11965_v44, %s6075_s19 }
 0x19e   :  { %v7569_v39 = vpop.permute.xlu1 %718  ;;  %v7571_v27 = vpop.permute.xlu0 %716 }
 0x19f   :  { %11966 = vst [vmem:[#allocation72_spill] sm:$0xff] %v7569_v39  ;;  %11967 = vst [vmem:[#allocation208_spill] sm:$0xff] %v7571_v27  ;;  %v7589_v39 = vld [vmem:[%s11430_s0 + $0x60] sm:$0xff] }
 0x1a0   :  { %1008 = vrot.lane.b32.xlu1 %v11965_v44, %s6070_s8  ;;  %1178 = vrot.lane.b32.xlu0 %v7578_v50, %s6072_s16  ;;  %v11970_v44 = vld [vmem:[#allocation10_spill] sm:$0xff] }
 0x1a2   :  { %v7582_v43 = vpop.permute.xlu1 %722  ;;  %v7584_v45 = vpop.permute.xlu0 %720 }
 0x1a3   :  { %11968 = vst [vmem:[#allocation209_spill] sm:$0xff] %v7582_v43  ;;  %11969 = vst [vmem:[#allocation210_spill] sm:$0xff] %v7584_v45  ;;  %v11974_v43 = vld [vmem:[#allocation69_spill] sm:$0xff] }
 0x1a4   :  { %1180 = vrot.lane.b32.xlu1 %v7589_v39, %s6072_s16  ;;  %1352 = vrot.lane.b32.xlu0 %v11970_v44, %s6071_s13 }
 0x1a6   :  { %v7595_v27 = vpop.permute.xlu1 %726  ;;  %v7597_v13 = vpop.permute.xlu0 %724 }
 0x1a7   :  { %11971 = vst [vmem:[#allocation10_spill] sm:$0xff] %v7595_v27  ;;  %11972 = vst [vmem:[#allocation211_spill] sm:$0xff] %v7597_v13 }
 0x1a8   :  { %1354 = vrot.lane.b32.xlu1 %v11973_v40, %s6071_s13  ;;  %1526 = vrot.lane.b32.xlu0 %v11974_v43, %s6075_s19 }
 0x1aa   :  { %v7603_v45 = vpop.permute.xlu1 %730  ;;  %v7605_v5 = vpop.permute.xlu0 %728 }
 0x1ab   :  { %11975 = vst [vmem:[#allocation13_spill] sm:$0xff] %v7603_v45  ;;  %11976 = vst [vmem:[#allocation69_spill] sm:$0xff] %v7605_v5 }
 0x1ac   :  { %836 = vrot.lane.b32.xlu1 %v11970_v44, %s6068_s30  ;;  %1528 = vrot.lane.b32.xlu0 %v11977_v41, %s6075_s19  ;;  %v7628_v44 = vld [vmem:[%s11430_s0 + $0x68] sm:$0xff] }
 0x1ad   :  { %11982 = vst [vmem:[#allocation215_spill] sm:$0xff] %v7628_v44 }
 0x1ae   :  { %v7611_v34 = vpop.permute.xlu1 %734  ;;  %v7613_v27 = vpop.permute.xlu0 %732 }
 0x1af   :  { %11978 = vst [vmem:[#allocation76_spill] sm:$0xff] %v7611_v34  ;;  %11979 = vst [vmem:[#allocation212_spill] sm:$0xff] %v7613_v27  ;;  %v11989_v27 = vld [vmem:[#allocation15_spill] sm:$0xff] }
 0x1b0   :  { %838 = vrot.lane.b32.xlu1 %v11973_v40, %s6068_s30  ;;  %1010 = vrot.lane.b32.xlu0 %v11974_v43, %s6070_s8  ;;  %v7639_v43 = vld [vmem:[%s11430_s0 + $0x70] sm:$0xff] }
 0x1b1   :  { %11985 = vst [vmem:[#allocation218_spill] sm:$0xff] %v7639_v43 }
 0x1b2   :  { %v7619_v13 = vpop.permute.xlu1 %738  ;;  %v7621_v45 = vpop.permute.xlu0 %736 }
 0x1b3   :  { %11980 = vst [vmem:[#allocation213_spill] sm:$0xff] %v7619_v13  ;;  %11981 = vst [vmem:[#allocation214_spill] sm:$0xff] %v7621_v45 }
 0x1b4   :  { %1012 = vrot.lane.b32.xlu1 %v11977_v41, %s6070_s8  ;;  %1182 = vrot.lane.b32.xlu0 %v7628_v44, %s6072_s16  ;;  %v11986_v41 = vld [vmem:[#allocation12_spill] sm:$0xff] }
 0x1b6   :  { %v7632_v34 = vpop.permute.xlu1 %742  ;;  %v7634_v40 = vpop.permute.xlu0 %740 }
 0x1b7   :  { %11983 = vst [vmem:[#allocation216_spill] sm:$0xff] %v7632_v34  ;;  %11984 = vst [vmem:[#allocation217_spill] sm:$0xff] %v7634_v40  ;;  %v11990_v34 = vld [vmem:[#allocation73_spill] sm:$0xff] }
 0x1b8   :  { %1184 = vrot.lane.b32.xlu1 %v7639_v43, %s6072_s16  ;;  %1356 = vrot.lane.b32.xlu0 %v11986_v41, %s6071_s13 }
 0x1ba   :  { %v7645_v13 = vpop.permute.xlu1 %746  ;;  %v7647_v45 = vpop.permute.xlu0 %744 }
 0x1bb   :  { %11987 = vst [vmem:[#allocation12_spill] sm:$0xff] %v7645_v13  ;;  %11988 = vst [vmem:[#allocation219_spill] sm:$0xff] %v7647_v45 }
 0x1bc   :  { %1358 = vrot.lane.b32.xlu1 %v11989_v27, %s6071_s13  ;;  %1530 = vrot.lane.b32.xlu0 %v11990_v34, %s6075_s19 }
 0x1be   :  { %v7653_v40 = vpop.permute.xlu1 %750  ;;  %v7655_v5 = vpop.permute.xlu0 %748 }
 0x1bf   :  { %11991 = vst [vmem:[#allocation15_spill] sm:$0xff] %v7653_v40  ;;  %11992 = vst [vmem:[#allocation73_spill] sm:$0xff] %v7655_v5 }
 0x1c0   :  { %1532 = vrot.lane.b32.xlu1 %v11993_v48, %s6075_s19  ;;  %840 = vrot.lane.b32.xlu0 %v11986_v41, %s6068_s30  ;;  %v7676_v41 = vld [vmem:[%s11430_s0 + $0x78] sm:$0xff] }
 0x1c1   :  { %11996 = vst [vmem:[#allocation221_spill] sm:$0xff] %v7676_v41 }
 0x1c2   :  { %v7661_v49 = vpop.permute.xlu1 %754  ;;  %v7663_v13 = vpop.permute.xlu0 %752 }
 0x1c3   :  { %11994 = vst [vmem:[#allocation80_spill] sm:$0xff] %v7661_v49  ;;  %11995 = vst [vmem:[#allocation220_spill] sm:$0xff] %v7663_v13 }
 0x1c4   :  { %842 = vrot.lane.b32.xlu1 %v11989_v27, %s6068_s30  ;;  %1014 = vrot.lane.b32.xlu0 %v11990_v34, %s6070_s8  ;;  %v5991_v34 = vld [vmem:[%s11430_s0 + $0x80] sm:$0xff] }
 0x1c6   :  { %v7669_v45 = vpop.permute.xlu1 %820  ;;  %v819_v40 = vpop.permute.xlu0 %818 }
 0x1c8   :  { %1016 = vrot.lane.b32.xlu1 %v11993_v48, %s6070_s8  ;;  %1186 = vrot.lane.b32.xlu0 %v7676_v41, %s6072_s16  ;;  %v11997_v48 = vld [vmem:[#allocation14_spill] sm:$0xff] }
 0x1c9   :  { %v5992_v41 = vld [vmem:[%s11430_s0] sm:$0xff] }
 0x1ca   :  { %v7680_v49 = vpop.permute.xlu1 %824  ;;  %v7682_v27 = vpop.permute.xlu0 %822  ;;  %v1681_v54 = vsel %vm1680_vm5, %v5992_v41, %v12001_v31  ;;  %v2195_v31 = vunpack.c.0.s8 %v2194_v56  ;;  %v2197_v41 = vshrl.u32 %v2196_v29, 7 }
 0x1cb   :  { %v1738_v6 = vsel %vm1737_vm4, %v1681_v54, %v7139_v3 }
 0x1cc   :  { %1188 = vrot.lane.b32.xlu1 %v5991_v34, %s6072_s16  ;;  %1360 = vrot.lane.b32.xlu0 %v11997_v48, %s6071_s13  ;;  %v12000_v34 = vld [vmem:[#allocation84_spill] sm:$0xff]  ;;  %v1795_v35 = vsel %vm1794_vm6, %v1738_v6, %v7371_v47 }
 0x1cd   :  { %v1852_v30 = vsel %vm1851_vm7, %v1795_v35, %v819_v40  ;;  %v12002_v47 = vld [vmem:[#allocation16_spill] sm:$0xff] }
 0x1ce   :  { %v7690_v13 = vpop.permute.xlu1 %828  ;;  %v7692_v5 = vpop.permute.xlu0 %826 }
 0x1d0   :  { %1362 = vrot.lane.b32.xlu1 %v11998_v55, %s6071_s13  ;;  %1534 = vrot.lane.b32.xlu0 %v11999_v62, %s6075_s19 }
 0x1d2   :  { %v7698_v59 = vpop.permute.xlu1 %832  ;;  %v7700_v60 = vpop.permute.xlu0 %830 }
 0x1d4   :  { %1536 = vrot.lane.b32.xlu1 %v12000_v34, %s6075_s19  ;;  %844 = vrot.lane.b32.xlu0 %v11997_v48, %s6068_s30  ;;  %v5993_v48 = vld [vmem:[%s11430_s0 + $0x88] sm:$0xff] }
 0x1d6   :  { %v993_v33 = vpop.permute.xlu1 %992  ;;  %v7711_v22 = vpop.permute.xlu0 %834 }
 0x1d7   :  { %v1909_v3 = vsel %vm1908_vm8, %v1852_v30, %v993_v33 }
 0x1d8   :  { %1190 = vrot.lane.b32.xlu1 %v5993_v48, %s6072_s16  ;;  %1018 = vrot.lane.b32.xlu0 %v11999_v62, %s6070_s8  ;;  %v7730_v62 = vsub.s32 %v2195_v31, %v2197_v41 }
 0x1da   :  { %v1339_v54 = vpop.permute.xlu1 %1338  ;;  %v1165_v43 = vpop.permute.xlu0 %1164 }
 0x1db   :  { %v1966_v6 = vsel %vm1965_vm9, %v1909_v3, %v1165_v43  ;;  %v12003_v43 = vld [vmem:[#allocation81_spill] sm:$0xff] }
 0x1dc   :  { %846 = vrot.lane.b32.xlu1 %v11998_v55, %s6068_s30  ;;  %1364 = vrot.lane.b32.xlu0 %v12002_v47, %s6071_s13  ;;  %v2023_v29 = vsel %vm2022_vm10, %v1966_v6, %v1339_v54  ;;  %v12004_v55 = vld [vmem:[#allocation30_spill] sm:$0xff]  ;;  %v5994_v54 = vld [vmem:[%s11430_s0 + $0x8] sm:$0xff] }
 0x1dd   :  { %v12005_v6 = vld [vmem:[#allocation59_spill] sm:$0xff] }
 0x1de   :  { %v995_v56 = vpop.permute.xlu1 %994  ;;  %v1513_v40 = vpop.permute.xlu0 %1512 }
 0x1df   :  { %v2080_v30 = vsel %vm2079_vm11, %v2023_v29, %v1513_v40  ;;  %v1682_v29 = vsel %vm1680_vm5, %v5994_v54, %v12005_v6  ;;  %v5995_v54 = vld [vmem:[%s11430_s0 + $0x10] sm:$0xff] }
 0x1e0   :  { %v2192_v33 = vcombine.high %v2080_v30, %v2080_v30  ;;  %v2199_v35 = vrot.slane %v2080_v30, %v7730_v62  ;;  %1538 = vrot.lane.b32.xlu1 %v12003_v43, %s6075_s19  ;;  %874 = vrot.lane.b32.xlu0 %v12004_v55, %s6068_s30 }
 0x1e2   :  { %v2206_v48 = vrot.slane %v2192_v33, %v7730_v62  ;;  %v2207_v3 = vcombine.high %v2199_v35, %v2199_v35  ;;  %v997_v31 = vpop.permute.xlu1 %996  ;;  %v1167_v41 = vpop.permute.xlu0 %1166  ;;  %v1739_v33 = vsel %vm1737_vm4, %v1682_v29, %v7137_v21 }
 0x1e3   :  { %v1796_v55 = vsel %vm1794_vm6, %v1739_v33, %v7369_v36  ;;  %v5996_v36 = vld [vmem:[%s11430_s0 + $0x90] sm:$0xff] }
 0x1e4   :  { %v2208_v40 = vcombine.high %v2206_v48, %v2206_v48  ;;  %v3128_v30 = vcombine.low %v2199_v35, %v2207_v3  ;;  %1048 = vrot.lane.b32.xlu1 %v6927_v1, %s6070_s8  ;;  %1020 = vrot.lane.b32.xlu0 %v12000_v34, %s6070_s8  ;;  %v12006_v35 = vld [vmem:[#allocation62_spill] sm:$0xff]  ;;  %v1853_v1 = vsel %vm1851_vm7, %v1796_v55, %v7669_v45 }
 0x1e5   :  { %v1683_v3 = vsel %vm1680_vm5, %v5995_v54, %v12006_v35  ;;  %v1910_v34 = vsel %vm1908_vm8, %v1853_v1, %v995_v56 }
 0x1e6   :  { %v3129_v52 = vcombine.low %v2206_v48, %v2208_v40  ;;  %v1169_v24 = vpop.permute.xlu1 %1168  ;;  %v1341_v44 = vpop.permute.xlu0 %1340  ;;  %v3136_v21 = vrot.slane %v3128_v30, %v7730_v62  ;;  %v12007_v48 = vld [vmem:[#allocation29_spill] sm:$0xff]  ;;  %v1740_v29 = vsel %vm1737_vm4, %v1683_v3, %v7147_v23  ;;  %v1967_v45 = vsel %vm1965_vm9, %v1910_v34, %v1167_v41 }
 0x1e7   :  { %v1797_v56 = vsel %vm1794_vm6, %v1740_v29, %v7379_v12  ;;  %v2024_v40 = vsel %vm2022_vm10, %v1967_v45, %v1341_v44  ;;  %v5997_v12 = vld [vmem:[%s11430_s0 + $0x120] sm:$0xff]  ;;  %v12008_v34 = vmov 0.0  }
 0x1e8   :  { %v3143_v6 = vrot.slane %v3129_v52, %v7730_v62  ;;  %1192 = vrot.lane.b32.xlu1 %v5996_v36, %s6072_s16  ;;  %876 = vrot.lane.b32.xlu0 %v12007_v48, %s6068_s30  ;;  %v1854_v55 = vsel %vm1851_vm7, %v1797_v56, %v7682_v27  ;;  %v12009_v48 = vld [vmem:[#allocation32_spill] sm:$0xff] }
 0x1e9   :  { %v1911_v35 = vsel %vm1908_vm8, %v1854_v55, %v997_v31 }
 0x1ea   :  { %v1343_v52 = vpop.permute.xlu1 %1342  ;;  %v1515_v30 = vpop.permute.xlu0 %1514  ;;  %v3144_v33 = vcombine.low %v3136_v21, %v3143_v6  ;;  %v1968_v44 = vsel %vm1965_vm9, %v1911_v35, %v1169_v24  ;;  %v12010_v24 = vld [vmem:[#allocation19_spill] sm:$0xff] }
 0x1eb   :  { %v2081_v54 = vsel %vm2079_vm11, %v2024_v40, %v1515_v30  ;;  %v2025_v27 = vsel %vm2022_vm10, %v1968_v44, %v1343_v52  ;;  %v5998_v52 = vld [vmem:[%s11430_s0 + $0x18] sm:$0xff]  ;;  %v12011_v30 = vld [vmem:[#allocation58_spill] sm:$0xff]  ;;  %v5999_v35 = vld [vmem:[%s11430_s0 + $0x128] sm:$0xff] }
 0x1ec   :  { %v2209_v1 = vcombine.high %v2081_v54, %v2081_v54  ;;  %v2216_v23 = vrot.slane %v2081_v54, %v7730_v62  ;;  %1050 = vrot.lane.b32.xlu1 %v6916_v16, %s6070_s8  ;;  %1220 = vrot.lane.b32.xlu0 %v5997_v12, %s6072_s16 }
 0x1ed   :  { %5805 = vmatmul.mubr.msk.f32.vlgmr.msra.gmra.mrb[0].mxu0 %vm3961_vm12, %v3144_v33  ;;  %v1684_v33 = vsel %vm1680_vm5, %v5998_v52, %v12011_v30 }
 0x1ee   :  { %v2224_v41 = vcombine.high %v2216_v23, %v2216_v23  ;;  %v999_v31 = vpop.permute.xlu1 %998  ;;  %v1517_v3 = vpop.permute.xlu0 %1516  ;;  %5807 = vmatprep.mubr.msk.f32.mxu0 %vm6074_vm3, %v12008_v34  ;;  %v2223_v21 = vrot.slane %v2209_v1, %v7730_v62  ;;  %v1741_v1 = vsel %vm1737_vm4, %v1684_v33, %v7145_v18 }
 0x1ef   :  { %v2082_v16 = vsel %vm2079_vm11, %v2025_v27, %v1517_v3 }
 0x1f0   :  { %v3145_v6 = vcombine.low %v2216_v23, %v2224_v41  ;;  %v2232_v36 = vrot.slane %v2082_v16, %v7730_v62  ;;  %1394 = vrot.lane.b32.xlu1 %v12009_v48, %s6071_s13  ;;  %1366 = vrot.lane.b32.xlu0 %v12010_v24, %s6071_s13  ;;  %v2225_v40 = vcombine.high %v2082_v16, %v2082_v16  ;;  %v12012_v41 = vld [vmem:[#allocation67_spill] sm:$0xff] }
 0x1f1   :  { %v1798_v23 = vsel %vm1794_vm6, %v1741_v1, %v7377_v17  ;;  %v1685_v3 = vsel %vm1680_vm5, %v7422_v10, %v12012_v41  ;;  %v12013_v17 = vld [vmem:[#allocation88_spill] sm:$0xff] }
 0x1f2   :  { %v3146_v29 = vcombine.low %v2223_v21, %v2232_v36  ;;  %v1001_v45 = vpop.permute.xlu1 %1000  ;;  %v1171_v56 = vpop.permute.xlu0 %1170  ;;  %v3153_v55 = vrot.slane %v3145_v6, %v7730_v62  ;;  %v1855_v16 = vsel %vm1851_vm7, %v1798_v23, %v7680_v49  ;;  %v2239_v21 = vrot.slane %v2225_v40, %v7730_v62  ;;  %v12014_v49 = vld [vmem:[#allocation66_spill] sm:$0xff] }
 0x1f3   :  { %v2240_v6 = vcombine.high %v2232_v36, %v2232_v36  ;;  %v1912_v18 = vsel %vm1908_vm8, %v1855_v16, %v999_v31  ;;  %v1686_v36 = vsel %vm1680_vm5, %v7452_v32, %v12014_v49 }
 0x1f4   :  { %v3160_v54 = vrot.slane %v3146_v29, %v7730_v62  ;;  %1222 = vrot.lane.b32.xlu1 %v5999_v35, %s6072_s16  ;;  %848 = vrot.lane.b32.xlu0 %v12002_v47, %s6068_s30  ;;  %v1742_v47 = vsel %vm1737_vm4, %v1685_v3, %v7155_v2  ;;  %v1969_v29 = vsel %vm1965_vm9, %v1912_v18, %v1171_v56 }
 0x1f5   :  { %v1799_v10 = vsel %vm1794_vm6, %v1742_v47, %v7387_v28  ;;  %v1743_v28 = vsel %vm1737_vm4, %v1686_v36, %v7153_v0  ;;  %v3162_v56 = vcombine.low %v2240_v6, %v2239_v21 }
 0x1f6   :  { %v1173_v12 = vpop.permute.xlu1 %1172  ;;  %v1345_v44 = vpop.permute.xlu0 %1344  ;;  %v3161_v27 = vcombine.low %v3153_v55, %v3160_v54  ;;  %v1856_v2 = vsel %vm1851_vm7, %v1799_v10, %v7692_v5  ;;  %v2241_v55 = vcombine.high %v2239_v21, %v2239_v21  ;;  %v12015_v5 = vld [vmem:[#allocation31_spill] sm:$0xff]  ;;  %v1800_v35 = vsel %vm1794_vm6, %v1743_v28, %v7385_v57 }
 0x1f7   :  { %v2026_v31 = vsel %vm2022_vm10, %v1969_v29, %v1345_v44  ;;  %v1913_v30 = vsel %vm1908_vm8, %v1856_v2, %v1001_v45  ;;  %v1857_v3 = vsel %vm1851_vm7, %v1800_v35, %v7690_v13 }
 0x1f8   :  { %1568 = vrot.lane.b32.xlu1 %v6943_v37, %s6075_s19  ;;  %1540 = vrot.lane.b32.xlu0 %v12013_v17, %s6075_s19  ;;  %v1970_v0 = vsel %vm1965_vm9, %v1913_v30, %v1173_v12 }
 0x1f9   :  { %5808 = vmatmul.mubr.msk.f32.gmra.mrb[2].mxu0 %vm3961_vm12, %v3161_v27 }
 0x1fa   :  { %v1347_v40 = vpop.permute.xlu1 %1346  ;;  %v1519_v52 = vpop.permute.xlu0 %1518  ;;  %5810 = vmatprep.mubr.msk.f32.mxu0 %vm6074_vm3, %v12008_v34 }
 0x1fb   :  { %v2083_v33 = vsel %vm2079_vm11, %v2026_v31, %v1519_v52  ;;  %v2027_v1 = vsel %vm2022_vm10, %v1970_v0, %v1347_v40  ;;  %v12016_v31 = vld [vmem:[#allocation109_spill] sm:$0xff] }
 0x1fc   :  { %v2242_v32 = vcombine.high %v2083_v33, %v2083_v33  ;;  %v2249_v54 = vrot.slane %v2083_v33, %v7730_v62  ;;  %1396 = vrot.lane.b32.xlu1 %v12015_v5, %s6071_s13  ;;  %1022 = vrot.lane.b32.xlu0 %v12003_v43, %s6070_s8  ;;  %v3170_v43 = vrot.slane %v3162_v56, %v7730_v62 }
 0x1fe   :  { %v2256_v45 = vrot.slane %v2242_v32, %v7730_v62  ;;  %v2257_v23 = vcombine.high %v2249_v54, %v2249_v54  ;;  %v3163_v44 = vcombine.low %v2241_v55, %v2249_v54  ;;  %v1003_v27 = vpop.permute.xlu1 %1002  ;;  %v1521_v41 = vpop.permute.xlu0 %1520 }
 0x1ff   :  { %v2084_v16 = vsel %vm2079_vm11, %v2027_v1, %v1521_v41  ;;  %v1914_v6 = vsel %vm1908_vm8, %v1857_v3, %v1003_v27 }
 0x200   :  { %v3177_v21 = vrot.slane %v3163_v44, %v7730_v62  ;;  %v2258_v57 = vcombine.high %v2084_v16, %v2084_v16  ;;  %v2265_v12 = vrot.slane %v2084_v16, %v7730_v62  ;;  %878 = vrot.lane.b32.xlu1 %v12009_v48, %s6068_s30  ;;  %850 = vrot.lane.b32.xlu0 %v12010_v24, %s6068_s30  ;;  %v12017_v48 = vld [vmem:[#allocation71_spill] sm:$0xff]  ;;  %v6000_v24 = vld [vmem:[%s11430_s0 + $0x98] sm:$0xff] }
 0x201   :  { %v3179_v47 = vcombine.low %v2257_v23, %v2256_v45  ;;  %v1687_v40 = vsel %vm1680_vm5, %v7463_v4, %v12017_v48 }
 0x202   :  { %v2272_v13 = vrot.slane %v2258_v57, %v7730_v62  ;;  %v2273_v18 = vcombine.high %v2265_v12, %v2265_v12  ;;  %v1349_v10 = vpop.permute.xlu1 %1348  ;;  %v1175_v29 = vpop.permute.xlu0 %1174  ;;  %v3178_v49 = vcombine.low %v3170_v43, %v3177_v21  ;;  %v1744_v4 = vsel %vm1737_vm4, %v1687_v40, %v7163_v8 }
 0x203   :  { %v1971_v36 = vsel %vm1965_vm9, %v1914_v6, %v1175_v29  ;;  %v3187_v52 = vrot.slane %v3179_v47, %v7730_v62  ;;  %v1801_v54 = vsel %vm1794_vm6, %v1744_v4, %v7401_v51  ;;  %v6002_v29 = vld [vmem:[%s11430_s0 + $0x130] sm:$0xff] }
 0x204   :  { %v3180_v2 = vcombine.low %v2265_v12, %v2273_v18  ;;  %1570 = vrot.lane.b32.xlu1 %v12016_v31, %s6075_s19  ;;  %5811 = vmatmul.mubr.msk.f32.gmra.mrb[4].mxu0 %vm3961_vm12, %v3178_v49  ;;  %v2274_v28 = vcombine.high %v2272_v13, %v2272_v13  ;;  %v2028_v33 = vsel %vm2022_vm10, %v1971_v36, %v1349_v10  ;;  %v12019_v18 = vld [vmem:[#allocation85_spill] sm:$0xff] }
 0x205   :  { %1194 = vrot.lane.b32.xlu0 %v6000_v24, %s6072_s16  ;;  %5813 = vmatprep.mubr.msk.f32.mxu0 %vm6074_vm3, %v12008_v34  ;;  %v1858_v1 = vsel %vm1851_vm7, %v1801_v54, %v7700_v60  ;;  %v6001_v60 = vld [vmem:[%s11430_s0 + $0xa0] sm:$0xff] }
 0x206   :  { %v3194_v56 = vrot.slane %v3180_v2, %v7730_v62  ;;  %v1005_v30 = vpop.permute.xlu1 %1004  ;;  %v1523_v55 = vpop.permute.xlu0 %1522  ;;  %v3196_v45 = vcombine.low %v2272_v13, %v2274_v28  ;;  %v12020_v24 = vld [vmem:[#allocation70_spill] sm:$0xff] }
 0x207   :  { %v2085_v32 = vsel %vm2079_vm11, %v2028_v33, %v1523_v55  ;;  %v1915_v8 = vsel %vm1908_vm8, %v1858_v1, %v1005_v30  ;;  %v12022_v33 = vld [vmem:[#allocation21_spill] sm:$0xff] }
 0x208   :  { %v2282_v35 = vrot.slane %v2085_v32, %v7730_v62  ;;  %1052 = vrot.lane.b32.xlu1 %v6943_v37, %s6070_s8  ;;  %v3195_v0 = vcombine.low %v3187_v52, %v3194_v56  ;;  %v2275_v37 = vcombine.high %v2085_v32, %v2085_v32  ;;  %v3204_v3 = vrot.slane %v3196_v45, %v7730_v62  ;;  %v12021_v56 = vld [vmem:[#allocation34_spill] sm:$0xff]  ;;  %v12024_v45 = vld [vmem:[#allocation92_spill] sm:$0xff] }
 0x209   :  { %1024 = vrot.lane.b32.xlu0 %v12013_v17, %s6070_s8  ;;  %v12018_v17 = vld [vmem:[#allocation18_spill] sm:$0xff]  ;;  %v1688_v52 = vsel %vm1680_vm5, %v7494_v42, %v12020_v24 }
 0x20a   :  { %v2290_v23 = vcombine.high %v2282_v35, %v2282_v35  ;;  %v1351_v44 = vpop.permute.xlu1 %1350  ;;  %5814 = vmatmul.mubr.msk.f32.gmra.mrb[6].mxu0 %vm3961_vm12, %v3195_v0  ;;  %v1177_v51 = vpop.permute.xlu0 %1176  ;;  %v2289_v6 = vrot.slane %v2275_v37, %v7730_v62  ;;  %v1745_v30 = vsel %vm1737_vm4, %v1688_v52, %v7161_v7  ;;  %v12023_v0 = vld [vmem:[#allocation75_spill] sm:$0xff] }
 0x20b   :  { %v1972_v27 = vsel %vm1965_vm9, %v1915_v8, %v1177_v51  ;;  %5816 = vmatprep.mubr.msk.f32.mxu0 %vm6074_vm3, %v12008_v34  ;;  %v1802_v55 = vsel %vm1794_vm6, %v1745_v30, %v7399_v63  ;;  %v1689_v1 = vsel %vm1680_vm5, %v7505_v58, %v12023_v0 }
 0x20c   :  { %v3197_v41 = vcombine.low %v2282_v35, %v2290_v23  ;;  %1196 = vrot.lane.b32.xlu1 %v6001_v60, %s6072_s16  ;;  %v2029_v21 = vsel %vm2022_vm10, %v1972_v27, %v1351_v44  ;;  %v1859_v42 = vsel %vm1851_vm7, %v1802_v55, %v7698_v59  ;;  %v1746_v63 = vsel %vm1737_vm4, %v1689_v1, %v7171_v15  ;;  %v12026_v55 = vld [vmem:[#allocation74_spill] sm:$0xff] }
 0x20d   :  { %1368 = vrot.lane.b32.xlu0 %v12018_v17, %s6071_s13  ;;  %v1803_v59 = vsel %vm1794_vm6, %v1746_v63, %v7415_v38 }
 0x20e   :  { %v3211_v16 = vrot.slane %v3197_v41, %v7730_v62  ;;  %v1007_v43 = vpop.permute.xlu1 %1006  ;;  %v1525_v57 = vpop.permute.xlu0 %1524  ;;  %v1860_v27 = vsel %vm1851_vm7, %v1803_v59, %v7711_v22 }
 0x20f   :  { %v2086_v12 = vsel %vm2079_vm11, %v2029_v21, %v1525_v57  ;;  %v1916_v7 = vsel %vm1908_vm8, %v1859_v42, %v1007_v43 }
 0x210   :  { %v2291_v47 = vcombine.high %v2086_v12, %v2086_v12  ;;  %v2298_v13 = vrot.slane %v2086_v12, %v7730_v62  ;;  %1542 = vrot.lane.b32.xlu1 %v12019_v18, %s6075_s19  ;;  %v3212_v10 = vcombine.low %v3204_v3, %v3211_v16  ;;  %v12025_v3 = vld [vmem:[#allocation115_spill] sm:$0xff] }
 0x211   :  { %1224 = vrot.lane.b32.xlu0 %v6002_v29, %s6072_s16 }
 0x212   :  { %v2305_v49 = vrot.slane %v2291_v47, %v7730_v62  ;;  %v2306_v36 = vcombine.high %v2298_v13, %v2298_v13  ;;  %v3213_v2 = vcombine.low %v2289_v6, %v2298_v13  ;;  %v1009_v48 = vpop.permute.xlu1 %1008  ;;  %5817 = vmatmul.mubr.msk.f32.gmra.mrb[8].mxu0 %vm3961_vm12, %v3212_v10  ;;  %v1179_v40 = vpop.permute.xlu0 %1178 }
 0x213   :  { %5819 = vmatprep.mubr.msk.f32.mxu0 %vm6074_vm3, %v12008_v34  ;;  %v1973_v23 = vsel %vm1965_vm9, %v1916_v7, %v1179_v40  ;;  %v1917_v15 = vsel %vm1908_vm8, %v1860_v27, %v1009_v48 }
 0x214   :  { %v3214_v28 = vcombine.low %v2306_v36, %v2305_v49  ;;  %1398 = vrot.lane.b32.xlu1 %v12021_v56, %s6071_s13  ;;  %v3221_v4 = vrot.slane %v3213_v2, %v7730_v62 }
 0x215   :  { %1370 = vrot.lane.b32.xlu0 %v12022_v33, %s6071_s13 }
 0x216   :  { %v3228_v32 = vrot.slane %v3214_v28, %v7730_v62  ;;  %v1181_v54 = vpop.permute.xlu1 %1180  ;;  %v1353_v35 = vpop.permute.xlu0 %1352  ;;  %v6003_v28 = vld [vmem:[%s11430_s0 + $0x138] sm:$0xff] }
 0x217   :  { %v2030_v44 = vsel %vm2022_vm10, %v1973_v23, %v1353_v35  ;;  %v1974_v60 = vsel %vm1965_vm9, %v1917_v15, %v1181_v54  ;;  %v12027_v54 = vld [vmem:[#allocation33_spill] sm:$0xff] }
 0x218   :  { %1544 = vrot.lane.b32.xlu1 %v12024_v45, %s6075_s19  ;;  %v3229_v8 = vcombine.low %v3221_v4, %v3228_v32  ;;  %v1690_v4 = vsel %vm1680_vm5, %v7536_v53, %v12026_v55 }
 0x219   :  { %880 = vrot.lane.b32.xlu0 %v12015_v5, %s6068_s30  ;;  %v2307_v5 = vcombine.high %v2305_v49, %v2305_v49  ;;  %v1747_v35 = vsel %vm1737_vm4, %v1690_v4, %v7169_v14  ;;  %v6004_v14 = vld [vmem:[%s11430_s0 + $0xa8] sm:$0xff] }
 0x21a   :  { %v1355_v58 = vpop.permute.xlu1 %1354  ;;  %5820 = vmatmul.mubr.msk.f32.gmra.mrb[10].mxu0 %vm3961_vm12, %v3229_v8  ;;  %v1527_v51 = vpop.permute.xlu0 %1526  ;;  %v1804_v42 = vsel %vm1794_vm6, %v1747_v35, %v7413_v11  ;;  %v12028_v8 = vld [vmem:[#allocation79_spill] sm:$0xff] }
 0x21b   :  { %v2087_v37 = vsel %vm2079_vm11, %v2030_v44, %v1527_v51  ;;  %5822 = vmatprep.mubr.msk.f32.mxu0 %vm6074_vm3, %v12008_v34  ;;  %v2031_v22 = vsel %vm2022_vm10, %v1974_v60, %v1355_v58  ;;  %v1691_v63 = vsel %vm1680_vm5, %v7557_v9, %v12028_v8 }
 0x21c   :  { %v2308_v41 = vcombine.high %v2087_v37, %v2087_v37  ;;  %v2315_v38 = vrot.slane %v2087_v37, %v7730_v62  ;;  %1054 = vrot.lane.b32.xlu1 %v12016_v31, %s6070_s8  ;;  %v1748_v11 = vsel %vm1737_vm4, %v1691_v63, %v7179_v20 }
 0x21d   :  { %1572 = vrot.lane.b32.xlu0 %v12025_v3, %s6075_s19  ;;  %v1805_v9 = vsel %vm1794_vm6, %v1748_v11, %v7430_v26  ;;  %v6005_v26 = vld [vmem:[%s11430_s0 + $0x140] sm:$0xff] }
 0x21e   :  { %v2322_v16 = vrot.slane %v2308_v41, %v7730_v62  ;;  %v2323_v43 = vcombine.high %v2315_v38, %v2315_v38  ;;  %v3230_v21 = vcombine.low %v2307_v5, %v2315_v38  ;;  %v837_v57 = vpop.permute.xlu1 %836  ;;  %v1529_v12 = vpop.permute.xlu0 %1528 }
 0x21f   :  { %v2088_v6 = vsel %vm2079_vm11, %v2031_v22, %v1529_v12  ;;  %v1861_v53 = vsel %vm1851_vm7, %v1804_v42, %v837_v57  ;;  %v12030_v12 = vld [vmem:[#allocation20_spill] sm:$0xff] }
 0x220   :  { %v3231_v47 = vcombine.low %v2323_v43, %v2322_v16  ;;  %v2324_v13 = vcombine.high %v2088_v6, %v2088_v6  ;;  %v2331_v10 = vrot.slane %v2088_v6, %v7730_v62  ;;  %882 = vrot.lane.b32.xlu1 %v12021_v56, %s6068_s30  ;;  %v3238_v31 = vrot.slane %v3230_v21, %v7730_v62 }
 0x221   :  { %852 = vrot.lane.b32.xlu0 %v12018_v17, %s6068_s30 }
 0x222   :  { %v3245_v29 = vrot.slane %v3231_v47, %v7730_v62  ;;  %v2338_v49 = vrot.slane %v2324_v13, %v7730_v62  ;;  %v2339_v36 = vcombine.high %v2331_v10, %v2331_v10  ;;  %v839_v2 = vpop.permute.xlu1 %838  ;;  %v1011_v48 = vpop.permute.xlu0 %1010 }
 0x223   :  { %v1918_v23 = vsel %vm1908_vm8, %v1861_v53, %v1011_v48  ;;  %v1862_v27 = vsel %vm1851_vm7, %v1805_v9, %v839_v2  ;;  %v12037_v9 = vld [vmem:[#allocation96_spill] sm:$0xff] }
 0x224   :  { %v2340_v40 = vcombine.high %v2338_v49, %v2338_v49  ;;  %v3247_v24 = vcombine.low %v2331_v10, %v2339_v36  ;;  %1026 = vrot.lane.b32.xlu1 %v12019_v18, %s6070_s8  ;;  %v3246_v52 = vcombine.low %v3238_v31, %v3245_v29  ;;  %v6006_v29 = vld [vmem:[%s11430_s0 + $0xb0] sm:$0xff] }
 0x225   :  { %1226 = vrot.lane.b32.xlu0 %v6003_v28, %s6072_s16 }
 0x226   :  { %v3248_v17 = vcombine.low %v2338_v49, %v2340_v40  ;;  %v1013_v56 = vpop.permute.xlu1 %1012  ;;  %5823 = vmatmul.mubr.msk.f32.gmra.mrb[12].mxu0 %vm3961_vm12, %v3246_v52  ;;  %v1183_v30 = vpop.permute.xlu0 %1182  ;;  %v3255_v18 = vrot.slane %v3247_v24, %v7730_v62  ;;  %v12031_v49 = vld [vmem:[#allocation36_spill] sm:$0xff]  ;;  %v12032_v40 = vld [vmem:[#allocation78_spill] sm:$0xff]  ;;  %v12033_v52 = vld [vmem:[#allocation119_spill] sm:$0xff] }
 0x227   :  { %5825 = vmatprep.mubr.msk.f32.mxu0 %vm6074_vm3, %v12008_v34  ;;  %v1975_v59 = vsel %vm1965_vm9, %v1918_v23, %v1183_v30  ;;  %v1919_v20 = vsel %vm1908_vm8, %v1862_v27, %v1013_v56  ;;  %v1692_v24 = vsel %vm1680_vm5, %v7578_v50, %v12032_v40 }
 0x228   :  { %v3262_v32 = vrot.slane %v3248_v17, %v7730_v62  ;;  %1400 = vrot.lane.b32.xlu1 %v12027_v54, %s6071_s13  ;;  %v1749_v28 = vsel %vm1737_vm4, %v1692_v24, %v7177_v19  ;;  %v12034_v17 = vld [vmem:[#allocation89_spill] sm:$0xff] }
 0x229   :  { %1056 = vrot.lane.b32.xlu0 %v12025_v3, %s6070_s8  ;;  %v1806_v56 = vsel %vm1794_vm6, %v1749_v28, %v7428_v46  ;;  %v6008_v28 = vld [vmem:[%s11430_s0 + $0xb8] sm:$0xff] }
 0x22a   :  { %v1185_v0 = vpop.permute.xlu1 %1184  ;;  %v1357_v1 = vpop.permute.xlu0 %1356  ;;  %v3263_v7 = vcombine.low %v3255_v18, %v3262_v32  ;;  %v12035_v32 = vld [vmem:[#allocation83_spill] sm:$0xff] }
 0x22b   :  { %v2032_v44 = vsel %vm2022_vm10, %v1975_v59, %v1357_v1  ;;  %v1976_v41 = vsel %vm1965_vm9, %v1919_v20, %v1185_v0  ;;  %v1693_v19 = vsel %vm1680_vm5, %v7589_v39, %v12035_v32  ;;  %v12036_v0 = vld [vmem:[#allocation23_spill] sm:$0xff] }
 0x22c   :  { %1198 = vrot.lane.b32.xlu1 %v6004_v14, %s6072_s16  ;;  %5826 = vmatmul.mubr.msk.f32.gmra.mrb[14].mxu0 %vm3961_vm12, %v3263_v7  ;;  %v1750_v42 = vsel %vm1737_vm4, %v1693_v19, %v7187_v25 }
 0x22d   :  { %854 = vrot.lane.b32.xlu0 %v12022_v33, %s6068_s30  ;;  %5828 = vmatprep.mubr.msk.f32.mxu0 %vm6074_vm3, %v12008_v34  ;;  %v12029_v33 = vld [vmem:[#allocation112_spill] sm:$0xff]  ;;  %v1807_v1 = vsel %vm1794_vm6, %v1750_v42, %v7445_v61 }
 0x22e   :  { %v1359_v58 = vpop.permute.xlu1 %1358  ;;  %v1531_v51 = vpop.permute.xlu0 %1530 }
 0x22f   :  { %v2089_v37 = vsel %vm2079_vm11, %v2032_v44, %v1531_v51  ;;  %v2033_v38 = vsel %vm2022_vm10, %v1976_v41, %v1359_v58 }
 0x230   :  { %v2341_v15 = vcombine.high %v2089_v37, %v2089_v37  ;;  %v2348_v5 = vrot.slane %v2089_v37, %v7730_v62  ;;  %1574 = vrot.lane.b32.xlu1 %v12029_v33, %s6075_s19 }
 0x231   :  { %1228 = vrot.lane.b32.xlu0 %v6005_v26, %s6072_s16 }
 0x232   :  { %v2356_v60 = vcombine.high %v2348_v5, %v2348_v5  ;;  %v1533_v3 = vpop.permute.xlu1 %1532  ;;  %v841_v22 = vpop.permute.xlu0 %840  ;;  %v2355_v43 = vrot.slane %v2341_v15, %v7730_v62 }
 0x233   :  { %v2090_v16 = vsel %vm2079_vm11, %v2033_v38, %v1533_v3  ;;  %v1863_v18 = vsel %vm1851_vm7, %v1806_v56, %v841_v22  ;;  %v12039_v38 = vld [vmem:[#allocation215_spill] sm:$0xff] }
 0x234   :  { %v3264_v21 = vcombine.low %v2348_v5, %v2356_v60  ;;  %v2364_v57 = vrot.slane %v2090_v16, %v7730_v62  ;;  %1372 = vrot.lane.b32.xlu1 %v12030_v12, %s6071_s13 }
 0x235   :  { %1028 = vrot.lane.b32.xlu0 %v12024_v45, %s6070_s8  ;;  %v2357_v45 = vcombine.high %v2090_v16, %v2090_v16 }
 0x236   :  { %v3265_v6 = vcombine.low %v2355_v43, %v2364_v57  ;;  %v843_v47 = vpop.permute.xlu1 %842  ;;  %v1015_v13 = vpop.permute.xlu0 %1014  ;;  %v3272_v10 = vrot.slane %v3264_v21, %v7730_v62  ;;  %v2372_v4 = vcombine.high %v2364_v57, %v2364_v57 }
 0x237   :  { %v2371_v50 = vrot.slane %v2357_v45, %v7730_v62  ;;  %v1920_v35 = vsel %vm1908_vm8, %v1863_v18, %v1015_v13  ;;  %v1864_v63 = vsel %vm1851_vm7, %v1807_v1, %v843_v47  ;;  %v12041_v47 = vld [vmem:[#allocation2_spill] sm:$0xff]  ;;  %v6007_v45 = vld [vmem:[%s11430_s0 + $0x148] sm:$0xff] }
 0x238   :  { %v3279_v31 = vrot.slane %v3265_v6, %v7730_v62  ;;  %1200 = vrot.lane.b32.xlu1 %v6006_v29, %s6072_s16 }
 0x239   :  { %1402 = vrot.lane.b32.xlu0 %v12031_v49, %s6071_s13  ;;  %v3281_v8 = vcombine.low %v2372_v4, %v2371_v50  ;;  %v2373_v25 = vcombine.high %v2371_v50, %v2371_v50 }
 0x23a   :  { %v1017_v36 = vpop.permute.xlu1 %1016  ;;  %v1187_v2 = vpop.permute.xlu0 %1186  ;;  %v3280_v48 = vcombine.low %v3272_v10, %v3279_v31 }
 0x23b   :  { %v1977_v46 = vsel %vm1965_vm9, %v1920_v35, %v1187_v2  ;;  %v1921_v14 = vsel %vm1908_vm8, %v1864_v63, %v1017_v36  ;;  %v3289_v5 = vrot.slane %v3281_v8, %v7730_v62  ;;  %v6010_v63 = vld [vmem:[%s11430_s0 + $0xc0] sm:$0xff] }
 0x23c   :  { %1576 = vrot.lane.b32.xlu1 %v12033_v52, %s6075_s19  ;;  %5829 = vmatmul.mubr.msk.f32.gmra.mrb[16].mxu0 %vm3961_vm12, %v3280_v48 }
 0x23d   :  { %1546 = vrot.lane.b32.xlu0 %v12034_v17, %s6075_s19  ;;  %5831 = vmatprep.mubr.msk.f32.mxu0 %vm6074_vm3, %v12008_v34 }
 0x23e   :  { %v1189_v30 = vpop.permute.xlu1 %1188  ;;  %v1361_v55 = vpop.permute.xlu0 %1360 }
 0x23f   :  { %v2034_v7 = vsel %vm2022_vm10, %v1977_v46, %v1361_v55  ;;  %v1978_v61 = vsel %vm1965_vm9, %v1921_v14, %v1189_v30  ;;  %v12042_v46 = vld [vmem:[#allocation35_spill] sm:$0xff] }
 0x240   :  { %856 = vrot.lane.b32.xlu1 %v12030_v12, %s6068_s30  ;;  %v12040_v12 = vld [vmem:[#allocation160_spill] sm:$0xff] }
 0x241   :  { %1374 = vrot.lane.b32.xlu0 %v12036_v0, %s6071_s13 }
 0x242   :  { %v1363_v53 = vpop.permute.xlu1 %1362  ;;  %v1535_v39 = vpop.permute.xlu0 %1534 }
 0x243   :  { %v2091_v23 = vsel %vm2079_vm11, %v2034_v7, %v1535_v39  ;;  %v2035_v44 = vsel %vm2022_vm10, %v1978_v61, %v1363_v53  ;;  %v6009_v39 = vld [vmem:[%s11430_s0 + $0x150] sm:$0xff]  ;;  %v12046_v61 = vld [vmem:[#allocation87_spill] sm:$0xff] }
 0x244   :  { %v2374_v11 = vcombine.high %v2091_v23, %v2091_v23  ;;  %v2381_v59 = vrot.slane %v2091_v23, %v7730_v62  ;;  %1548 = vrot.lane.b32.xlu1 %v12037_v9, %s6075_s19 }
 0x245   :  { %884 = vrot.lane.b32.xlu0 %v12027_v54, %s6068_s30  ;;  %v12038_v54 = vld [vmem:[#allocation82_spill] sm:$0xff] }
 0x246   :  { %v2388_v58 = vrot.slane %v2374_v11, %v7730_v62  ;;  %v2389_v51 = vcombine.high %v2381_v59, %v2381_v59  ;;  %v3282_v27 = vcombine.low %v2373_v25, %v2381_v59  ;;  %v1537_v37 = vpop.permute.xlu1 %1536  ;;  %v845_v20 = vpop.permute.xlu0 %844  ;;  %v1694_v60 = vsel %vm1680_vm5, %v12039_v38, %v12038_v54  ;;  %v12044_v25 = vld [vmem:[#allocation116_spill] sm:$0xff]  ;;  %v12045_v11 = vld [vmem:[#allocation93_spill] sm:$0xff]  ;;  %v12052_v54 = vld [vmem:[#allocation26_spill] sm:$0xff] }
 0x247   :  { %v2092_v15 = vsel %vm2079_vm11, %v2035_v44, %v1537_v37  ;;  %v1751_v6 = vsel %vm1737_vm4, %v1694_v60, %v12040_v12  ;;  %v12047_v44 = vld [vmem:[#allocation218_spill] sm:$0xff]  ;;  %v12053_v38 = vld [vmem:[#allocation4_spill] sm:$0xff] }
 0x248   :  { %v3296_v41 = vrot.slane %v3282_v27, %v7730_v62  ;;  %v2397_v26 = vrot.slane %v2092_v15, %v7730_v62  ;;  %1058 = vrot.lane.b32.xlu1 %v12029_v33, %s6070_s8  ;;  %v3298_v3 = vcombine.low %v2389_v51, %v2388_v58  ;;  %v2390_v22 = vcombine.high %v2092_v15, %v2092_v15  ;;  %v6011_v51 = vld [vmem:[%s11430_s0 + $0x100] sm:$0xff]  ;;  %v12048_v27 = vld [vmem:[#allocation111_spill] sm:$0xff] }
 0x249   :  { %1030 = vrot.lane.b32.xlu0 %v12034_v17, %s6070_s8  ;;  %v1808_v13 = vsel %vm1794_vm6, %v1751_v6, %v12041_v47  ;;  %v1695_v58 = vsel %vm1680_vm5, %v12047_v44, %v12046_v61  ;;  %v1709_v37 = vsel %vm1680_vm5, %v6011_v51, %v12048_v27  ;;  %v12050_v15 = vld [vmem:[#allocation162_spill] sm:$0xff]  ;;  %v6014_v27 = vld [vmem:[%s11430_s0 + $0x158] sm:$0xff] }
 0x24a   :  { %v2405_v16 = vcombine.high %v2397_v26, %v2397_v26  ;;  %v1191_v43 = vpop.permute.xlu1 %1190  ;;  %v1019_v21 = vpop.permute.xlu0 %1018  ;;  %v3297_v57 = vcombine.low %v3289_v5, %v3296_v41  ;;  %v1865_v10 = vsel %vm1851_vm7, %v1808_v13, %v845_v20  ;;  %v3306_v31 = vrot.slane %v3298_v3, %v7730_v62  ;;  %v12049_v20 = vld [vmem:[#allocation38_spill] sm:$0xff]  ;;  %v12051_v41 = vld [vmem:[#allocation175_spill] sm:$0xff] }
 0x24b   :  { %v2404_v29 = vrot.slane %v2390_v22, %v7730_v62  ;;  %v1922_v2 = vsel %vm1908_vm8, %v1865_v10, %v1019_v21  ;;  %v1752_v5 = vsel %vm1737_vm4, %v1695_v58, %v12050_v15  ;;  %v12054_v3 = vld [vmem:[#allocation202_spill] sm:$0xff] }
 0x24c   :  { %v3299_v33 = vcombine.low %v2397_v26, %v2405_v16  ;;  %886 = vrot.lane.b32.xlu1 %v12031_v49, %s6068_s30  ;;  %5832 = vmatmul.mubr.msk.f32.gmra.mrb[18].mxu0 %vm3961_vm12, %v3297_v57  ;;  %v1979_v24 = vsel %vm1965_vm9, %v1922_v2, %v1191_v43  ;;  %v1766_v26 = vsel %vm1737_vm4, %v1709_v37, %v12051_v41  ;;  %v12060_v41 = vld [vmem:[#allocation86_spill] sm:$0xff] }
 0x24d   :  { %858 = vrot.lane.b32.xlu0 %v12036_v0, %s6068_s30  ;;  %5834 = vmatprep.mubr.msk.f32.mxu0 %vm6074_vm3, %v12008_v34  ;;  %v2406_v17 = vcombine.high %v2404_v29, %v2404_v29  ;;  %v12043_v0 = vld [vmem:[#allocation22_spill] sm:$0xff]  ;;  %v1809_v60 = vsel %vm1794_vm6, %v1752_v5, %v12053_v38  ;;  %v1823_v22 = vsel %vm1794_vm6, %v1766_v26, %v12054_v3  ;;  %v12061_v26 = vld [vmem:[#allocation221_spill] sm:$0xff] }
 0x24e   :  { %v3313_v36 = vrot.slane %v3299_v33, %v7730_v62  ;;  %v847_v48 = vpop.permute.xlu1 %846  ;;  %v1365_v49 = vpop.permute.xlu0 %1364  ;;  %v1696_v38 = vsel %vm1680_vm5, %v12061_v26, %v12060_v41  ;;  %v12062_v3 = vld [vmem:[#allocation37_spill] sm:$0xff] }
 0x24f   :  { %v2036_v56 = vsel %vm2022_vm10, %v1979_v24, %v1365_v49  ;;  %v3315_v18 = vcombine.low %v2404_v29, %v2406_v17  ;;  %v1866_v21 = vsel %vm1851_vm7, %v1809_v60, %v847_v48 }
 0x250   :  { %1230 = vrot.lane.b32.xlu1 %v6007_v45, %s6072_s16  ;;  %v3314_v40 = vcombine.low %v3306_v31, %v3313_v36 }
 0x251   :  { %1202 = vrot.lane.b32.xlu0 %v6008_v28, %s6072_s16  ;;  %v3323_v1 = vrot.slane %v3315_v18, %v7730_v62  ;;  %v12056_v28 = vld [vmem:[#allocation100_spill] sm:$0xff]  ;;  %v6012_v18 = vld [vmem:[%s11430_s0 + $0x108] sm:$0xff] }
 0x252   :  { %v1539_v30 = vpop.permute.xlu1 %1538  ;;  %5835 = vmatmul.mubr.msk.f32.gmra.mrb[20].mxu0 %vm3961_vm12, %v3314_v40  ;;  %v875_v55 = vpop.permute.xlu0 %874  ;;  %v12055_v40 = vld [vmem:[#allocation123_spill] sm:$0xff] }
 0x253   :  { %v2093_v50 = vsel %vm2079_vm11, %v2036_v56, %v1539_v30  ;;  %5837 = vmatprep.mubr.msk.f32.mxu0 %vm6074_vm3, %v12008_v34  ;;  %v1880_v57 = vsel %vm1851_vm7, %v1823_v22, %v875_v55  ;;  %v12063_v22 = vld [vmem:[#allocation161_spill] sm:$0xff] }
 0x254   :  { %v2414_v4 = vrot.slane %v2093_v50, %v7730_v62  ;;  %1060 = vrot.lane.b32.xlu1 %v12033_v52, %s6070_s8  ;;  %v2407_v47 = vcombine.high %v2093_v50, %v2093_v50 }
 0x255   :  { %1032 = vrot.lane.b32.xlu0 %v12037_v9, %s6070_s8 }
 0x256   :  { %v2422_v32 = vcombine.high %v2414_v4, %v2414_v4  ;;  %v1049_v19 = vpop.permute.xlu1 %1048  ;;  %v1021_v35 = vpop.permute.xlu0 %1020  ;;  %v2421_v24 = vrot.slane %v2407_v47, %v7730_v62 }
 0x257   :  { %v1937_v12 = vsel %vm1908_vm8, %v1880_v57, %v1049_v19  ;;  %v1923_v6 = vsel %vm1908_vm8, %v1866_v21, %v1021_v35  ;;  %v12064_v21 = vld [vmem:[#allocation24_spill] sm:$0xff]  ;;  %v12065_v57 = vld [vmem:[#allocation3_spill] sm:$0xff] }
 0x258   :  { %v3316_v42 = vcombine.low %v2414_v4, %v2422_v32  ;;  %1404 = vrot.lane.b32.xlu1 %v12042_v46, %s6071_s13  ;;  %v12057_v32 = vld [vmem:[#allocation110_spill] sm:$0xff] }
 0x259   :  { %1376 = vrot.lane.b32.xlu0 %v12043_v0, %s6071_s13  ;;  %v1710_v19 = vsel %vm1680_vm5, %v6012_v18, %v12057_v32  ;;  %v12068_v18 = vld [vmem:[#allocation164_spill] sm:$0xff] }
 0x25a   :  { %v3330_v7 = vrot.slane %v3316_v42, %v7730_v62  ;;  %v1193_v53 = vpop.permute.xlu1 %1192  ;;  %v8136_v52 = vpop.permute.xlu0 %876  ;;  %v12058_v42 = vld [vmem:[#allocation174_spill] sm:$0xff] }
 0x25b   :  { %v1980_v13 = vsel %vm1965_vm9, %v1923_v6, %v1193_v53 }
 0x25c   :  { %1232 = vrot.lane.b32.xlu1 %v6009_v39, %s6072_s16  ;;  %v3331_v8 = vcombine.low %v3323_v1, %v3330_v7 }
 0x25d   :  { %1204 = vrot.lane.b32.xlu0 %v6010_v63, %s6072_s16 }
 0x25e   :  { %v1051_v23 = vpop.permute.xlu1 %1050  ;;  %5838 = vmatmul.mubr.msk.f32.gmra.mrb[22].mxu0 %vm3961_vm12, %v3331_v8  ;;  %v1221_v14 = vpop.permute.xlu0 %1220 }
 0x25f   :  { %5840 = vmatprep.mubr.msk.f32.mxu0 %vm6074_vm3, %v12008_v34  ;;  %v1994_v33 = vsel %vm1965_vm9, %v1937_v12, %v1221_v14 }
 0x260   :  { %1578 = vrot.lane.b32.xlu1 %v12044_v25, %s6075_s19 }
 0x261   :  { %1550 = vrot.lane.b32.xlu0 %v12045_v11, %s6075_s19 }
 0x262   :  { %v1395_v59 = vpop.permute.xlu1 %1394  ;;  %v1367_v9 = vpop.permute.xlu0 %1366 }
 0x263   :  { %v2051_v10 = vsel %vm2022_vm10, %v1994_v33, %v1395_v59  ;;  %v2037_v31 = vsel %vm2022_vm10, %v1980_v13, %v1367_v9 }
 0x264   :  { %1406 = vrot.lane.b32.xlu1 %v12049_v20, %s6071_s13 }
 0x265   :  { %1378 = vrot.lane.b32.xlu0 %v12052_v54, %s6071_s13 }
 0x266   :  { %v1223_v16 = vpop.permute.xlu1 %1222  ;;  %v8173_v43 = vpop.permute.xlu0 %848 }
 0x268   :  { %888 = vrot.lane.b32.xlu1 %v12042_v46, %s6068_s30  ;;  %v1767_v46 = vsel %vm1737_vm4, %v1710_v19, %v12058_v42  ;;  %v12069_v19 = vld [vmem:[#allocation97_spill] sm:$0xff] }
 0x269   :  { %860 = vrot.lane.b32.xlu0 %v12043_v0, %s6068_s30  ;;  %v12059_v0 = vld [vmem:[#allocation68_spill] sm:$0xff] }
 0x26a   :  { %v1569_v29 = vpop.permute.xlu1 %1568  ;;  %v1541_v36 = vpop.permute.xlu0 %1540  ;;  %v1824_v1 = vsel %vm1794_vm6, %v1767_v46, %v12059_v0 }
 0x26b   :  { %v8188_v2 = vsel %vm2079_vm11, %v2051_v10, %v1569_v29  ;;  %v2094_v48 = vsel %vm2079_vm11, %v2037_v31, %v1541_v36  ;;  %v1881_v63 = vsel %vm1851_vm7, %v1824_v1, %v8136_v52  ;;  %v6015_v29 = vld [vmem:[%s11430_s0 + $0x160] sm:$0xff] }
 0x26c   :  { %v2423_v49 = vcombine.high %v2094_v48, %v2094_v48  ;;  %v2430_v45 = vrot.slane %v2094_v48, %v7730_v62  ;;  %1580 = vrot.lane.b32.xlu1 %v12055_v40, %s6075_s19  ;;  %v2654_v17 = vcombine.high %v8188_v2, %v8188_v2 }
 0x26d   :  { %1552 = vrot.lane.b32.xlu0 %v12056_v28, %s6075_s19 }
 0x26e   :  { %v8200_v56 = vrot.slane %v2423_v49, %v7730_v62  ;;  %v2438_v30 = vcombine.high %v2430_v45, %v2430_v45  ;;  %v1397_v55 = vpop.permute.xlu1 %1396  ;;  %v1023_v50 = vpop.permute.xlu0 %1022  ;;  %v3332_v4 = vcombine.low %v2421_v24, %v2430_v45  ;;  %v2668_v7 = vrot.slane %v2654_v17, %v7730_v62  ;;  %v6016_v24 = vld [vmem:[%s11430_s0 + $0x80] sm:$0xff]  ;;  %v12066_v17 = vld [vmem:[#allocation91_spill] sm:$0xff] }
 0x270   :  { %v3333_v35 = vcombine.low %v2438_v30, %v8200_v56  ;;  %1062 = vrot.lane.b32.xlu1 %v12044_v25, %s6070_s8  ;;  %v3340_v53 = vrot.slane %v3332_v4, %v7730_v62  ;;  %v1938_v25 = vsel %vm1908_vm8, %v1881_v63, %v1051_v23  ;;  %v2670_v61 = vcombine.high %v2668_v7, %v2668_v7  ;;  %v12067_v4 = vld [vmem:[#allocation120_spill] sm:$0xff] }
 0x271   :  { %1034 = vrot.lane.b32.xlu0 %v12045_v11, %s6070_s8  ;;  %v6013_v11 = vld [vmem:[%s11430_s0 + $0xc8] sm:$0xff]  ;;  %v1995_v9 = vsel %vm1965_vm9, %v1938_v25, %v1223_v16  ;;  %v1753_v16 = vsel %vm1737_vm4, %v1696_v38, %v12063_v22  ;;  %v1697_v30 = vsel %vm1680_vm5, %v6016_v24, %v12066_v17  ;;  %v12071_v25 = vld [vmem:[#allocation40_spill] sm:$0xff] }
 0x272   :  { %v3347_v39 = vrot.slane %v3333_v35, %v7730_v62  ;;  %v8219_v8 = vpop.permute.xlu1 %878  ;;  %v851_v14 = vpop.permute.xlu0 %850  ;;  %v2052_v44 = vsel %vm2022_vm10, %v1995_v9, %v1397_v55  ;;  %v3553_v37 = vcombine.low %v2668_v7, %v2670_v61  ;;  %v1810_v12 = vsel %vm1794_vm6, %v1753_v16, %v12065_v57  ;;  %v12070_v35 = vld [vmem:[#allocation6_spill] sm:$0xff] }
 0x273   :  { %v1867_v33 = vsel %vm1851_vm7, %v1810_v12, %v8173_v43  ;;  %v1754_v32 = vsel %vm1737_vm4, %v1697_v30, %v12068_v18 }
 0x274   :  { %1206 = vrot.lane.b32.xlu1 %v6013_v11, %s6072_s16  ;;  %v3348_v59 = vcombine.low %v3340_v53, %v3347_v39  ;;  %v3561_v6 = vrot.slane %v3553_v37, %v7730_v62  ;;  %v1924_v31 = vsel %vm1908_vm8, %v1867_v33, %v1023_v50  ;;  %v1811_v42 = vsel %vm1794_vm6, %v1754_v32, %v12070_v35  ;;  %v6017_v11 = vld [vmem:[%s11430_s0 + $0x110] sm:$0xff] }
 0x275   :  { %890 = vrot.lane.b32.xlu0 %v12049_v20, %s6068_s30  ;;  %v1868_v7 = vsel %vm1851_vm7, %v1811_v42, %v851_v14  ;;  %v12073_v14 = vld [vmem:[#allocation177_spill] sm:$0xff]  ;;  %v12074_v37 = vld [vmem:[#allocation204_spill] sm:$0xff] }
 0x276   :  { %v1571_v58 = vpop.permute.xlu1 %1570  ;;  %5841 = vmatmul.mubr.msk.f32.gmra.mrb[24].mxu0 %vm3961_vm12, %v3348_v59  ;;  %v12072_v59 = vld [vmem:[#allocation114_spill] sm:$0xff]  ;;  %v12077_v42 = vld [vmem:[#allocation104_spill] sm:$0xff] }
 0x277   :  { %v8234_v52 = vsel %vm2079_vm11, %v2052_v44, %v1571_v58  ;;  %v1195_v23 = vpop.permute.xlu0 %1194  ;;  %5843 = vmatprep.mubr.msk.f32.mxu0 %vm6074_vm3, %v12008_v34  ;;  %v1711_v9 = vsel %vm1680_vm5, %v6017_v11, %v12072_v59  ;;  %v12081_v59 = vld [vmem:[#allocation203_spill] sm:$0xff] }
 0x278   :  { %v2678_v51 = vrot.slane %v8234_v52, %v7730_v62  ;;  %1064 = vrot.lane.b32.xlu1 %v12055_v40, %s6070_s8  ;;  %v1981_v48 = vsel %vm1965_vm9, %v1924_v31, %v1195_v23  ;;  %v1768_v44 = vsel %vm1737_vm4, %v1711_v9, %v12073_v14  ;;  %v2671_v16 = vcombine.high %v8234_v52, %v8234_v52 }
 0x279   :  { %1234 = vrot.lane.b32.xlu0 %v6014_v27, %s6072_s16 }
 0x27a   :  { %v2686_v20 = vcombine.high %v2678_v51, %v2678_v51  ;;  %v8246_v15 = vpop.permute.xlu1 %1052 }
 0x27b   :  { %v1025_v5 = vpop.permute.xlu0 %1024 }
 0x27c   :  { %v3554_v60 = vcombine.low %v2678_v51, %v2686_v20  ;;  %1408 = vrot.lane.b32.xlu1 %v12062_v3, %s6071_s13  ;;  %v1925_v39 = vsel %vm1908_vm8, %v1868_v7, %v1025_v5  ;;  %v1825_v20 = vsel %vm1794_vm6, %v1768_v44, %v12074_v37  ;;  %v12078_v7 = vld [vmem:[#allocation113_spill] sm:$0xff] }
 0x27d   :  { %1380 = vrot.lane.b32.xlu0 %v12064_v21, %s6071_s13  ;;  %v1882_v26 = vsel %vm1851_vm7, %v1825_v20, %v8219_v8 }
 0x27e   :  { %v3568_v47 = vrot.slane %v3554_v60, %v7730_v62  ;;  %v1197_v13 = vpop.permute.xlu1 %1196  ;;  %v6018_v60 = vld [vmem:[%s11430_s0 + $0xd0] sm:$0xff]  ;;  %v1939_v57 = vsel %vm1908_vm8, %v1882_v26, %v8246_v15 }
 0x27f   :  { %v1369_v10 = vpop.permute.xlu0 %1368  ;;  %v1982_v61 = vsel %vm1965_vm9, %v1925_v39, %v1197_v13  ;;  %v12079_v39 = vld [vmem:[#allocation39_spill] sm:$0xff]  ;;  %v12082_v26 = vld [vmem:[#allocation124_spill] sm:$0xff] }
 0x280   :  { %1236 = vrot.lane.b32.xlu1 %v6015_v29, %s6072_s16  ;;  %v3569_v36 = vcombine.low %v3561_v6, %v3568_v47  ;;  %v2038_v49 = vsel %vm2022_vm10, %v1981_v48, %v1369_v10 }
 0x281   :  { %862 = vrot.lane.b32.xlu0 %v12052_v54, %s6068_s30  ;;  %v2439_v54 = vcombine.high %v8200_v56, %v8200_v56 }
 0x282   :  { %v1543_v45 = vpop.permute.xlu1 %1542  ;;  %5880 = vmatmul.mubr.msk.f32.vlgmr.msra.gmra.mrb[0].mxu1 %vm3961_vm12, %v3569_v36  ;;  %v12075_v36 = vld [vmem:[#allocation127_spill] sm:$0xff] }
 0x283   :  { %v2095_v43 = vsel %vm2079_vm11, %v2038_v49, %v1543_v45  ;;  %v1225_v40 = vpop.permute.xlu0 %1224  ;;  %5882 = vmatprep.mubr.msk.f32.mxu1 %vm6074_vm3, %v12008_v34 }
 0x284   :  { %v2440_v55 = vcombine.high %v2095_v43, %v2095_v43  ;;  %v2447_v50 = vrot.slane %v2095_v43, %v7730_v62  ;;  %1582 = vrot.lane.b32.xlu1 %v12067_v4, %s6075_s19  ;;  %v1996_v8 = vsel %vm1965_vm9, %v1939_v57, %v1225_v40  ;;  %v6022_v57 = vld [vmem:[%s11430_s0 + $0x120] sm:$0xff] }
 0x285   :  { %1554 = vrot.lane.b32.xlu0 %v12069_v19, %s6075_s19 }
 0x286   :  { %v2454_v46 = vrot.slane %v2440_v55, %v7730_v62  ;;  %v2455_v0 = vcombine.high %v2447_v50, %v2447_v50  ;;  %v3349_v1 = vcombine.low %v2439_v54, %v2447_v50  ;;  %v1399_v56 = vpop.permute.xlu1 %1398  ;;  %v12076_v55 = vld [vmem:[#allocation28_spill] sm:$0xff] }
 0x287   :  { %v1371_v53 = vpop.permute.xlu0 %1370  ;;  %v2053_v13 = vsel %vm2022_vm10, %v1996_v8, %v1399_v56  ;;  %v6020_v56 = vld [vmem:[%s11430_s0 + $0x118] sm:$0xff]  ;;  %v12083_v8 = vld [vmem:[#allocation118_spill] sm:$0xff] }
 0x288   :  { %v3350_v63 = vcombine.low %v2455_v0, %v2454_v46  ;;  %1410 = vrot.lane.b32.xlu1 %v12071_v25, %s6071_s13  ;;  %v3357_v58 = vrot.slane %v3349_v1, %v7730_v62  ;;  %v2039_v51 = vsel %vm2022_vm10, %v1982_v61, %v1371_v53  ;;  %v1712_v53 = vsel %vm1680_vm5, %v6020_v56, %v12078_v7 }
 0x289   :  { %1036 = vrot.lane.b32.xlu0 %v12056_v28, %s6070_s8 }
 0x28a   :  { %v3364_v23 = vrot.slane %v3350_v63, %v7730_v62  ;;  %v1545_v27 = vpop.permute.xlu1 %1544  ;;  %v12080_v63 = vld [vmem:[#allocation176_spill] sm:$0xff] }
 0x28b   :  { %v2096_v5 = vsel %vm2079_vm11, %v2039_v51, %v1545_v27  ;;  %v881_v41 = vpop.permute.xlu0 %880  ;;  %v1769_v11 = vsel %vm1737_vm4, %v1712_v53, %v12080_v63  ;;  %v6026_v53 = vld [vmem:[%s11430_s0 + $0x90] sm:$0xff]  ;;  %v12090_v63 = vld [vmem:[#allocation95_spill] sm:$0xff] }
 0x28c   :  { %v2456_v28 = vcombine.high %v2096_v5, %v2096_v5  ;;  %v2463_v38 = vrot.slane %v2096_v5, %v7730_v62  ;;  %1208 = vrot.lane.b32.xlu1 %v6018_v60, %s6072_s16  ;;  %v3365_v22 = vcombine.low %v3357_v58, %v3364_v23  ;;  %v1826_v9 = vsel %vm1794_vm6, %v1769_v11, %v12081_v59 }
 0x28d   :  { %892 = vrot.lane.b32.xlu0 %v12062_v3, %s6068_s30  ;;  %v2685_v3 = vrot.slane %v2671_v16, %v7730_v62  ;;  %v1883_v14 = vsel %vm1851_vm7, %v1826_v9, %v881_v41  ;;  %v1699_v11 = vsel %vm1680_vm5, %v6026_v53, %v12090_v63  ;;  %v6029_v63 = vld [vmem:[%s11430_s0 + $0x98] sm:$0xff] }
 0x28e   :  { %v2470_v12 = vrot.slane %v2456_v28, %v7730_v62  ;;  %v2471_v6 = vcombine.high %v2463_v38, %v2463_v38  ;;  %v1055_v47 = vpop.permute.xlu1 %1054  ;;  %5844 = vmatmul.mubr.msk.f32.gmra.mrb[26].mxu0 %vm3961_vm12, %v3365_v22 }
 0x28f   :  { %v1573_v33 = vpop.permute.xlu0 %1572  ;;  %5846 = vmatprep.mubr.msk.f32.mxu0 %vm6074_vm3, %v12008_v34  ;;  %v1940_v58 = vsel %vm1908_vm8, %v1883_v14, %v1055_v47  ;;  %v6023_v47 = vld [vmem:[%s11430_s0 + $0x88] sm:$0xff]  ;;  %v12091_v14 = vld [vmem:[#allocation101_spill] sm:$0xff] }
 0x290   :  { %v2472_v52 = vcombine.high %v2470_v12, %v2470_v12  ;;  %v3366_v10 = vcombine.low %v2463_v38, %v2471_v6  ;;  %v2110_v15 = vsel %vm2079_vm11, %v2053_v13, %v1573_v33  ;;  %1066 = vrot.lane.b32.xlu1 %v12067_v4, %s6070_s8  ;;  %v12084_v13 = vld [vmem:[#allocation90_spill] sm:$0xff] }
 0x291   :  { %v2687_v31 = vcombine.high %v2110_v15, %v2110_v15  ;;  %v2694_v29 = vrot.slane %v2110_v15, %v7730_v62  ;;  %1584 = vrot.lane.b32.xlu0 %v12075_v36, %s6075_s19  ;;  %v1698_v33 = vsel %vm1680_vm5, %v6023_v47, %v12084_v13  ;;  %v12086_v15 = vld [vmem:[#allocation163_spill] sm:$0xff]  ;;  %v12094_v13 = vld [vmem:[#allocation42_spill] sm:$0xff] }
 0x292   :  { %v3367_v48 = vcombine.low %v2470_v12, %v2472_v52  ;;  %v8339_v49 = vpop.permute.xlu1 %882  ;;  %v3374_v17 = vrot.slane %v3366_v10, %v7730_v62  ;;  %v1713_v12 = vsel %vm1680_vm5, %v6022_v57, %v12083_v8  ;;  %v12085_v52 = vld [vmem:[#allocation179_spill] sm:$0xff] }
 0x293   :  { %v2701_v45 = vrot.slane %v2687_v31, %v7730_v62  ;;  %v2702_v43 = vcombine.high %v2694_v29, %v2694_v29  ;;  %v3570_v40 = vcombine.low %v2685_v3, %v2694_v29  ;;  %v8342_v24 = vpop.permute.xlu0 %852  ;;  %v1770_v10 = vsel %vm1737_vm4, %v1713_v12, %v12085_v52  ;;  %v12087_v31 = vld [vmem:[#allocation205_spill] sm:$0xff] }
 0x294   :  { %v3381_v30 = vrot.slane %v3367_v48, %v7730_v62  ;;  %864 = vrot.lane.b32.xlu1 %v12064_v21, %s6068_s30  ;;  %v6019_v21 = vld [vmem:[%s11430_s0 + $0x168] sm:$0xff]  ;;  %v1755_v3 = vsel %vm1737_vm4, %v1698_v33, %v12086_v15  ;;  %v1827_v29 = vsel %vm1794_vm6, %v1770_v10, %v12087_v31 }
 0x295   :  { %v3571_v54 = vcombine.low %v2702_v43, %v2701_v45  ;;  %1382 = vrot.lane.b32.xlu0 %v12076_v55, %s6071_s13  ;;  %v3578_v18 = vrot.slane %v3570_v40, %v7730_v62  ;;  %v2703_v20 = vcombine.high %v2701_v45, %v2701_v45  ;;  %v12088_v43 = vld [vmem:[#allocation5_spill] sm:$0xff] }
 0x296   :  { %v8350_v50 = vpop.permute.xlu1 %1026  ;;  %v3382_v4 = vcombine.low %v3374_v17, %v3381_v30  ;;  %v1812_v40 = vsel %vm1794_vm6, %v1755_v3, %v12088_v43  ;;  %v1884_v17 = vsel %vm1851_vm7, %v1827_v29, %v8339_v49  ;;  %v12089_v49 = vld [vmem:[#allocation27_spill] sm:$0xff] }
 0x297   :  { %v3585_v32 = vrot.slane %v3571_v54, %v7730_v62  ;;  %v1227_v35 = vpop.permute.xlu0 %1226  ;;  %v1869_v54 = vsel %vm1851_vm7, %v1812_v40, %v8342_v24  ;;  %v8439_v24 = vld [vmem:[%s11430_s0 + $0xe8] sm:$0xff] }
 0x298   :  { %1556 = vrot.lane.b32.xlu1 %v12077_v42, %s6075_s19  ;;  %5847 = vmatmul.mubr.msk.f32.gmra.mrb[28].mxu0 %vm3961_vm12, %v3382_v4  ;;  %v1997_v23 = vsel %vm1965_vm9, %v1940_v58, %v1227_v35  ;;  %v6024_v4 = vld [vmem:[%s11430_s0 + $0xe0] sm:$0xff] }
 0x299   :  { %1238 = vrot.lane.b32.xlu0 %v6019_v21, %s6072_s16  ;;  %v3586_v46 = vcombine.low %v3578_v18, %v3585_v32  ;;  %5849 = vmatprep.mubr.msk.f32.mxu0 %vm6074_vm3, %v12008_v34  ;;  %v1926_v32 = vsel %vm1908_vm8, %v1869_v54, %v8350_v50  ;;  %v812_v21 = vrot.slane %v6024_v4, 1  ;;  %v12092_v58 = vld [vmem:[#allocation166_spill] sm:$0xff] }
 0x29a   :  { %v1401_v0 = vpop.permute.xlu1 %1400 }
 0x29b   :  { %5883 = vmatmul.mubr.msk.f32.gmra.mrb[2].mxu1 %vm3961_vm12, %v3586_v46  ;;  %v1057_v1 = vpop.permute.xlu0 %1056 }
 0x29c   :  { %1412 = vrot.lane.b32.xlu1 %v12079_v39, %s6071_s13  ;;  %5885 = vmatprep.mubr.msk.f32.mxu1 %vm6074_vm3, %v12008_v34 }
 0x29d   :  { %1038 = vrot.lane.b32.xlu0 %v12069_v19, %s6070_s8  ;;  %v2054_v19 = vsel %vm2022_vm10, %v1997_v23, %v1401_v0  ;;  %v1756_v23 = vsel %vm1737_vm4, %v1699_v11, %v12092_v58  ;;  %v12097_v11 = vld [vmem:[#allocation94_spill] sm:$0xff]  ;;  %v12098_v58 = vld [vmem:[#allocation117_spill] sm:$0xff] }
 0x29e   :  { %v1199_v61 = vpop.permute.xlu1 %1198 }
 0x29f   :  { %v8380_v44 = vpop.permute.xlu0 %854  ;;  %v1983_v46 = vsel %vm1965_vm9, %v1926_v32, %v1199_v61 }
 0x2a0   :  { %894 = vrot.lane.b32.xlu1 %v12071_v25, %s6068_s30  ;;  %v6021_v25 = vld [vmem:[%s11430_s0 + $0xd8] sm:$0xff] }
 0x2a1   :  { %866 = vrot.lane.b32.xlu0 %v12076_v55, %s6068_s30  ;;  %v1941_v55 = vsel %vm1908_vm8, %v1884_v17, %v1057_v1 }
 0x2a2   :  { %v1575_v51 = vpop.permute.xlu1 %1574 }
 0x2a3   :  { %v2111_v27 = vsel %vm2079_vm11, %v2054_v19, %v1575_v51  ;;  %v1229_v37 = vpop.permute.xlu0 %1228  ;;  %v8463_v19 = vrot.slane %v8439_v24, 2  ;;  %v986_v51 = vrot.slane %v6024_v4, 2 }
 0x2a4   :  { %v2704_v5 = vcombine.high %v2111_v27, %v2111_v27  ;;  %v2711_v41 = vrot.slane %v2111_v27, %v7730_v62  ;;  %1586 = vrot.lane.b32.xlu1 %v12082_v26, %s6075_s19  ;;  %v1998_v35 = vsel %vm1965_vm9, %v1941_v55, %v1229_v37  ;;  %v6027_v37 = vld [vmem:[%s11430_s0 + $0x170] sm:$0xff] }
 0x2a5   :  { %1210 = vrot.lane.b32.xlu0 %v6021_v25, %s6072_s16  ;;  %v8486_v52 = vsel %vm387_vm1, %v986_v51, %v8463_v19  ;;  %v12099_v51 = vld [vmem:[#allocation165_spill] sm:$0xff] }
 0x2a6   :  { %v2718_v28 = vrot.slane %v2704_v5, %v7730_v62  ;;  %v2719_v38 = vcombine.high %v2711_v41, %v2711_v41  ;;  %v3587_v60 = vcombine.low %v2703_v20, %v2711_v41  ;;  %v1373_v22 = vpop.permute.xlu1 %1372  ;;  %v12093_v20 = vld [vmem:[#allocation8_spill] sm:$0xff] }
 0x2a7   :  { %v1029_v16 = vpop.permute.xlu0 %1028  ;;  %v2040_v50 = vsel %vm2022_vm10, %v1983_v46, %v1373_v22  ;;  %v1813_v5 = vsel %vm1794_vm6, %v1756_v23, %v12093_v20 }
 0x2a8   :  { %v3588_v6 = vcombine.low %v2719_v38, %v2718_v28  ;;  %1068 = vrot.lane.b32.xlu1 %v12075_v36, %s6070_s8  ;;  %v3595_v36 = vrot.slane %v3587_v60, %v7730_v62  ;;  %v1870_v60 = vsel %vm1851_vm7, %v1813_v5, %v8380_v44  ;;  %v12101_v5 = vld [vmem:[#allocation7_spill] sm:$0xff] }
 0x2a9   :  { %1040 = vrot.lane.b32.xlu0 %v12077_v42, %s6070_s8  ;;  %v8442_v42 = vrot.slane %v8439_v24, 1  ;;  %v1927_v8 = vsel %vm1908_vm8, %v1870_v60, %v1029_v16 }
 0x2aa   :  { %v3602_v48 = vrot.slane %v3588_v6, %v7730_v62  ;;  %v1201_v45 = vpop.permute.xlu1 %1200 }
 0x2ab   :  { %v1403_v30 = vpop.permute.xlu0 %1402  ;;  %v814_v38 = vsel %vm134_vm0, %v812_v21, %v8442_v42  ;;  %v1984_v33 = vsel %vm1965_vm9, %v1927_v8, %v1201_v45 }
 0x2ac   :  { %1212 = vrot.lane.b32.xlu1 %v6024_v4, %s6072_s16  ;;  %v3603_v18 = vcombine.low %v3595_v36, %v3602_v48  ;;  %v2055_v0 = vsel %vm2022_vm10, %v1998_v35, %v1403_v30  ;;  %v12095_v4 = vld [vmem:[#allocation131_spill] sm:$0xff] }
 0x2ad   :  { %1384 = vrot.lane.b32.xlu0 %v12089_v49, %s6071_s13 }
 0x2ae   :  { %v1577_v1 = vpop.permute.xlu1 %1576  ;;  %5886 = vmatmul.mubr.msk.f32.gmra.mrb[4].mxu1 %vm3961_vm12, %v3603_v18 }
 0x2af   :  { %v2112_v56 = vsel %vm2079_vm11, %v2055_v0, %v1577_v1  ;;  %v1547_v7 = vpop.permute.xlu0 %1546  ;;  %5888 = vmatprep.mubr.msk.f32.mxu1 %vm6074_vm3, %v12008_v34  ;;  %v6028_v0 = vld [vmem:[%s11430_s0 + $0x178] sm:$0xff] }
 0x2b0   :  { %v2720_v59 = vcombine.high %v2112_v56, %v2112_v56  ;;  %v2727_v9 = vrot.slane %v2112_v56, %v7730_v62  ;;  %v2097_v61 = vsel %vm2079_vm11, %v2040_v50, %v1547_v7  ;;  %1558 = vrot.lane.b32.xlu1 %v12091_v14, %s6075_s19 }
 0x2b1   :  { %v2480_v27 = vrot.slane %v2097_v61, %v7730_v62  ;;  %1240 = vrot.lane.b32.xlu0 %v6027_v37, %s6072_s16  ;;  %v2473_v22 = vcombine.high %v2097_v61, %v2097_v61  ;;  %v12100_v37 = vld [vmem:[#allocation178_spill] sm:$0xff] }
 0x2b2   :  { %v2734_v41 = vrot.slane %v2720_v59, %v7730_v62  ;;  %v2735_v25 = vcombine.high %v2727_v9, %v2727_v9  ;;  %v8473_v28 = vpop.permute.xlu1 %856  ;;  %v1700_v59 = vsel %vm1680_vm5, %v6029_v63, %v12097_v11 }
 0x2b3   :  { %v1375_v57 = vpop.permute.xlu0 %1374  ;;  %v2488_v47 = vcombine.high %v2480_v27, %v2480_v27  ;;  %v2487_v16 = vrot.slane %v2473_v22, %v7730_v62 }
 0x2b4   :  { %v2736_v12 = vcombine.high %v2734_v41, %v2734_v41  ;;  %v3604_v6 = vcombine.low %v2727_v9, %v2735_v25  ;;  %1414 = vrot.lane.b32.xlu1 %v12094_v13, %s6071_s13  ;;  %v2041_v44 = vsel %vm2022_vm10, %v1984_v33, %v1375_v57  ;;  %v12103_v57 = vld [vmem:[#allocation128_spill] sm:$0xff] }
 0x2b5   :  { %1386 = vrot.lane.b32.xlu0 %v814_v38, %s6071_s13  ;;  %v3383_v48 = vcombine.low %v2480_v27, %v2488_v47 }
 0x2b6   :  { %v3605_v10 = vcombine.low %v2734_v41, %v2736_v12  ;;  %v1549_v15 = vpop.permute.xlu1 %1548  ;;  %v3612_v29 = vrot.slane %v3604_v6, %v7730_v62 }
 0x2b7   :  { %v2098_v3 = vsel %vm2079_vm11, %v2041_v44, %v1549_v15  ;;  %v885_v31 = vpop.permute.xlu0 %884  ;;  %v3391_v54 = vrot.slane %v3383_v48, %v7730_v62 }
 0x2b8   :  { %v3619_v36 = vrot.slane %v3605_v10, %v7730_v62  ;;  %v8494_v45 = vrot.slane %v2098_v3, %v7730_v62  ;;  %1560 = vrot.lane.b32.xlu1 %v8486_v52, %s6075_s19  ;;  %v2489_v9 = vcombine.high %v2098_v3, %v2098_v3 }
 0x2b9   :  { %896 = vrot.lane.b32.xlu0 %v12079_v39, %s6068_s30 }
 0x2ba   :  { %v3384_v43 = vcombine.low %v2487_v16, %v8494_v45  ;;  %v1059_v40 = vpop.permute.xlu1 %1058  ;;  %v3620_v17 = vcombine.low %v3612_v29, %v3619_v36  ;;  %v2503_v8 = vrot.slane %v2489_v9, %v7730_v62  ;;  %v2504_v12 = vcombine.high %v8494_v45, %v8494_v45  ;;  %v12107_v9 = vld [vmem:[#allocation44_spill] sm:$0xff] }
 0x2bb   :  { %v1031_v30 = vpop.permute.xlu0 %1030 }
 0x2bc   :  { %v3398_v55 = vrot.slane %v3384_v43, %v7730_v62  ;;  %1070 = vrot.lane.b32.xlu1 %v12082_v26, %s6070_s8  ;;  %5889 = vmatmul.mubr.msk.f32.gmra.mrb[6].mxu1 %vm3961_vm12, %v3620_v17  ;;  %v3400_v29 = vcombine.low %v2504_v12, %v2503_v8  ;;  %v2505_v48 = vcombine.high %v2503_v8, %v2503_v8  ;;  %v44_v43 = vld [vmem:[%s11430_s0 + $0xf0] sm:$0xff] }
 0x2bd   :  { %1588 = vrot.lane.b32.xlu0 %v12095_v4, %s6075_s19  ;;  %5891 = vmatprep.mubr.msk.f32.mxu1 %vm6074_vm3, %v12008_v34 }
 0x2be   :  { %v8510_v39 = vpop.permute.xlu1 %886  ;;  %v3399_v18 = vcombine.low %v3391_v54, %v3398_v55  ;;  %v8598_v55 = vld [vmem:[%s11430_s0 + $0xf8] sm:$0xff]  ;;  %v3408_v11 = vrot.slane %v3400_v29, %v7730_v62 }
 0x2bf   :  { %v8512_v32 = vpop.permute.xlu0 %858 }
 0x2c0   :  { %v8514_v35 = vpop.f32.mrb[0].mxu0  ;;  %898 = vrot.lane.b32.xlu1 %v12094_v13, %s6068_s30  ;;  %5850 = vmatmul.mubr.msk.f32.gmra.mrb[30].mxu0 %vm3961_vm12, %v3399_v18  ;;  %v6031_v13 = vld [vmem:[%s11430_s0 + $0x180] sm:$0xff] }
 0x2c1   :  { %v5806_v26 = vpop.f32.mrb[1].mxu0  ;;  %868 = vrot.lane.b32.xlu0 %v12089_v49, %s6068_s30  ;;  %5852 = vmatprep.mubr.msk.f32.mxu0 %vm6074_vm3, %v12008_v34  ;;  %v12096_v49 = vld [vmem:[#allocation41_spill] sm:$0xff] }
 0x2c2   :  { %v1231_v21 = vpop.permute.xlu1 %1230 }
 0x2c3   :  { %v1203_v46 = vpop.permute.xlu0 %1202 }
 0x2c4   :  { %1042 = vrot.lane.b32.xlu1 %v12091_v14, %s6070_s8  ;;  %v6030_v14 = vld [vmem:[%s11430_s0 + $0x128] sm:$0xff] }
 0x2c5   :  { %1242 = vrot.lane.b32.xlu0 %v6028_v0, %s6072_s16  ;;  %v1714_v23 = vsel %vm1680_vm5, %v6030_v14, %v12098_v58  ;;  %v12105_v0 = vld [vmem:[#allocation99_spill] sm:$0xff] }
 0x2c6   :  { %v8529_v1 = vpop.permute.xlu1 %1060  ;;  %v1771_v20 = vsel %vm1737_vm4, %v1714_v23, %v12100_v37  ;;  %v12109_v58 = vld [vmem:[#allocation207_spill] sm:$0xff]  ;;  %v1333_v37 = vrot.slane %v8598_v55, 1 }
 0x2c7   :  { %v8531_v50 = vpop.permute.xlu0 %1032 }
 0x2c8   :  { %1416 = vrot.lane.b32.xlu1 %v12096_v49, %s6071_s13 }
 0x2c9   :  { %1072 = vrot.lane.b32.xlu0 %v12095_v4, %s6070_s8  ;;  %v6032_v4 = vld [vmem:[%s11430_s0 + $0x130] sm:$0xff] }
 0x2ca   :  { %v1405_v56 = vpop.permute.xlu1 %1404 }
 0x2cb   :  { %v1377_v7 = vpop.permute.xlu0 %1376 }
 0x2cc   :  { %v8537_v53 = vpop.f32.mrb[2].mxu0  ;;  %1214 = vrot.lane.b32.xlu1 %v8439_v24, %s6072_s16  ;;  %v1757_v24 = vsel %vm1737_vm4, %v1700_v59, %v12099_v51  ;;  %v1332_v51 = vrot.slane %v44_v43, 1 }
 0x2cd   :  { %v5809_v61 = vpop.f32.mrb[3].mxu0  ;;  %870 = vrot.lane.b32.xlu0 %v814_v38, %s6068_s30  ;;  %v1814_v41 = vsel %vm1794_vm6, %v1757_v24, %v12101_v5  ;;  %v12102_v38 = vld [vmem:[#allocation65_spill] sm:$0xff] }
 0x2ce   :  { %v1233_v27 = vpop.permute.xlu1 %1232  ;;  %v1828_v60 = vsel %vm1794_vm6, %v1771_v20, %v12102_v38  ;;  %v1871_v22 = vsel %vm1851_vm7, %v1814_v41, %v8473_v28  ;;  %v12108_v61 = vld [vmem:[#allocation168_spill] sm:$0xff] }
 0x2cf   :  { %v8558_v25 = vpop.permute.xlu0 %1204  ;;  %v1885_v6 = vsel %vm1851_vm7, %v1828_v60, %v885_v31  ;;  %v1928_v47 = vsel %vm1908_vm8, %v1871_v22, %v1031_v30  ;;  %v12110_v20 = vld [vmem:[#allocation56_spill] sm:$0xff] }
 0x2d0   :  { %1590 = vrot.lane.b32.xlu1 %v12103_v57, %s6075_s19  ;;  %v1942_v28 = vsel %vm1908_vm8, %v1885_v6, %v1059_v40  ;;  %v1985_v33 = vsel %vm1965_vm9, %v1928_v47, %v1203_v46  ;;  %v6033_v46 = vld [vmem:[%s11430_s0 + $0xa0] sm:$0xff] }
 0x2d1   :  { %1244 = vrot.lane.b32.xlu0 %v6031_v13, %s6072_s16  ;;  %v1999_v44 = vsel %vm1965_vm9, %v1942_v28, %v1231_v21  ;;  %v2042_v15 = vsel %vm2022_vm10, %v1985_v33, %v1377_v7  ;;  %v12106_v7 = vld [vmem:[#allocation181_spill] sm:$0xff]  ;;  %v12111_v13 = vld [vmem:[#allocation135_spill] sm:$0xff]  ;;  %v1506_v33 = vrot.slane %v44_v43, 2 }
 0x2d2   :  { %v1579_v10 = vpop.permute.xlu1 %1578  ;;  %v2056_v3 = vsel %vm2022_vm10, %v1999_v44, %v1405_v56  ;;  %v1701_v56 = vsel %vm1680_vm5, %v6033_v46, %v12105_v0 }
 0x2d3   :  { %v1551_v16 = vpop.permute.xlu0 %1550  ;;  %v2113_v36 = vsel %vm2079_vm11, %v2056_v3, %v1579_v10  ;;  %v1758_v14 = vsel %vm1737_vm4, %v1701_v56, %v12108_v61 }
 0x2d4   :  { %v2099_v31 = vsel %vm2079_vm11, %v2042_v15, %v1551_v16  ;;  %1388 = vrot.lane.b32.xlu1 %v8442_v42, %s6071_s13  ;;  %v2744_v26 = vrot.slane %v2113_v36, %v7730_v62  ;;  %v1815_v5 = vsel %vm1794_vm6, %v1758_v14, %v12110_v20  ;;  %v2737_v6 = vcombine.high %v2113_v36, %v2113_v36 }
 0x2d5   :  { %v8585_v45 = vrot.slane %v2099_v31, %v7730_v62  ;;  %1044 = vrot.lane.b32.xlu0 %v8486_v52, %s6070_s8  ;;  %v12104_v52 = vld [vmem:[#allocation122_spill] sm:$0xff]  ;;  %v2506_v38 = vcombine.high %v2099_v31, %v2099_v31  ;;  %v1872_v8 = vsel %vm1851_vm7, %v1815_v5, %v8512_v32  ;;  %v6034_v5 = vld [vmem:[%s11430_s0 + $0x138] sm:$0xff] }
 0x2d6   :  { %v1407_v40 = vpop.permute.xlu1 %1406  ;;  %v1715_v18 = vsel %vm1680_vm5, %v6032_v4, %v12104_v52  ;;  %v2752_v47 = vcombine.high %v2744_v26, %v2744_v26  ;;  %v1929_v28 = vsel %vm1908_vm8, %v1872_v8, %v8531_v50  ;;  %v1334_v50 = vsel %vm134_vm0, %v1332_v51, %v1333_v37  ;;  %v12113_v8 = vld [vmem:[#allocation98_spill] sm:$0xff] }
 0x2d7   :  { %v3401_v17 = vcombine.low %v2505_v48, %v8585_v45  ;;  %v1379_v30 = vpop.permute.xlu0 %1378  ;;  %v8593_v54 = vpop.f32.mrb[4].mxu0  ;;  %v1772_v63 = vsel %vm1737_vm4, %v1715_v18, %v12106_v7  ;;  %v1986_v10 = vsel %vm1965_vm9, %v1929_v28, %v8558_v25  ;;  %v2521_v3 = vcombine.high %v8585_v45, %v8585_v45  ;;  %v8718_v28 = vld [vmem:[%s11430_s0 + $0x188] sm:$0xff] }
 0x2d8   :  { %1216 = vrot.lane.b32.xlu1 %v44_v43, %s6072_s16  ;;  %v5812_v21 = vpop.f32.mrb[5].mxu0  ;;  %v1829_v23 = vsel %vm1794_vm6, %v1772_v63, %v12109_v58  ;;  %v2043_v31 = vsel %vm2022_vm10, %v1986_v10, %v1379_v30  ;;  %v2751_v36 = vrot.slane %v2737_v6, %v7730_v62  ;;  %v3621_v48 = vcombine.low %v2744_v26, %v2752_v47  ;;  %v12114_v6 = vld [vmem:[#allocation180_spill] sm:$0xff] }
 0x2d9   :  { %v3415_v59 = vrot.slane %v3401_v17, %v7730_v62  ;;  %1418 = vrot.lane.b32.xlu0 %v12107_v9, %s6071_s13  ;;  %v1886_v41 = vsel %vm1851_vm7, %v1829_v23, %v8510_v39 }
 0x2da   :  { %v8622_v24 = vpop.permute.xlu1 %888  ;;  %v1943_v12 = vsel %vm1908_vm8, %v1886_v41, %v8529_v1  ;;  %v1507_v1 = vrot.slane %v8598_v55, 2  ;;  %v3629_v21 = vrot.slane %v3621_v48, %v7730_v62  ;;  %v12112_v41 = vld [vmem:[#allocation121_spill] sm:$0xff]  ;;  %v12118_v48 = vld [vmem:[#allocation43_spill] sm:$0xff] }
 0x2db   :  { %v8629_v60 = vpop.permute.xlu0 %860  ;;  %v3416_v22 = vcombine.low %v3408_v11, %v3415_v59  ;;  %v2000_v39 = vsel %vm1965_vm9, %v1943_v12, %v1233_v27  ;;  %v2520_v27 = vrot.slane %v2506_v38, %v7730_v62  ;;  %v1716_v38 = vsel %vm1680_vm5, %v6034_v5, %v12112_v41  ;;  %v12121_v41 = vld [vmem:[#allocation132_spill] sm:$0xff] }
 0x2dc   :  { %1592 = vrot.lane.b32.xlu1 %v12111_v13, %s6075_s19  ;;  %v2057_v44 = vsel %vm2022_vm10, %v2000_v39, %v1407_v40  ;;  %v1508_v45 = vsel %vm387_vm1, %v1506_v33, %v1507_v1  ;;  %v1773_v47 = vsel %vm1737_vm4, %v1716_v38, %v12114_v6  ;;  %v12115_v39 = vld [vmem:[#allocation167_spill] sm:$0xff]  ;;  %v12116_v33 = vld [vmem:[#allocation206_spill] sm:$0xff] }
 0x2dd   :  { %1562 = vrot.lane.b32.xlu0 %v8463_v19, %s6075_s19  ;;  %5853 = vmatmul.mubr.msk.f32.gmra.mrb[32].mxu0 %vm3961_vm12, %v3416_v22  ;;  %v8643_v32 = vpop.f32.mrb[6].mxu0  ;;  %v3417_v52 = vcombine.low %v2521_v3, %v2520_v27  ;;  %v1830_v10 = vsel %vm1794_vm6, %v1773_v47, %v12116_v33  ;;  %v12122_v38 = vld [vmem:[#allocation183_spill] sm:$0xff] }
 0x2de   :  { %v1581_v15 = vpop.permute.xlu1 %1580  ;;  %v5815_v16 = vpop.f32.mrb[7].mxu0  ;;  %5855 = vmatprep.mubr.msk.f32.mxu0 %vm6074_vm3, %v12008_v34 }
 0x2df   :  { %v2114_v25 = vsel %vm2079_vm11, %v2057_v44, %v1581_v15  ;;  %v1553_v29 = vpop.permute.xlu0 %1552  ;;  %v3425_v11 = vrot.slane %v3417_v52, %v7730_v62  ;;  %v12117_v15 = vld [vmem:[#allocation9_spill] sm:$0xff] }
 0x2e0   :  { %v8661_v43 = vrot.slane %v2114_v25, %v7730_v62  ;;  %v2100_v40 = vsel %vm2079_vm11, %v2043_v31, %v1553_v29  ;;  %872 = vrot.lane.b32.xlu1 %v8442_v42, %s6068_s30  ;;  %v2753_v22 = vcombine.high %v2114_v25, %v2114_v25 }
 0x2e1   :  { %v2529_v17 = vrot.slane %v2100_v40, %v7730_v62  ;;  %1390 = vrot.lane.b32.xlu0 %v1334_v50, %s6071_s13  ;;  %v2522_v51 = vcombine.high %v2100_v40, %v2100_v40  ;;  %v1887_v50 = vsel %vm1851_vm7, %v1830_v10, %v8622_v24 }
 0x2e2   :  { %v3622_v30 = vcombine.low %v2751_v36, %v8661_v43  ;;  %v1063_v4 = vpop.permute.xlu1 %1062  ;;  %v2767_v25 = vrot.slane %v2753_v22, %v7730_v62  ;;  %v2768_v29 = vcombine.high %v8661_v43, %v8661_v43 }
 0x2e3   :  { %v2537_v18 = vcombine.high %v2529_v17, %v2529_v17  ;;  %v1035_v26 = vpop.permute.xlu0 %1034  ;;  %v2536_v27 = vrot.slane %v2522_v51, %v7730_v62  ;;  %v1944_v36 = vsel %vm1908_vm8, %v1887_v50, %v1063_v4  ;;  %v12120_v51 = vld [vmem:[#allocation126_spill] sm:$0xff] }
 0x2e4   :  { %v3636_v46 = vrot.slane %v3622_v30, %v7730_v62  ;;  %1564 = vrot.lane.b32.xlu1 %v1508_v45, %s6075_s19 }
 0x2e5   :  { %v3418_v42 = vcombine.low %v2529_v17, %v2537_v18  ;;  %900 = vrot.lane.b32.xlu0 %v12096_v49, %s6068_s30  ;;  %v8677_v0 = vpop.f32.mrb[8].mxu0  ;;  %v2538_v30 = vcombine.high %v2536_v27, %v2536_v27  ;;  %v3638_v18 = vcombine.low %v2768_v29, %v2767_v25 }
 0x2e6   :  { %v1207_v56 = vpop.permute.xlu1 %1206  ;;  %v5818_v7 = vpop.f32.mrb[9].mxu0  ;;  %v3637_v63 = vcombine.low %v3629_v21, %v3636_v46  ;;  %v2769_v21 = vcombine.high %v2767_v25, %v2767_v25 }
 0x2e7   :  { %v3432_v59 = vrot.slane %v3418_v42, %v7730_v62  ;;  %v8681_v61 = vpop.permute.xlu0 %890  ;;  %v8762_v42 = vld [vmem:[%s11430_s0 + $0x190] sm:$0xff] }
 0x2e8   :  { %1074 = vrot.lane.b32.xlu1 %v12103_v57, %s6070_s8  ;;  %5892 = vmatmul.mubr.msk.f32.gmra.mrb[8].mxu1 %vm3961_vm12, %v3637_v63 }
 0x2e9   :  { %1046 = vrot.lane.b32.xlu0 %v8463_v19, %s6070_s8  ;;  %v3433_v49 = vcombine.low %v3425_v11, %v3432_v59  ;;  %5894 = vmatprep.mubr.msk.f32.mxu1 %vm6074_vm3, %v12008_v34  ;;  %v3434_v59 = vcombine.low %v2536_v27, %v2538_v30 }
 0x2ea   :  { %v8690_v14 = vpop.permute.xlu1 %1064 }
 0x2eb   :  { %5856 = vmatmul.mubr.msk.f32.gmra.mrb[34].mxu0 %vm3961_vm12, %v3433_v49  ;;  %v1235_v58 = vpop.permute.xlu0 %1234  ;;  %v3442_v47 = vrot.slane %v3434_v59, %v7730_v62 }
 0x2ec   :  { %1218 = vrot.lane.b32.xlu1 %v8598_v55, %s6072_s16  ;;  %5858 = vmatprep.mubr.msk.f32.mxu0 %vm6074_vm3, %v12008_v34  ;;  %v2001_v24 = vsel %vm1965_vm9, %v1944_v36, %v1235_v58 }
 0x2ed   :  { %902 = vrot.lane.b32.xlu0 %v12107_v9, %s6068_s30  ;;  %v8699_v57 = vpop.f32.mrb[10].mxu0  ;;  %v6035_v9 = vld [vmem:[%s11430_s0 + $0xa8] sm:$0xff] }
 0x2ee   :  { %v1409_v19 = vpop.permute.xlu1 %1408  ;;  %v5821_v23 = vpop.f32.mrb[11].mxu0  ;;  %v1702_v12 = vsel %vm1680_vm5, %v6035_v9, %v12113_v8 }
 0x2ef   :  { %v1381_v20 = vpop.permute.xlu0 %1380  ;;  %v2058_v17 = vsel %vm2022_vm10, %v2001_v24, %v1409_v19  ;;  %v12119_v19 = vld [vmem:[#allocation46_spill] sm:$0xff] }
 0x2f0   :  { %1076 = vrot.lane.b32.xlu1 %v12111_v13, %s6070_s8  ;;  %v1759_v13 = vsel %vm1737_vm4, %v1702_v12, %v12115_v39  ;;  %v6038_v23 = vld [vmem:[%s11430_s0 + $0x140] sm:$0xff]  ;;  %v12123_v12 = vld [vmem:[#allocation208_spill] sm:$0xff] }
 0x2f1   :  { %1246 = vrot.lane.b32.xlu0 %v8718_v28, %s6072_s16  ;;  %v1816_v16 = vsel %vm1794_vm6, %v1759_v13, %v12117_v15 }
 0x2f2   :  { %v1237_v44 = vpop.permute.xlu1 %1236  ;;  %v1873_v31 = vsel %vm1851_vm7, %v1816_v16, %v8629_v60  ;;  %v12124_v16 = vld [vmem:[#allocation139_spill] sm:$0xff] }
 0x2f3   :  { %v8731_v3 = vpop.permute.xlu0 %862  ;;  %v1930_v40 = vsel %vm1908_vm8, %v1873_v31, %v1035_v26 }
 0x2f4   :  { %1420 = vrot.lane.b32.xlu1 %v12118_v48, %s6071_s13  ;;  %v1987_v60 = vsel %vm1965_vm9, %v1930_v40, %v1207_v56 }
 0x2f5   :  { %1392 = vrot.lane.b32.xlu0 %v1333_v37, %s6071_s13  ;;  %v2044_v43 = vsel %vm2022_vm10, %v1987_v60, %v1381_v20  ;;  %v1717_v20 = vsel %vm1680_vm5, %v6038_v23, %v12120_v51 }
 0x2f6   :  { %v1583_v45 = vpop.permute.xlu1 %1582  ;;  %v1774_v22 = vsel %vm1737_vm4, %v1717_v20, %v12122_v38 }
 0x2f7   :  { %v2115_v4 = vsel %vm2079_vm11, %v2058_v17, %v1583_v45  ;;  %v1555_v52 = vpop.permute.xlu0 %1554  ;;  %v1831_v6 = vsel %vm1794_vm6, %v1774_v22, %v12123_v12 }
 0x2f8   :  { %v2777_v26 = vrot.slane %v2115_v4, %v7730_v62  ;;  %v8752_v46 = vsel %vm2079_vm11, %v2044_v43, %v1555_v52  ;;  %1566 = vrot.lane.b32.xlu1 %v1507_v1, %s6075_s19  ;;  %v3646_v1 = vrot.slane %v3638_v18, %v7730_v62  ;;  %v2770_v39 = vcombine.high %v2115_v4, %v2115_v4  ;;  %v12127_v43 = vld [vmem:[#allocation55_spill] sm:$0xff] }
 0x2f9   :  { %v2546_v37 = vrot.slane %v8752_v46, %v7730_v62  ;;  %1248 = vrot.lane.b32.xlu0 %v8762_v42, %s6072_s16  ;;  %v8766_v56 = vpop.f32.mrb[12].mxu0  ;;  %v1888_v15 = vsel %vm1851_vm7, %v1831_v6, %v8681_v61 }
 0x2fa   :  { %v3639_v7 = vcombine.low %v2769_v21, %v2777_v26  ;;  %v1411_v63 = vpop.permute.xlu1 %1410  ;;  %v5824_v11 = vpop.f32.mrb[13].mxu0  ;;  %v1945_v27 = vsel %vm1908_vm8, %v1888_v15, %v8690_v14  ;;  %v2784_v61 = vrot.slane %v2770_v39, %v7730_v62  ;;  %v2785_v36 = vcombine.high %v2777_v26, %v2777_v26  ;;  %v6039_v14 = vld [vmem:[%s11430_s0 + $0xb0] sm:$0xff]  ;;  %v12129_v15 = vld [vmem:[#allocation125_spill] sm:$0xff] }
 0x2fb   :  { %v2554_v49 = vcombine.high %v2546_v37, %v2546_v37  ;;  %v1037_v55 = vpop.permute.xlu0 %1036  ;;  %v2002_v25 = vsel %vm1965_vm9, %v1945_v27, %v1237_v44  ;;  %v12126_v44 = vld [vmem:[#allocation170_spill] sm:$0xff]  ;;  %v12130_v27 = vld [vmem:[#allocation48_spill] sm:$0xff] }
 0x2fc   :  { %v3653_v58 = vrot.slane %v3639_v7, %v7730_v62  ;;  %1422 = vrot.lane.b32.xlu1 %v12119_v19, %s6071_s13  ;;  %v2059_v40 = vsel %vm2022_vm10, %v2002_v25, %v1411_v63  ;;  %v3655_v21 = vcombine.low %v2785_v36, %v2784_v61  ;;  %v2539_v7 = vcombine.high %v8752_v46, %v8752_v46  ;;  %v12131_v25 = vld [vmem:[#allocation182_spill] sm:$0xff]  ;;  %v12132_v36 = vld [vmem:[#allocation136_spill] sm:$0xff] }
 0x2fd   :  { %v3435_v5 = vcombine.low %v2546_v37, %v2554_v49  ;;  %1594 = vrot.lane.b32.xlu0 %v12121_v41, %s6075_s19  ;;  %v8836_v49 = vld [vmem:[%s11430_s0 + $0x198] sm:$0xff] }
 0x2fe   :  { %v1209_v9 = vpop.permute.xlu1 %1208  ;;  %v3654_v8 = vcombine.low %v3646_v1, %v3653_v58  ;;  %v3663_v46 = vrot.slane %v3655_v21, %v7730_v62  ;;  %v2553_v23 = vrot.slane %v2539_v7, %v7730_v62 }
 0x2ff   :  { %v3449_v13 = vrot.slane %v3435_v5, %v7730_v62  ;;  %v8785_v33 = vpop.permute.xlu0 %892  ;;  %v8787_v10 = vpop.f32.mrb[14].mxu0  ;;  %v8849_v5 = vld [vmem:[%s11430_s0 + $0x1a0] sm:$0xff] }
 0x300   :  { %1596 = vrot.lane.b32.xlu1 %v12124_v16, %s6075_s19  ;;  %v5827_v50 = vpop.f32.mrb[15].mxu0  ;;  %5895 = vmatmul.mubr.msk.f32.gmra.mrb[10].mxu1 %vm3961_vm12, %v3654_v8 }
 0x301   :  { %904 = vrot.lane.b32.xlu0 %v12118_v48, %s6068_s30  ;;  %v3450_v31 = vcombine.low %v3442_v47, %v3449_v13  ;;  %5897 = vmatprep.mubr.msk.f32.mxu1 %vm6074_vm3, %v12008_v34  ;;  %v12125_v48 = vld [vmem:[#allocation103_spill] sm:$0xff] }
 0x302   :  { %v8801_v29 = vpop.permute.xlu1 %1066  ;;  %v1703_v60 = vsel %vm1680_vm5, %v6039_v14, %v12125_v48  ;;  %v6042_v13 = vld [vmem:[%s11430_s0 + $0x148] sm:$0xff] }
 0x303   :  { %5859 = vmatmul.mubr.msk.f32.gmra.mrb[36].mxu0 %vm3961_vm12, %v3450_v31  ;;  %v1585_v24 = vpop.permute.xlu0 %1584  ;;  %v1760_v45 = vsel %vm1737_vm4, %v1703_v60, %v12126_v44 }
 0x304   :  { %v2116_v17 = vsel %vm2079_vm11, %v2059_v40, %v1585_v24  ;;  %906 = vrot.lane.b32.xlu1 %v12119_v19, %s6068_s30  ;;  %5861 = vmatprep.mubr.msk.f32.mxu0 %vm6074_vm3, %v12008_v34  ;;  %v1817_v4 = vsel %vm1794_vm6, %v1760_v45, %v12127_v43  ;;  %v12133_v40 = vld [vmem:[#allocation72_spill] sm:$0xff]  ;;  %v12134_v43 = vld [vmem:[#allocation143_spill] sm:$0xff] }
 0x305   :  { %v2793_v30 = vrot.slane %v2116_v17, %v7730_v62  ;;  %1078 = vrot.lane.b32.xlu0 %v12121_v41, %s6070_s8  ;;  %v1874_v18 = vsel %vm1851_vm7, %v1817_v4, %v8731_v3  ;;  %v12128_v41 = vld [vmem:[#allocation45_spill] sm:$0xff]  ;;  %v2786_v22 = vcombine.high %v2116_v17, %v2116_v17 }
 0x306   :  { %v8823_v52 = vpop.permute.xlu1 %864  ;;  %v1931_v63 = vsel %vm1908_vm8, %v1874_v18, %v1037_v55 }
 0x307   :  { %v2801_v26 = vcombine.high %v2793_v30, %v2793_v30  ;;  %v1383_v37 = vpop.permute.xlu0 %1382  ;;  %v1988_v11 = vsel %vm1965_vm9, %v1931_v63, %v1209_v9  ;;  %v2800_v14 = vrot.slane %v2786_v22, %v7730_v62  ;;  %v8905_v63 = vld [vmem:[%s11430_s0 + $0x1a8] sm:$0xff] }
 0x308   :  { %1080 = vrot.lane.b32.xlu1 %v12124_v16, %s6070_s8  ;;  %v2045_v3 = vsel %vm2022_vm10, %v1988_v11, %v1383_v37  ;;  %v1718_v16 = vsel %vm1680_vm5, %v6042_v13, %v12129_v15 }
 0x309   :  { %v3656_v59 = vcombine.low %v2793_v30, %v2801_v26  ;;  %1250 = vrot.lane.b32.xlu0 %v8836_v49, %s6072_s16  ;;  %v1775_v61 = vsel %vm1737_vm4, %v1718_v16, %v12131_v25  ;;  %v2802_v21 = vcombine.high %v2800_v14, %v2800_v14  ;;  %v12139_v25 = vld [vmem:[#allocation140_spill] sm:$0xff] }
 0x30a   :  { %v1557_v1 = vpop.permute.xlu1 %1556  ;;  %v1832_v24 = vsel %vm1794_vm6, %v1775_v61, %v12133_v40 }
 0x30b   :  { %v3670_v55 = vrot.slane %v3656_v59, %v7730_v62  ;;  %v2102_v58 = vsel %vm2079_vm11, %v2045_v3, %v1557_v1  ;;  %v1239_v19 = vpop.permute.xlu0 %1238  ;;  %v1889_v44 = vsel %vm1851_vm7, %v1832_v24, %v8785_v33  ;;  %v3672_v11 = vcombine.low %v2800_v14, %v2802_v21  ;;  %v12140_v24 = vld [vmem:[#allocation106_spill] sm:$0xff] }
 0x30c   :  { %v2555_v51 = vcombine.high %v2102_v58, %v2102_v58  ;;  %v2562_v20 = vrot.slane %v2102_v58, %v7730_v62  ;;  %1252 = vrot.lane.b32.xlu1 %v8849_v5, %s6072_s16  ;;  %v1946_v30 = vsel %vm1908_vm8, %v1889_v44, %v8801_v29 }
 0x30d   :  { %1424 = vrot.lane.b32.xlu0 %v12128_v41, %s6071_s13  ;;  %v3671_v38 = vcombine.low %v3663_v46, %v3670_v55  ;;  %v2003_v18 = vsel %vm1965_vm9, %v1946_v30, %v1239_v19  ;;  %v6044_v46 = vld [vmem:[%s11430_s0 + $0xb8] sm:$0xff]  ;;  %v12135_v55 = vld [vmem:[#allocation102_spill] sm:$0xff]  ;;  %v3680_v22 = vrot.slane %v3672_v11, %v7730_v62 }
 0x30e   :  { %v8856_v9 = vrot.slane %v2555_v51, %v7730_v62  ;;  %v2570_v8 = vcombine.high %v2562_v20, %v2562_v20  ;;  %v3451_v12 = vcombine.low %v2553_v23, %v2562_v20  ;;  %v1413_v6 = vpop.permute.xlu1 %1412  ;;  %v1704_v58 = vsel %vm1680_vm5, %v6044_v46, %v12135_v55  ;;  %v12136_v23 = vld [vmem:[#allocation169_spill] sm:$0xff]  ;;  %v12137_v20 = vld [vmem:[#allocation47_spill] sm:$0xff]  ;;  %v12141_v30 = vld [vmem:[#allocation50_spill] sm:$0xff] }
 0x30f   :  { %5898 = vmatmul.mubr.msk.f32.gmra.mrb[12].mxu1 %vm3961_vm12, %v3671_v38  ;;  %v1039_v47 = vpop.permute.xlu0 %1038  ;;  %v8859_v39 = vpop.f32.mrb[16].mxu0  ;;  %v2060_v26 = vsel %vm2022_vm10, %v2003_v18, %v1413_v6  ;;  %v1761_v51 = vsel %vm1737_vm4, %v1704_v58, %v12136_v23  ;;  %v8958_v18 = vld [vmem:[%s11430_s0 + $0x1b0] sm:$0xff]  ;;  %v12144_v23 = vld [vmem:[#allocation147_spill] sm:$0xff] }
 0x310   :  { %v3452_v50 = vcombine.low %v2570_v8, %v8856_v9  ;;  %1426 = vrot.lane.b32.xlu1 %v12130_v27, %s6071_s13  ;;  %v5830_v31 = vpop.f32.mrb[17].mxu0  ;;  %5900 = vmatprep.mubr.msk.f32.mxu1 %vm6074_vm3, %v12008_v34  ;;  %v3459_v48 = vrot.slane %v3451_v12, %v7730_v62 }
 0x311   :  { %1598 = vrot.lane.b32.xlu0 %v12132_v36, %s6075_s19 }
 0x312   :  { %v3466_v60 = vrot.slane %v3452_v50, %v7730_v62  ;;  %v8880_v17 = vpop.permute.xlu1 %894 }
 0x313   :  { %v8884_v45 = vpop.permute.xlu0 %866 }
 0x314   :  { %1600 = vrot.lane.b32.xlu1 %v12134_v43, %s6075_s19  ;;  %v3467_v4 = vcombine.low %v3459_v48, %v3466_v60  ;;  %v2571_v48 = vcombine.high %v8856_v9, %v8856_v9  ;;  %v12143_v9 = vld [vmem:[#allocation57_spill] sm:$0xff] }
 0x315   :  { %908 = vrot.lane.b32.xlu0 %v12128_v41, %s6068_s30  ;;  %v12138_v41 = vld [vmem:[#allocation11_spill] sm:$0xff] }
 0x316   :  { %v1587_v37 = vpop.permute.xlu1 %1586  ;;  %5862 = vmatmul.mubr.msk.f32.gmra.mrb[38].mxu0 %vm3961_vm12, %v3467_v4  ;;  %v1818_v38 = vsel %vm1794_vm6, %v1761_v51, %v12138_v41  ;;  %v6047_v51 = vld [vmem:[%s11430_s0 + $0x150] sm:$0xff]  ;;  %v12145_v41 = vld [vmem:[#allocation130_spill] sm:$0xff] }
 0x317   :  { %v8896_v33 = vsel %vm2079_vm11, %v2060_v26, %v1587_v37  ;;  %v1211_v7 = vpop.permute.xlu0 %1210  ;;  %5864 = vmatprep.mubr.msk.f32.mxu0 %vm6074_vm3, %v12008_v34  ;;  %v1875_v6 = vsel %vm1851_vm7, %v1818_v38, %v8823_v52  ;;  %v1719_v38 = vsel %vm1680_vm5, %v6047_v51, %v12145_v41  ;;  %v12148_v41 = vld [vmem:[#allocation49_spill] sm:$0xff] }
 0x318   :  { %v2810_v29 = vrot.slane %v8896_v33, %v7730_v62  ;;  %1254 = vrot.lane.b32.xlu1 %v8905_v63, %s6072_s16  ;;  %v1932_v16 = vsel %vm1908_vm8, %v1875_v6, %v1039_v47  ;;  %v6045_v47 = vld [vmem:[%s11430_s0 + $0xc0] sm:$0xff] }
 0x319   :  { %1082 = vrot.lane.b32.xlu0 %v12132_v36, %s6070_s8  ;;  %v1989_v31 = vsel %vm1965_vm9, %v1932_v16, %v1211_v7  ;;  %v1705_v14 = vsel %vm1680_vm5, %v6045_v47, %v12140_v24  ;;  %v2803_v47 = vcombine.high %v8896_v33, %v8896_v33 }
 0x31a   :  { %v2818_v59 = vcombine.high %v2810_v29, %v2810_v29  ;;  %v8911_v3 = vpop.permute.xlu1 %1068 }
 0x31b   :  { %v1041_v1 = vpop.permute.xlu0 %1040 }
 0x31c   :  { %v3673_v19 = vcombine.low %v2810_v29, %v2818_v59  ;;  %910 = vrot.lane.b32.xlu1 %v12130_v27, %s6068_s30 }
 0x31d   :  { %1428 = vrot.lane.b32.xlu0 %v12137_v20, %s6071_s13 }
 0x31e   :  { %v3687_v8 = vrot.slane %v3673_v19, %v7730_v62  ;;  %v1213_v12 = vpop.permute.xlu1 %1212 }
 0x31f   :  { %v1385_v13 = vpop.permute.xlu0 %1384  ;;  %v8930_v15 = vpop.f32.mrb[18].mxu0 }
 0x320   :  { %1084 = vrot.lane.b32.xlu1 %v12134_v43, %s6070_s8  ;;  %v5833_v50 = vpop.f32.mrb[19].mxu0  ;;  %v3688_v27 = vcombine.low %v3680_v22, %v3687_v8  ;;  %v2046_v61 = vsel %vm2022_vm10, %v1989_v31, %v1385_v13  ;;  %v12142_v43 = vld [vmem:[#allocation171_spill] sm:$0xff] }
 0x321   :  { %1602 = vrot.lane.b32.xlu0 %v12139_v25, %s6075_s19  ;;  %v1762_v4 = vsel %vm1737_vm4, %v1705_v14, %v12142_v43  ;;  %v12147_v50 = vld [vmem:[#allocation210_spill] sm:$0xff] }
 0x322   :  { %v1559_v36 = vpop.permute.xlu1 %1558  ;;  %5901 = vmatmul.mubr.msk.f32.gmra.mrb[14].mxu1 %vm3961_vm12, %v3688_v27  ;;  %v1819_v26 = vsel %vm1794_vm6, %v1762_v4, %v12143_v9  ;;  %v9013_v9 = vld [vmem:[%s11430_s0 + $0x1b8] sm:$0xff] }
 0x323   :  { %v2103_v52 = vsel %vm2079_vm11, %v2046_v61, %v1559_v36  ;;  %v1241_v40 = vpop.permute.xlu0 %1240  ;;  %5903 = vmatprep.mubr.msk.f32.mxu1 %vm6074_vm3, %v12008_v34  ;;  %v1876_v46 = vsel %vm1851_vm7, %v1819_v26, %v8884_v45  ;;  %v12146_v45 = vld [vmem:[#allocation185_spill] sm:$0xff] }
 0x324   :  { %v2572_v60 = vcombine.high %v2103_v52, %v2103_v52  ;;  %v2579_v44 = vrot.slane %v2103_v52, %v7730_v62  ;;  %1430 = vrot.lane.b32.xlu1 %v12141_v30, %s6071_s13  ;;  %v1933_v58 = vsel %vm1908_vm8, %v1876_v46, %v1041_v1  ;;  %v1776_v8 = vsel %vm1737_vm4, %v1719_v38, %v12146_v45 }
 0x325   :  { %1256 = vrot.lane.b32.xlu0 %v8958_v18, %s6072_s16  ;;  %v8962_v21 = vpop.f32.mrb[20].mxu0  ;;  %v1990_v22 = vsel %vm1965_vm9, %v1933_v58, %v1213_v12  ;;  %v1833_v27 = vsel %vm1794_vm6, %v1776_v8, %v12147_v50 }
 0x326   :  { %v2586_v37 = vrot.slane %v2572_v60, %v7730_v62  ;;  %v2587_v7 = vcombine.high %v2579_v44, %v2579_v44  ;;  %v3468_v29 = vcombine.low %v2571_v48, %v2579_v44  ;;  %v1415_v11 = vpop.permute.xlu1 %1414  ;;  %v5836_v59 = vpop.f32.mrb[21].mxu0  ;;  %v1890_v12 = vsel %vm1851_vm7, %v1833_v27, %v8880_v17 }
 0x327   :  { %v1387_v55 = vpop.permute.xlu0 %1386  ;;  %v1947_v24 = vsel %vm1908_vm8, %v1890_v12, %v8911_v3  ;;  %v12151_v12 = vld [vmem:[#allocation129_spill] sm:$0xff] }
 0x328   :  { %v3469_v19 = vcombine.low %v2587_v7, %v2586_v37  ;;  %1604 = vrot.lane.b32.xlu1 %v12144_v23, %s6075_s19  ;;  %v3476_v1 = vrot.slane %v3468_v29, %v7730_v62  ;;  %v2047_v13 = vsel %vm2022_vm10, %v1990_v22, %v1387_v55  ;;  %v2004_v14 = vsel %vm1965_vm9, %v1947_v24, %v1241_v40  ;;  %v12154_v24 = vld [vmem:[#allocation209_spill] sm:$0xff] }
 0x329   :  { %912 = vrot.lane.b32.xlu0 %v12137_v20, %s6068_s30  ;;  %v2061_v44 = vsel %vm2022_vm10, %v2004_v14, %v1415_v11 }
 0x32a   :  { %v3483_v6 = vrot.slane %v3469_v19, %v7730_v62  ;;  %v1561_v16 = vpop.permute.xlu1 %1560 }
 0x32b   :  { %v2104_v31 = vsel %vm2079_vm11, %v2047_v13, %v1561_v16  ;;  %v897_v61 = vpop.permute.xlu0 %896  ;;  %v12150_v13 = vld [vmem:[#allocation144_spill] sm:$0xff] }
 0x32c   :  { %v2588_v20 = vcombine.high %v2104_v31, %v2104_v31  ;;  %v2595_v36 = vrot.slane %v2104_v31, %v7730_v62  ;;  %914 = vrot.lane.b32.xlu1 %v12141_v30, %s6068_s30  ;;  %v3484_v52 = vcombine.low %v3476_v1, %v3483_v6  ;;  %v12149_v6 = vld [vmem:[#allocation52_spill] sm:$0xff]  ;;  %v6050_v31 = vld [vmem:[%s11430_s0 + $0x158] sm:$0xff] }
 0x32d   :  { %1086 = vrot.lane.b32.xlu0 %v12139_v25, %s6070_s8  ;;  %v2817_v25 = vrot.slane %v2803_v47, %v7730_v62  ;;  %v12153_v47 = vld [vmem:[#allocation151_spill] sm:$0xff] }
 0x32e   :  { %v2602_v17 = vrot.slane %v2588_v20, %v7730_v62  ;;  %v2603_v48 = vcombine.high %v2595_v36, %v2595_v36  ;;  %v1071_v60 = vpop.permute.xlu1 %1070  ;;  %5865 = vmatmul.mubr.msk.f32.gmra.mrb[40].mxu0 %vm3961_vm12, %v3484_v52  ;;  %v1720_v20 = vsel %vm1680_vm5, %v6050_v31, %v12151_v12  ;;  %v12159_v12 = vld [vmem:[#allocation25_spill] sm:$0xff] }
 0x32f   :  { %v1589_v30 = vpop.permute.xlu0 %1588  ;;  %5867 = vmatprep.mubr.msk.f32.mxu0 %vm6074_vm3, %v12008_v34 }
 0x330   :  { %v2604_v33 = vcombine.high %v2602_v17, %v2602_v17  ;;  %v3485_v43 = vcombine.low %v2595_v36, %v2603_v48  ;;  %v2118_v3 = vsel %vm2079_vm11, %v2061_v44, %v1589_v30  ;;  %1088 = vrot.lane.b32.xlu1 %v12144_v23, %s6070_s8  ;;  %v9029_v23 = vld [vmem:[%s11430_s0 + $0x1c0] sm:$0xff]  ;;  %v12152_v36 = vld [vmem:[#allocation184_spill] sm:$0xff] }
 0x331   :  { %v2819_v40 = vcombine.high %v2118_v3, %v2118_v3  ;;  %v2826_v4 = vrot.slane %v2118_v3, %v7730_v62  ;;  %1258 = vrot.lane.b32.xlu0 %v9013_v9, %s6072_s16  ;;  %v9017_v26 = vpop.f32.mrb[22].mxu0  ;;  %v1777_v52 = vsel %vm1737_vm4, %v1720_v20, %v12152_v36  ;;  %v12160_v36 = vld [vmem:[#allocation211_spill] sm:$0xff] }
 0x332   :  { %v3486_v37 = vcombine.low %v2602_v17, %v2604_v33  ;;  %v9019_v7 = vpop.permute.xlu1 %898  ;;  %v5839_v29 = vpop.f32.mrb[23].mxu0  ;;  %v3493_v58 = vrot.slane %v3485_v43, %v7730_v62  ;;  %v1834_v14 = vsel %vm1794_vm6, %v1777_v52, %v12154_v24 }
 0x333   :  { %v2833_v11 = vrot.slane %v2819_v40, %v7730_v62  ;;  %v2834_v59 = vcombine.high %v2826_v4, %v2826_v4  ;;  %v3689_v46 = vcombine.low %v2817_v25, %v2826_v4  ;;  %v9022_v55 = vpop.permute.xlu0 %868  ;;  %v1891_v48 = vsel %vm1851_vm7, %v1834_v14, %v897_v61 }
 0x334   :  { %v3500_v19 = vrot.slane %v3486_v37, %v7730_v62  ;;  %1260 = vrot.lane.b32.xlu1 %v9029_v23, %s6072_s16  ;;  %v1948_v30 = vsel %vm1908_vm8, %v1891_v48, %v1071_v60  ;;  %v9079_v60 = vld [vmem:[%s11430_s0 + $0x1c8] sm:$0xff] }
 0x335   :  { %v3690_v51 = vcombine.low %v2834_v59, %v2833_v11  ;;  %1432 = vrot.lane.b32.xlu0 %v12148_v41, %s6071_s13  ;;  %v3697_v45 = vrot.slane %v3689_v46, %v7730_v62  ;;  %v2835_v4 = vcombine.high %v2833_v11, %v2833_v11 }
 0x336   :  { %v9035_v38 = vpop.permute.xlu1 %1042  ;;  %v3501_v22 = vcombine.low %v3493_v58, %v3500_v19  ;;  %v6052_v19 = vld [vmem:[%s11430_s0 + $0x160] sm:$0xff] }
 0x337   :  { %v3704_v8 = vrot.slane %v3690_v51, %v7730_v62  ;;  %v1243_v1 = vpop.permute.xlu0 %1242  ;;  %v12155_v51 = vld [vmem:[#allocation134_spill] sm:$0xff] }
 0x338   :  { %1434 = vrot.lane.b32.xlu1 %v12149_v6, %s6071_s13  ;;  %5868 = vmatmul.mubr.msk.f32.gmra.mrb[42].mxu0 %vm3961_vm12, %v3501_v22  ;;  %v2005_v33 = vsel %vm1965_vm9, %v1948_v30, %v1243_v1  ;;  %v12156_v1 = vld [vmem:[#allocation105_spill] sm:$0xff]  ;;  %v12161_v30 = vld [vmem:[#allocation60_spill] sm:$0xff] }
 0x339   :  { %1606 = vrot.lane.b32.xlu0 %v12150_v13, %s6075_s19  ;;  %v3705_v16 = vcombine.low %v3697_v45, %v3704_v8  ;;  %5870 = vmatprep.mubr.msk.f32.mxu0 %vm6074_vm3, %v12008_v34  ;;  %v9092_v45 = vld [vmem:[%s11430_s0 + $0x1d0] sm:$0xff]  ;;  %v6054_v8 = vld [vmem:[%s11430_s0 + $0xc8] sm:$0xff] }
 0x33a   :  { %v1417_v50 = vpop.permute.xlu1 %1416 }
 0x33b   :  { %5904 = vmatmul.mubr.msk.f32.gmra.mrb[16].mxu1 %vm3961_vm12, %v3705_v16  ;;  %v1073_v27 = vpop.permute.xlu0 %1072  ;;  %v2062_v43 = vsel %vm2022_vm10, %v2005_v33, %v1417_v50  ;;  %v12158_v50 = vld [vmem:[#allocation51_spill] sm:$0xff] }
 0x33c   :  { %916 = vrot.lane.b32.xlu1 %v12148_v41, %s6068_s30  ;;  %5906 = vmatprep.mubr.msk.f32.mxu1 %vm6074_vm3, %v12008_v34  ;;  %v1721_v41 = vsel %vm1680_vm5, %v6052_v19, %v12155_v51 }
 0x33d   :  { %1608 = vrot.lane.b32.xlu0 %v12153_v47, %s6075_s19 }
 0x33e   :  { %v1215_v17 = vpop.permute.xlu1 %1214 }
 0x33f   :  { %v9063_v44 = vpop.permute.xlu0 %870 }
 0x340   :  { %918 = vrot.lane.b32.xlu1 %v12149_v6, %s6068_s30  ;;  %v1706_v6 = vsel %vm1680_vm5, %v6054_v8, %v12156_v1 }
 0x341   :  { %1090 = vrot.lane.b32.xlu0 %v12150_v13, %s6070_s8  ;;  %v12157_v13 = vld [vmem:[#allocation187_spill] sm:$0xff]  ;;  %v1763_v20 = vsel %vm1737_vm4, %v1706_v6, %v12159_v12  ;;  %v12166_v6 = vld [vmem:[#allocation173_spill] sm:$0xff] }
 0x342   :  { %v1591_v3 = vpop.permute.xlu1 %1590  ;;  %v1778_v16 = vsel %vm1737_vm4, %v1721_v41, %v12157_v13  ;;  %v1820_v33 = vsel %vm1794_vm6, %v1763_v20, %v12161_v30  ;;  %v12167_v12 = vld [vmem:[#allocation61_spill] sm:$0xff] }
 0x343   :  { %v2119_v25 = vsel %vm2079_vm11, %v2062_v43, %v1591_v3  ;;  %v1245_v40 = vpop.permute.xlu0 %1244  ;;  %v1835_v52 = vsel %vm1794_vm6, %v1778_v16, %v12160_v36 }
 0x344   :  { %v2836_v61 = vcombine.high %v2119_v25, %v2119_v25  ;;  %v2843_v37 = vrot.slane %v2119_v25, %v7730_v62  ;;  %1092 = vrot.lane.b32.xlu1 %v12153_v47, %s6070_s8  ;;  %v1892_v43 = vsel %vm1851_vm7, %v1835_v52, %v9019_v7  ;;  %v1877_v25 = vsel %vm1851_vm7, %v1820_v33, %v9022_v55 }
 0x345   :  { %1262 = vrot.lane.b32.xlu0 %v9079_v60, %s6072_s16 }
 0x346   :  { %v2850_v29 = vrot.slane %v2836_v61, %v7730_v62  ;;  %v2851_v59 = vcombine.high %v2843_v37, %v2843_v37  ;;  %v3706_v46 = vcombine.low %v2835_v4, %v2843_v37  ;;  %v1389_v58 = vpop.permute.xlu1 %1388  ;;  %v1949_v4 = vsel %vm1908_vm8, %v1892_v43, %v1073_v27  ;;  %v12162_v61 = vld [vmem:[#allocation54_spill] sm:$0xff] }
 0x347   :  { %v1045_v11 = vpop.permute.xlu0 %1044 }
 0x348   :  { %v3707_v22 = vcombine.low %v2851_v59, %v2850_v29  ;;  %1264 = vrot.lane.b32.xlu1 %v9092_v45, %s6072_s16  ;;  %v3714_v47 = vrot.slane %v3706_v46, %v7730_v62  ;;  %v1934_v29 = vsel %vm1908_vm8, %v1877_v25, %v9035_v38  ;;  %v2006_v59 = vsel %vm1965_vm9, %v1949_v4, %v1245_v40  ;;  %v12163_v46 = vld [vmem:[#allocation148_spill] sm:$0xff] }
 0x349   :  { %1436 = vrot.lane.b32.xlu0 %v12158_v50, %s6071_s13  ;;  %v9105_v31 = vpop.f32.mrb[24].mxu0  ;;  %v1991_v7 = vsel %vm1965_vm9, %v1934_v29, %v1215_v17  ;;  %v6055_v38 = vld [vmem:[%s11430_s0 + $0xd0] sm:$0xff] }
 0x34a   :  { %v3721_v24 = vrot.slane %v3707_v22, %v7730_v62  ;;  %v1217_v14 = vpop.permute.xlu1 %1216  ;;  %v5842_v48 = vpop.f32.mrb[25].mxu0  ;;  %v2048_v55 = vsel %vm2022_vm10, %v1991_v7, %v1389_v58  ;;  %v12164_v40 = vld [vmem:[#allocation108_spill] sm:$0xff]  ;;  %v12165_v58 = vld [vmem:[#allocation155_spill] sm:$0xff] }
 0x34b   :  { %v1419_v3 = vpop.permute.xlu0 %1418  ;;  %v1707_v17 = vsel %vm1680_vm5, %v6055_v38, %v12164_v40  ;;  %v9186_v40 = vld [vmem:[%s11430_s0 + $0x1d8] sm:$0xff] }
 0x34c   :  { %1438 = vrot.lane.b32.xlu1 %v12162_v61, %s6071_s13  ;;  %v3722_v37 = vcombine.low %v3714_v47, %v3721_v24  ;;  %v2063_v19 = vsel %vm2022_vm10, %v2006_v59, %v1419_v3  ;;  %v1764_v13 = vsel %vm1737_vm4, %v1707_v17, %v12166_v6 }
 0x34d   :  { %1610 = vrot.lane.b32.xlu0 %v12163_v46, %s6075_s19  ;;  %v1821_v20 = vsel %vm1794_vm6, %v1764_v13, %v12167_v12  ;;  %v12168_v12 = vld [vmem:[#allocation53_spill] sm:$0xff] }
 0x34e   :  { %v1593_v51 = vpop.permute.xlu1 %1592  ;;  %5907 = vmatmul.mubr.msk.f32.gmra.mrb[18].mxu1 %vm3961_vm12, %v3722_v37  ;;  %v1878_v24 = vsel %vm1851_vm7, %v1821_v20, %v9063_v44 }
 0x34f   :  { %v2120_v27 = vsel %vm2079_vm11, %v2063_v19, %v1593_v51  ;;  %v1563_v41 = vpop.permute.xlu0 %1562  ;;  %5909 = vmatprep.mubr.msk.f32.mxu1 %vm6074_vm3, %v12008_v34  ;;  %v1935_v33 = vsel %vm1908_vm8, %v1878_v24, %v1045_v11 }
 0x350   :  { %v2852_v22 = vcombine.high %v2120_v27, %v2120_v27  ;;  %v2859_v8 = vrot.slane %v2120_v27, %v7730_v62  ;;  %v2105_v1 = vsel %vm2079_vm11, %v2048_v55, %v1563_v41  ;;  %1612 = vrot.lane.b32.xlu1 %v12165_v58, %s6075_s19  ;;  %v6056_v55 = vld [vmem:[%s11430_s0 + $0x1e8] sm:$0xff]  ;;  %v6057_v41 = vld [vmem:[%s11430_s0 + $0x1e0] sm:$0xff] }
 0x351   :  { %v2612_v16 = vrot.slane %v2105_v1, %v7730_v62  ;;  %920 = vrot.lane.b32.xlu0 %v12158_v50, %s6068_s30  ;;  %v2605_v48 = vcombine.high %v2105_v1, %v2105_v1  ;;  %v1992_v50 = vsel %vm1965_vm9, %v1935_v33, %v1217_v14  ;;  %v9178_v27 = vrot.slane %v6056_v55, 1 }
 0x352   :  { %v2866_v36 = vrot.slane %v2852_v22, %v7730_v62  ;;  %v2867_v52 = vcombine.high %v2859_v8, %v2859_v8  ;;  %v9151_v47 = vpop.permute.xlu1 %872  ;;  %v815_v38 = vrot.slane %v6057_v41, 1  ;;  %v9197_v13 = vrot.slane %v6056_v55, 2 }
 0x353   :  { %v1391_v30 = vpop.permute.xlu0 %1390  ;;  %v2620_v25 = vcombine.high %v2612_v16, %v2612_v16  ;;  %v2619_v11 = vrot.slane %v2605_v48, %v7730_v62  ;;  %v12169_v48 = vld [vmem:[#allocation152_spill] sm:$0xff] }
 0x354   :  { %v2868_v43 = vcombine.high %v2866_v36, %v2866_v36  ;;  %v3723_v3 = vcombine.low %v2859_v8, %v2867_v52  ;;  %922 = vrot.lane.b32.xlu1 %v12162_v61, %s6068_s30  ;;  %v2049_v44 = vsel %vm2022_vm10, %v1992_v50, %v1391_v30  ;;  %v817_v20 = vsel %vm134_vm0, %v815_v38, %v9178_v27 }
 0x355   :  { %1094 = vrot.lane.b32.xlu0 %v12163_v46, %s6070_s8  ;;  %v9161_v4 = vpop.f32.mrb[0].mxu1  ;;  %v3502_v51 = vcombine.low %v2612_v16, %v2620_v25  ;;  %v989_v16 = vrot.slane %v6057_v41, 2 }
 0x356   :  { %v3724_v37 = vcombine.low %v2866_v36, %v2868_v43  ;;  %v1565_v29 = vpop.permute.xlu1 %1564  ;;  %v5881_v59 = vpop.f32.mrb[1].mxu1  ;;  %v3731_v61 = vrot.slane %v3723_v3, %v7730_v62 }
 0x357   :  { %v2106_v7 = vsel %vm2079_vm11, %v2049_v44, %v1565_v29  ;;  %v9166_v19 = vpop.permute.xlu0 %900  ;;  %v9215_v33 = vsel %vm387_vm1, %v989_v16, %v9197_v13  ;;  %v12170_v44 = vld [vmem:[#allocation107_spill] sm:$0xff]  ;;  %v12171_v59 = vld [vmem:[#allocation172_spill] sm:$0xff] }
 0x358   :  { %v3738_v14 = vrot.slane %v3724_v37, %v7730_v62  ;;  %v9171_v46 = vrot.slane %v2106_v7, %v7730_v62  ;;  %1096 = vrot.lane.b32.xlu1 %v12165_v58, %s6070_s8  ;;  %v3510_v58 = vrot.slane %v3502_v51, %v7730_v62  ;;  %v2621_v25 = vcombine.high %v2106_v7, %v2106_v7  ;;  %v6059_v37 = vld [vmem:[%s11430_s0 + $0xd8] sm:$0xff]  ;;  %v12172_v7 = vld [vmem:[#allocation64_spill] sm:$0xff] }
 0x359   :  { %1266 = vrot.lane.b32.xlu0 %v9186_v40, %s6072_s16  ;;  %v1708_v29 = vsel %vm1680_vm5, %v6059_v37, %v12170_v44 }
 0x35a   :  { %v3503_v17 = vcombine.low %v2619_v11, %v9171_v46  ;;  %v9191_v22 = vpop.permute.xlu1 %1074  ;;  %v3739_v8 = vcombine.low %v3731_v61, %v3738_v14  ;;  %v1765_v11 = vsel %vm1737_vm4, %v1708_v29, %v12171_v59  ;;  %v2661_v61 = vrot.slane %v8188_v2, %v7730_v62  ;;  %v6060_v2 = vld [vmem:[%s11430_s0 + $0x168] sm:$0xff]  ;;  %v76_v59 = vld [vmem:[%s11430_s0 + $0x1f0] sm:$0xff] }
 0x35b   :  { %v1047_v1 = vpop.permute.xlu0 %1046  ;;  %v1822_v14 = vsel %vm1794_vm6, %v1765_v11, %v12172_v7  ;;  %v2635_v38 = vrot.slane %v2621_v25, %v7730_v62  ;;  %v12176_v25 = vld [vmem:[#allocation189_spill] sm:$0xff]  ;;  %v12177_v11 = vld [vmem:[#allocation10_spill] sm:$0xff] }
 0x35c   :  { %v3517_v6 = vrot.slane %v3503_v17, %v7730_v62  ;;  %1268 = vrot.lane.b32.xlu1 %v6057_v41, %s6072_s16  ;;  %5910 = vmatmul.mubr.msk.f32.gmra.mrb[20].mxu1 %vm3961_vm12, %v3739_v8  ;;  %v1879_v41 = vsel %vm1851_vm7, %v1822_v14, %v9151_v47  ;;  %v2636_v17 = vcombine.high %v9171_v46, %v9171_v46  ;;  %v6061_v47 = vld [vmem:[%s11430_s0 + $0x170] sm:$0xff]  ;;  %v12178_v7 = vld [vmem:[#allocation69_spill] sm:$0xff] }
 0x35d   :  { %1440 = vrot.lane.b32.xlu0 %v12168_v12, %s6071_s13  ;;  %5912 = vmatprep.mubr.msk.f32.mxu1 %vm6074_vm3, %v12008_v34  ;;  %v2669_v46 = vcombine.high %v2661_v61, %v2661_v61 }
 0x35e   :  { %v1219_v36 = vpop.permute.xlu1 %1218  ;;  %v3518_v52 = vcombine.low %v3510_v58, %v3517_v6  ;;  %v1936_v58 = vsel %vm1908_vm8, %v1879_v41, %v1047_v1  ;;  %v12173_v6 = vld [vmem:[#allocation133_spill] sm:$0xff]  ;;  %v3519_v41 = vcombine.low %v2636_v17, %v2635_v38  ;;  %v1335_v17 = vrot.slane %v76_v59, 1 }
 0x35f   :  { %v9205_v24 = vpop.permute.xlu0 %902  ;;  %v1722_v16 = vsel %vm1680_vm5, %v6060_v2, %v12173_v6 }
 0x360   :  { %1442 = vrot.lane.b32.xlu1 %v817_v20, %s6071_s13  ;;  %5871 = vmatmul.mubr.msk.f32.gmra.mrb[44].mxu0 %vm3961_vm12, %v3518_v52 }
 0x361   :  { %1614 = vrot.lane.b32.xlu0 %v12169_v48, %s6075_s19  ;;  %v9211_v30 = vpop.f32.mrb[26].mxu0  ;;  %5873 = vmatprep.mubr.msk.f32.mxu0 %vm6074_vm3, %v12008_v34 }
 0x362   :  { %v9219_v43 = vpop.permute.xlu1 %1076  ;;  %v5845_v3 = vpop.f32.mrb[27].mxu0 }
 0x363   :  { %v1247_v50 = vpop.permute.xlu0 %1246  ;;  %v1993_v3 = vsel %vm1965_vm9, %v1936_v58, %v1219_v36  ;;  %v9267_v36 = vld [vmem:[%s11430_s0 + $0x1f8] sm:$0xff] }
 0x364   :  { %1616 = vrot.lane.b32.xlu1 %v9215_v33, %s6075_s19 }
 0x365   :  { %924 = vrot.lane.b32.xlu0 %v12168_v12, %s6068_s30  ;;  %v12174_v12 = vld [vmem:[#allocation138_spill] sm:$0xff] }
 0x366   :  { %v1421_v51 = vpop.permute.xlu1 %1420  ;;  %v1723_v52 = vsel %vm1680_vm5, %v6061_v47, %v12174_v12 }
 0x367   :  { %v1393_v8 = vpop.permute.xlu0 %1392  ;;  %v1780_v37 = vsel %vm1737_vm4, %v1723_v52, %v12176_v25 }
 0x368   :  { %1270 = vrot.lane.b32.xlu1 %v6056_v55, %s6072_s16  ;;  %v12175_v55 = vld [vmem:[#allocation186_spill] sm:$0xff]  ;;  %v2050_v44 = vsel %vm2022_vm10, %v1993_v3, %v1393_v8  ;;  %v1837_v14 = vsel %vm1794_vm6, %v1780_v37, %v12178_v7  ;;  %v3537_v3 = vcombine.low %v2661_v61, %v2669_v46  ;;  %v3527_v61 = vrot.slane %v3519_v41, %v7730_v62 }
 0x369   :  { %1098 = vrot.lane.b32.xlu0 %v12169_v48, %s6070_s8  ;;  %v1779_v1 = vsel %vm1737_vm4, %v1722_v16, %v12175_v55  ;;  %v2637_v16 = vcombine.high %v2635_v38, %v2635_v38  ;;  %v1894_v7 = vsel %vm1851_vm7, %v1837_v14, %v9205_v24 }
 0x36a   :  { %v1567_v29 = vpop.permute.xlu1 %1566  ;;  %v1836_v48 = vsel %vm1794_vm6, %v1779_v1, %v12177_v11  ;;  %v1336_v1 = vrot.slane %v9267_v36, 1  ;;  %v1509_v11 = vrot.slane %v76_v59, 2  ;;  %v1951_v41 = vsel %vm1908_vm8, %v1894_v7, %v9219_v43 }
 0x36b   :  { %v2107_v58 = vsel %vm2079_vm11, %v2050_v44, %v1567_v29  ;;  %v1249_v8 = vpop.permute.xlu0 %1248  ;;  %v9274_v2 = vpop.f32.mrb[28].mxu0  ;;  %v1893_v6 = vsel %vm1851_vm7, %v1836_v48, %v9166_v19  ;;  %v1510_v48 = vrot.slane %v9267_v36, 2 }
 0x36c   :  { %v2638_v47 = vcombine.high %v2107_v58, %v2107_v58  ;;  %v2645_v12 = vrot.slane %v2107_v58, %v7730_v62  ;;  %926 = vrot.lane.b32.xlu1 %v817_v20, %s6068_s30  ;;  %v5848_v52 = vpop.f32.mrb[29].mxu0  ;;  %v1950_v55 = vsel %vm1908_vm8, %v1893_v6, %v9191_v22  ;;  %v1337_v24 = vsel %vm134_vm0, %v1335_v17, %v1336_v1 }
 0x36d   :  { %1444 = vrot.lane.b32.xlu0 %v9178_v27, %s6071_s13  ;;  %v2007_v25 = vsel %vm1965_vm9, %v1950_v55, %v1247_v50  ;;  %v1511_v17 = vsel %vm387_vm1, %v1509_v11, %v1510_v48 }
 0x36e   :  { %v2652_v19 = vrot.slane %v2638_v47, %v7730_v62  ;;  %v2653_v38 = vcombine.high %v2645_v12, %v2645_v12  ;;  %v3520_v37 = vcombine.low %v2637_v16, %v2645_v12  ;;  %v9287_v44 = vpop.f32.mrb[2].mxu1  ;;  %v1423_v20 = vpop.permute.xlu1 %1422  ;;  %v2064_v46 = vsel %vm2022_vm10, %v2007_v25, %v1421_v51 }
 0x36f   :  { %v5884_v22 = vpop.f32.mrb[3].mxu1  ;;  %v1595_v29 = vpop.permute.xlu0 %1594  ;;  %v2008_v47 = vsel %vm1965_vm9, %v1951_v41, %v1249_v8  ;;  %v3551_v25 = vrot.slane %v3537_v3, %v7730_v62 }
 0x370   :  { %v3534_v50 = vrot.slane %v3520_v37, %v7730_v62  ;;  %v3536_v58 = vcombine.low %v2653_v38, %v2652_v19  ;;  %v2121_v6 = vsel %vm2079_vm11, %v2064_v46, %v1595_v29  ;;  %1100 = vrot.lane.b32.xlu1 %v9215_v33, %s6070_s8  ;;  %v2065_v33 = vsel %vm2022_vm10, %v2008_v47, %v1423_v20 }
 0x371   :  { %v2869_v51 = vcombine.high %v2121_v6, %v2121_v6  ;;  %v2876_v16 = vrot.slane %v2121_v6, %v7730_v62  ;;  %1618 = vrot.lane.b32.xlu0 %v9197_v13, %s6075_s19  ;;  %v12179_v6 = vld [vmem:[#allocation137_spill] sm:$0xff] }
 0x372   :  { %v3544_v14 = vrot.slane %v3536_v58, %v7730_v62  ;;  %v1597_v12 = vpop.permute.xlu1 %1596  ;;  %v3535_v52 = vcombine.low %v3527_v61, %v3534_v50  ;;  %v6062_v58 = vld [vmem:[%s11430_s0 + $0x178] sm:$0xff] }
 0x373   :  { %v2884_v55 = vcombine.high %v2876_v16, %v2876_v16  ;;  %v905_v43 = vpop.permute.xlu0 %904  ;;  %v2122_v19 = vsel %vm2079_vm11, %v2065_v33, %v1597_v12  ;;  %v2883_v38 = vrot.slane %v2869_v51, %v7730_v62  ;;  %v1724_v41 = vsel %vm1680_vm5, %v6062_v58, %v12179_v6  ;;  %v6063_v12 = vld [vmem:[%s11430_s0 + $0x180] sm:$0xff] }
 0x374   :  { %1446 = vrot.lane.b32.xlu1 %v1337_v24, %s6071_s13  ;;  %5874 = vmatmul.mubr.msk.f32.gmra.mrb[46].mxu0 %vm3961_vm12, %v3535_v52  ;;  %v2892_v8 = vrot.slane %v2122_v19, %v7730_v62  ;;  %v3552_v3 = vcombine.low %v3544_v14, %v3551_v25  ;;  %v2885_v50 = vcombine.high %v2122_v19, %v2122_v19  ;;  %v12181_v24 = vld [vmem:[#allocation13_spill] sm:$0xff]  ;;  %v12182_v52 = vld [vmem:[#allocation142_spill] sm:$0xff]  ;;  %v12183_v19 = vld [vmem:[#allocation191_spill] sm:$0xff] }
 0x375   :  { %v3740_v37 = vcombine.low %v2876_v16, %v2884_v55  ;;  %1272 = vrot.lane.b32.xlu0 %v76_v59, %s6072_s16  ;;  %5876 = vmatprep.mubr.msk.f32.mxu0 %vm6074_vm3, %v12008_v34 }
 0x376   :  { %v907_v20 = vpop.permute.xlu1 %906  ;;  %v3741_v61 = vcombine.low %v2883_v38, %v2892_v8  ;;  %v2899_v33 = vrot.slane %v2885_v50, %v7730_v62  ;;  %v2900_v55 = vcombine.high %v2892_v8, %v2892_v8 }
 0x377   :  { %v1079_v46 = vpop.permute.xlu0 %1078  ;;  %v3748_v22 = vrot.slane %v3740_v37, %v7730_v62 }
 0x378   :  { %1620 = vrot.lane.b32.xlu1 %v1511_v17, %s6075_s19  ;;  %5877 = vmatmul.mubr.msk.f32.gmra.mrb[48].mxu0 %vm3961_vm12, %v3552_v3  ;;  %v3755_v29 = vrot.slane %v3741_v61, %v7730_v62  ;;  %v12184_v3 = vld [vmem:[#allocation212_spill] sm:$0xff]  ;;  %v3757_v50 = vcombine.low %v2900_v55, %v2899_v33  ;;  %v2901_v58 = vcombine.high %v2899_v33, %v2899_v33  ;;  %v12185_v55 = vld [vmem:[#allocation141_spill] sm:$0xff] }
 0x379   :  { %928 = vrot.lane.b32.xlu0 %v9178_v27, %s6068_s30  ;;  %v12180_v27 = vld [vmem:[#allocation188_spill] sm:$0xff] }
 0x37a   :  { %v1081_v11 = vpop.permute.xlu1 %1080  ;;  %v3756_v7 = vcombine.low %v3748_v22, %v3755_v29  ;;  %v1781_v51 = vsel %vm1737_vm4, %v1724_v41, %v12180_v27 }
 0x37b   :  { %v1251_v59 = vpop.permute.xlu0 %1250  ;;  %v1838_v14 = vsel %vm1794_vm6, %v1781_v51, %v12181_v24 }
 0x37c   :  { %1274 = vrot.lane.b32.xlu1 %v9267_v36, %s6072_s16  ;;  %5913 = vmatmul.mubr.msk.f32.gmra.mrb[22].mxu1 %vm3961_vm12, %v3756_v7  ;;  %v1895_v25 = vsel %vm1851_vm7, %v1838_v14, %v905_v43 }
 0x37d   :  { %1102 = vrot.lane.b32.xlu0 %v9197_v13, %s6070_s8  ;;  %5915 = vmatprep.mubr.msk.f32.mxu1 %vm6074_vm3, %v12008_v34  ;;  %v1725_v13 = vsel %vm1680_vm5, %v6063_v12, %v12182_v52  ;;  %v1952_v38 = vsel %vm1908_vm8, %v1895_v25, %v1079_v46  ;;  %v3765_v12 = vrot.slane %v3757_v50, %v7730_v62 }
 0x37e   :  { %v1253_v16 = vpop.permute.xlu1 %1252  ;;  %v1782_v17 = vsel %vm1737_vm4, %v1725_v13, %v12183_v19  ;;  %v2009_v8 = vsel %vm1965_vm9, %v1952_v38, %v1251_v59  ;;  %v1726_v25 = vsel %vm1680_vm5, %v8718_v28, %v12185_v55 }
 0x37f   :  { %v1425_v47 = vpop.permute.xlu0 %1424  ;;  %v1839_v61 = vsel %vm1794_vm6, %v1782_v17, %v12184_v3  ;;  %v12186_v3 = vld [vmem:[#allocation190_spill] sm:$0xff] }
 0x380   :  { %1622 = vrot.lane.b32.xlu1 %v1510_v48, %s6075_s19  ;;  %v1896_v48 = vsel %vm1851_vm7, %v1839_v61, %v907_v20  ;;  %v2066_v29 = vsel %vm2022_vm10, %v2009_v8, %v1425_v47  ;;  %v1783_v61 = vsel %vm1737_vm4, %v1726_v25, %v12186_v3 }
 0x381   :  { %1448 = vrot.lane.b32.xlu0 %v1336_v1, %s6071_s13  ;;  %v9355_v37 = vpop.f32.mrb[4].mxu1  ;;  %v1953_v46 = vsel %vm1908_vm8, %v1896_v48, %v1081_v11 }
 0x382   :  { %v1427_v22 = vpop.permute.xlu1 %1426  ;;  %v5887_v43 = vpop.f32.mrb[5].mxu1  ;;  %v2010_v1 = vsel %vm1965_vm9, %v1953_v46, %v1253_v16 }
 0x383   :  { %v1599_v7 = vpop.permute.xlu0 %1598  ;;  %v2067_v59 = vsel %vm2022_vm10, %v2010_v1, %v1427_v22  ;;  %v12187_v22 = vld [vmem:[#allocation76_spill] sm:$0xff] }
 0x384   :  { %v2123_v36 = vsel %vm2079_vm11, %v2066_v29, %v1599_v7  ;;  %v1840_v43 = vsel %vm1794_vm6, %v1783_v61, %v12187_v22 }
 0x385   :  { %v2902_v6 = vcombine.high %v2123_v36, %v2123_v36  ;;  %v2909_v41 = vrot.slane %v2123_v36, %v7730_v62 }
 0x386   :  { %v1601_v27 = vpop.permute.xlu1 %1600 }
 0x387   :  { %v2916_v51 = vrot.slane %v2902_v6, %v7730_v62  ;;  %v2917_v20 = vcombine.high %v2909_v41, %v2909_v41  ;;  %v3758_v24 = vcombine.low %v2901_v58, %v2909_v41  ;;  %v2124_v14 = vsel %vm2079_vm11, %v2067_v59, %v1601_v27  ;;  %v909_v47 = vpop.permute.xlu0 %908  ;;  %v12188_v27 = vld [vmem:[#allocation146_spill] sm:$0xff] }
 0x388   :  { %v2925_v11 = vrot.slane %v2124_v14, %v7730_v62  ;;  %v2918_v19 = vcombine.high %v2124_v14, %v2124_v14  ;;  %v1897_v7 = vsel %vm1851_vm7, %v1840_v43, %v909_v47 }
 0x389   :  { %v3772_v16 = vrot.slane %v3758_v24, %v7730_v62  ;;  %v3774_v52 = vcombine.low %v2917_v20, %v2916_v51  ;;  %v1727_v51 = vsel %vm1680_vm5, %v8762_v42, %v12188_v27 }
 0x38a   :  { %v2933_v13 = vcombine.high %v2925_v11, %v2925_v11  ;;  %v1255_v33 = vpop.permute.xlu1 %1254  ;;  %v2932_v28 = vrot.slane %v2918_v19, %v7730_v62 }
 0x38b   :  { %v1083_v17 = vpop.permute.xlu0 %1082  ;;  %v3773_v38 = vcombine.low %v3765_v12, %v3772_v16  ;;  %v3782_v48 = vrot.slane %v3774_v52, %v7730_v62 }
 0x38c   :  { %v3775_v8 = vcombine.low %v2925_v11, %v2933_v13  ;;  %v1954_v46 = vsel %vm1908_vm8, %v1897_v7, %v1083_v17  ;;  %v2934_v20 = vcombine.high %v2932_v28, %v2932_v28  ;;  %v12189_v11 = vld [vmem:[#allocation193_spill] sm:$0xff]  ;;  %v12190_v13 = vld [vmem:[#allocation214_spill] sm:$0xff] }
 0x38d   :  { %5916 = vmatmul.mubr.msk.f32.gmra.mrb[24].mxu1 %vm3961_vm12, %v3773_v38  ;;  %v2011_v41 = vsel %vm1965_vm9, %v1954_v46, %v1255_v33  ;;  %v1784_v12 = vsel %vm1737_vm4, %v1727_v51, %v12189_v11 }
 0x38e   :  { %v3789_v29 = vrot.slane %v3775_v8, %v7730_v62  ;;  %v911_v50 = vpop.permute.xlu1 %910  ;;  %5918 = vmatprep.mubr.msk.f32.mxu1 %vm6074_vm3, %v12008_v34  ;;  %v1841_v33 = vsel %vm1794_vm6, %v1784_v12, %v12190_v13  ;;  %v3791_v19 = vcombine.low %v2932_v28, %v2934_v20  ;;  %v12191_v13 = vld [vmem:[#allocation145_spill] sm:$0xff] }
 0x38f   :  { %v1429_v36 = vpop.permute.xlu0 %1428  ;;  %v9387_v1 = vpop.f32.mrb[6].mxu1  ;;  %v1898_v55 = vsel %vm1851_vm7, %v1841_v33, %v911_v50  ;;  %v1728_v33 = vsel %vm1680_vm5, %v8836_v49, %v12191_v13 }
 0x390   :  { %v5890_v58 = vpop.f32.mrb[7].mxu1  ;;  %v3790_v6 = vcombine.low %v3782_v48, %v3789_v29  ;;  %v2068_v24 = vsel %vm2022_vm10, %v2011_v41, %v1429_v36  ;;  %v3799_v29 = vrot.slane %v3791_v19, %v7730_v62  ;;  %v12193_v19 = vld [vmem:[#allocation213_spill] sm:$0xff] }
 0x392   :  { %v1085_v59 = vpop.permute.xlu1 %1084  ;;  %5919 = vmatmul.mubr.msk.f32.gmra.mrb[26].mxu1 %vm3961_vm12, %v3790_v6 }
 0x393   :  { %v1603_v14 = vpop.permute.xlu0 %1602  ;;  %v9395_v47 = vpop.f32.mrb[30].mxu0  ;;  %5921 = vmatprep.mubr.msk.f32.mxu1 %vm6074_vm3, %v12008_v34  ;;  %v1955_v17 = vsel %vm1908_vm8, %v1898_v55, %v1085_v59 }
 0x394   :  { %v2125_v16 = vsel %vm2079_vm11, %v2068_v24, %v1603_v14  ;;  %v5851_v52 = vpop.f32.mrb[31].mxu0 }
 0x395   :  { %v2942_v42 = vrot.slane %v2125_v16, %v7730_v62  ;;  %v2935_v61 = vcombine.high %v2125_v16, %v2125_v16 }
 0x396   :  { %v1431_v25 = vpop.permute.xlu1 %1430 }
 0x397   :  { %v2950_v38 = vcombine.high %v2942_v42, %v2942_v42  ;;  %v1257_v3 = vpop.permute.xlu0 %1256  ;;  %v2949_v28 = vrot.slane %v2935_v61, %v7730_v62  ;;  %v12194_v61 = vld [vmem:[#allocation150_spill] sm:$0xff] }
 0x398   :  { %v2012_v8 = vsel %vm1965_vm9, %v1955_v17, %v1257_v3 }
 0x399   :  { %v3792_v22 = vcombine.low %v2942_v42, %v2950_v38  ;;  %v2069_v48 = vsel %vm2022_vm10, %v2012_v8, %v1431_v25  ;;  %v12192_v42 = vld [vmem:[#allocation192_spill] sm:$0xff]  ;;  %v1729_v8 = vsel %vm1680_vm5, %v8849_v5, %v12194_v61 }
 0x39a   :  { %v1605_v43 = vpop.permute.xlu1 %1604  ;;  %v1785_v55 = vsel %vm1737_vm4, %v1728_v33, %v12192_v42 }
 0x39b   :  { %v3806_v7 = vrot.slane %v3792_v22, %v7730_v62  ;;  %v2126_v46 = vsel %vm2079_vm11, %v2069_v48, %v1605_v43  ;;  %v913_v50 = vpop.permute.xlu0 %912  ;;  %v1842_v17 = vsel %vm1794_vm6, %v1785_v55, %v12193_v19  ;;  %v12195_v22 = vld [vmem:[#allocation195_spill] sm:$0xff] }
 0x39c   :  { %v2951_v36 = vcombine.high %v2126_v46, %v2126_v46  ;;  %v2958_v58 = vrot.slane %v2126_v46, %v7730_v62  ;;  %v1899_v3 = vsel %vm1851_vm7, %v1842_v17, %v913_v50  ;;  %v1786_v43 = vsel %vm1737_vm4, %v1729_v8, %v12195_v22 }
 0x39d   :  { %v3807_v6 = vcombine.low %v3799_v29, %v3806_v7  ;;  %v12196_v7 = vld [vmem:[#allocation217_spill] sm:$0xff] }
 0x39e   :  { %v2965_v41 = vrot.slane %v2951_v36, %v7730_v62  ;;  %v2966_v59 = vcombine.high %v2958_v58, %v2958_v58  ;;  %v3808_v27 = vcombine.low %v2949_v28, %v2958_v58  ;;  %v915_v51 = vpop.permute.xlu1 %914  ;;  %v1843_v46 = vsel %vm1794_vm6, %v1786_v43, %v12196_v7  ;;  %v12197_v7 = vld [vmem:[#allocation149_spill] sm:$0xff] }
 0x39f   :  { %5922 = vmatmul.mubr.msk.f32.gmra.mrb[28].mxu1 %vm3961_vm12, %v3807_v6  ;;  %v1087_v20 = vpop.permute.xlu0 %1086  ;;  %v1900_v50 = vsel %vm1851_vm7, %v1843_v46, %v915_v51  ;;  %v1730_v46 = vsel %vm1680_vm5, %v8905_v63, %v12197_v7 }
 0x3a0   :  { %v3809_v24 = vcombine.low %v2966_v59, %v2965_v41  ;;  %5924 = vmatprep.mubr.msk.f32.mxu1 %vm6074_vm3, %v12008_v34  ;;  %v3816_v14 = vrot.slane %v3808_v27, %v7730_v62  ;;  %v1956_v49 = vsel %vm1908_vm8, %v1899_v3, %v1087_v20  ;;  %v2967_v6 = vcombine.high %v2965_v41, %v2965_v41 }
 0x3a2   :  { %v3823_v11 = vrot.slane %v3809_v24, %v7730_v62  ;;  %v1089_v12 = vpop.permute.xlu1 %1088 }
 0x3a3   :  { %v1259_v16 = vpop.permute.xlu0 %1258  ;;  %v1957_v5 = vsel %vm1908_vm8, %v1900_v50, %v1089_v12  ;;  %v12198_v50 = vld [vmem:[#allocation194_spill] sm:$0xff] }
 0x3a4   :  { %v3824_v52 = vcombine.low %v3816_v14, %v3823_v11  ;;  %v2013_v48 = vsel %vm1965_vm9, %v1956_v49, %v1259_v16 }
 0x3a6   :  { %v1261_v25 = vpop.permute.xlu1 %1260  ;;  %5925 = vmatmul.mubr.msk.f32.gmra.mrb[30].mxu1 %vm3961_vm12, %v3824_v52 }
 0x3a7   :  { %v1433_v38 = vpop.permute.xlu0 %1432  ;;  %5927 = vmatprep.mubr.msk.f32.mxu1 %vm6074_vm3, %v12008_v34  ;;  %v2014_v20 = vsel %vm1965_vm9, %v1957_v5, %v1261_v25 }
 0x3a8   :  { %v2070_v28 = vsel %vm2022_vm10, %v2013_v48, %v1433_v38 }
 0x3aa   :  { %v1435_v29 = vpop.permute.xlu1 %1434 }
 0x3ab   :  { %v1607_v36 = vpop.permute.xlu0 %1606  ;;  %v2071_v14 = vsel %vm2022_vm10, %v2014_v20, %v1435_v29 }
 0x3ac   :  { %v2127_v58 = vsel %vm2079_vm11, %v2070_v28, %v1607_v36 }
 0x3ad   :  { %v2968_v59 = vcombine.high %v2127_v58, %v2127_v58  ;;  %v2975_v27 = vrot.slane %v2127_v58, %v7730_v62  ;;  %v1787_v58 = vsel %vm1737_vm4, %v1730_v46, %v12198_v50 }
 0x3ae   :  { %v917_v24 = vpop.permute.xlu1 %916 }
 0x3af   :  { %v2982_v11 = vrot.slane %v2968_v59, %v7730_v62  ;;  %v2983_v16 = vcombine.high %v2975_v27, %v2975_v27  ;;  %v3825_v52 = vcombine.low %v2967_v6, %v2975_v27  ;;  %v1609_v13 = vpop.permute.xlu0 %1608  ;;  %v12199_v6 = vld [vmem:[#allocation216_spill] sm:$0xff] }
 0x3b0   :  { %v2128_v51 = vsel %vm2079_vm11, %v2071_v14, %v1609_v13  ;;  %v9449_v33 = vpop.f32.mrb[32].mxu0  ;;  %v1844_v59 = vsel %vm1794_vm6, %v1787_v58, %v12199_v6  ;;  %v12201_v13 = vld [vmem:[#allocation197_spill] sm:$0xff] }
 0x3b1   :  { %v3826_v42 = vcombine.low %v2983_v16, %v2982_v11  ;;  %v2984_v12 = vcombine.high %v2128_v51, %v2128_v51  ;;  %v2991_v41 = vrot.slane %v2128_v51, %v7730_v62  ;;  %v5854_v55 = vpop.f32.mrb[33].mxu0  ;;  %v3833_v25 = vrot.slane %v3825_v52, %v7730_v62  ;;  %v12200_v11 = vld [vmem:[#allocation154_spill] sm:$0xff] }
 0x3b2   :  { %v919_v19 = vpop.permute.xlu1 %918  ;;  %v1731_v16 = vsel %vm1680_vm5, %v8958_v18, %v12200_v11  ;;  %v1901_v63 = vsel %vm1851_vm7, %v1844_v59, %v917_v24 }
 0x3b3   :  { %v3840_v17 = vrot.slane %v3826_v42, %v7730_v62  ;;  %v2998_v38 = vrot.slane %v2984_v12, %v7730_v62  ;;  %v2999_v3 = vcombine.high %v2991_v41, %v2991_v41  ;;  %v1091_v61 = vpop.permute.xlu0 %1090  ;;  %v1788_v51 = vsel %vm1737_vm4, %v1731_v16, %v12201_v13  ;;  %v12202_v12 = vld [vmem:[#allocation219_spill] sm:$0xff] }
 0x3b4   :  { %v1958_v42 = vsel %vm1908_vm8, %v1901_v63, %v1091_v61 }
 0x3b5   :  { %v3000_v8 = vcombine.high %v2998_v38, %v2998_v38  ;;  %v3842_v49 = vcombine.low %v2991_v41, %v2999_v3  ;;  %v3841_v22 = vcombine.low %v3833_v25, %v3840_v17  ;;  %v1845_v41 = vsel %vm1794_vm6, %v1788_v51, %v12202_v12  ;;  %v12204_v51 = vld [vmem:[#allocation196_spill] sm:$0xff] }
 0x3b6   :  { %v1093_v43 = vpop.permute.xlu1 %1092  ;;  %v1902_v18 = vsel %vm1851_vm7, %v1845_v41, %v919_v19  ;;  %v12205_v41 = vld [vmem:[#allocation12_spill] sm:$0xff] }
 0x3b7   :  { %v3843_v48 = vcombine.low %v2998_v38, %v3000_v8  ;;  %5928 = vmatmul.mubr.msk.f32.gmra.mrb[32].mxu1 %vm3961_vm12, %v3841_v22  ;;  %v1263_v29 = vpop.permute.xlu0 %1262  ;;  %v3850_v28 = vrot.slane %v3842_v49, %v7730_v62  ;;  %v1959_v61 = vsel %vm1908_vm8, %v1902_v18, %v1093_v43 }
 0x3b8   :  { %5930 = vmatprep.mubr.msk.f32.mxu1 %vm6074_vm3, %v12008_v34  ;;  %v2015_v55 = vsel %vm1965_vm9, %v1958_v42, %v1263_v29 }
 0x3b9   :  { %v3857_v36 = vrot.slane %v3843_v48, %v7730_v62 }
 0x3ba   :  { %v1265_v5 = vpop.permute.xlu1 %1264 }
 0x3bb   :  { %v1437_v27 = vpop.permute.xlu0 %1436  ;;  %v9467_v20 = vpop.f32.mrb[8].mxu1  ;;  %v3858_v14 = vcombine.low %v3850_v28, %v3857_v36  ;;  %v2016_v49 = vsel %vm1965_vm9, %v1959_v61, %v1265_v5 }
 0x3bc   :  { %v5893_v52 = vpop.f32.mrb[9].mxu1  ;;  %v2072_v24 = vsel %vm2022_vm10, %v2015_v55, %v1437_v27 }
 0x3bd   :  { %5931 = vmatmul.mubr.msk.f32.gmra.mrb[34].mxu1 %vm3961_vm12, %v3858_v14  ;;  %v12203_v52 = vld [vmem:[#allocation153_spill] sm:$0xff] }
 0x3be   :  { %v9480_v25 = vpop.f32.mrb[34].mxu0  ;;  %v1439_v17 = vpop.permute.xlu1 %1438  ;;  %5933 = vmatprep.mubr.msk.f32.mxu1 %vm6074_vm3, %v12008_v34  ;;  %v1732_v13 = vsel %vm1680_vm5, %v9013_v9, %v12203_v52 }
 0x3bf   :  { %v5857_v38 = vpop.f32.mrb[35].mxu0  ;;  %v1611_v3 = vpop.permute.xlu0 %1610  ;;  %v2073_v29 = vsel %vm2022_vm10, %v2016_v49, %v1439_v17  ;;  %v1789_v42 = vsel %vm1737_vm4, %v1732_v13, %v12204_v51 }
 0x3c0   :  { %v2129_v8 = vsel %vm2079_vm11, %v2072_v24, %v1611_v3  ;;  %v1846_v55 = vsel %vm1794_vm6, %v1789_v42, %v12205_v41  ;;  %v12206_v3 = vld [vmem:[#allocation157_spill] sm:$0xff] }
 0x3c1   :  { %v3001_v22 = vcombine.high %v2129_v8, %v2129_v8  ;;  %v3008_v48 = vrot.slane %v2129_v8, %v7730_v62  ;;  %v1733_v9 = vsel %vm1680_vm5, %v9029_v23, %v12206_v3  ;;  %v12207_v8 = vld [vmem:[#allocation199_spill] sm:$0xff] }
 0x3c2   :  { %v1613_v7 = vpop.permute.xlu1 %1612  ;;  %v1790_v49 = vsel %vm1737_vm4, %v1733_v9, %v12207_v8  ;;  %v12210_v8 = vld [vmem:[#allocation198_spill] sm:$0xff] }
 0x3c3   :  { %v3016_v46 = vcombine.high %v3008_v48, %v3008_v48  ;;  %v2130_v28 = vsel %vm2079_vm11, %v2073_v29, %v1613_v7  ;;  %v921_v19 = vpop.permute.xlu0 %920  ;;  %v3015_v36 = vrot.slane %v3001_v22, %v7730_v62  ;;  %v12208_v29 = vld [vmem:[#allocation73_spill] sm:$0xff] }
 0x3c4   :  { %v3024_v50 = vrot.slane %v2130_v28, %v7730_v62  ;;  %v3017_v63 = vcombine.high %v2130_v28, %v2130_v28  ;;  %v1903_v38 = vsel %vm1851_vm7, %v1846_v55, %v921_v19  ;;  %v1847_v7 = vsel %vm1794_vm6, %v1790_v49, %v12208_v29  ;;  %v12211_v29 = vld [vmem:[#allocation15_spill] sm:$0xff] }
 0x3c5   :  { %v3859_v58 = vcombine.low %v3008_v48, %v3016_v46 }
 0x3c6   :  { %v3860_v43 = vcombine.low %v3015_v36, %v3024_v50  ;;  %v923_v6 = vpop.permute.xlu1 %922  ;;  %v3031_v18 = vrot.slane %v3017_v63, %v7730_v62  ;;  %v3032_v24 = vcombine.high %v3024_v50, %v3024_v50 }
 0x3c7   :  { %v1095_v59 = vpop.permute.xlu0 %1094  ;;  %v3867_v5 = vrot.slane %v3859_v58, %v7730_v62  ;;  %v1904_v50 = vsel %vm1851_vm7, %v1847_v7, %v923_v6 }
 0x3c8   :  { %v3874_v27 = vrot.slane %v3860_v43, %v7730_v62  ;;  %v1960_v61 = vsel %vm1908_vm8, %v1903_v38, %v1095_v59  ;;  %v3876_v19 = vcombine.low %v3032_v24, %v3031_v18  ;;  %v3033_v59 = vcombine.high %v3031_v18, %v3031_v18  ;;  %v12209_v24 = vld [vmem:[#allocation156_spill] sm:$0xff] }
 0x3c9   :  { %v1734_v38 = vsel %vm1680_vm5, %v9079_v60, %v12209_v24 }
 0x3ca   :  { %v1097_v14 = vpop.permute.xlu1 %1096  ;;  %v3875_v11 = vcombine.low %v3867_v5, %v3874_v27  ;;  %v1791_v49 = vsel %vm1737_vm4, %v1734_v38, %v12210_v8 }
 0x3cb   :  { %v1267_v16 = vpop.permute.xlu0 %1266  ;;  %v1961_v43 = vsel %vm1908_vm8, %v1904_v50, %v1097_v14  ;;  %v3884_v14 = vrot.slane %v3876_v19, %v7730_v62  ;;  %v1848_v7 = vsel %vm1794_vm6, %v1791_v49, %v12211_v29 }
 0x3cc   :  { %5934 = vmatmul.mubr.msk.f32.gmra.mrb[36].mxu1 %vm3961_vm12, %v3875_v11  ;;  %v2017_v22 = vsel %vm1965_vm9, %v1960_v61, %v1267_v16 }
 0x3cd   :  { %5936 = vmatprep.mubr.msk.f32.mxu1 %vm6074_vm3, %v12008_v34 }
 0x3ce   :  { %v1269_v12 = vpop.permute.xlu1 %1268 }
 0x3cf   :  { %v1441_v17 = vpop.permute.xlu0 %1440  ;;  %v2018_v11 = vsel %vm1965_vm9, %v1961_v43, %v1269_v12 }
 0x3d0   :  { %v2074_v46 = vsel %vm2022_vm10, %v2017_v22, %v1441_v17 }
 0x3d2   :  { %v1443_v48 = vpop.permute.xlu1 %1442 }
 0x3d3   :  { %v1615_v28 = vpop.permute.xlu0 %1614  ;;  %v9518_v36 = vpop.f32.mrb[10].mxu1  ;;  %v2075_v52 = vsel %vm2022_vm10, %v2018_v11, %v1443_v48 }
 0x3d4   :  { %v2131_v23 = vsel %vm2079_vm11, %v2074_v46, %v1615_v28  ;;  %v5896_v58 = vpop.f32.mrb[11].mxu1 }
 0x3d5   :  { %v3034_v5 = vcombine.high %v2131_v23, %v2131_v23  ;;  %v3041_v27 = vrot.slane %v2131_v23, %v7730_v62 }
 0x3d6   :  { %v9525_v16 = vpop.f32.mrb[36].mxu0  ;;  %v1617_v63 = vpop.permute.xlu1 %1616 }
 0x3d7   :  { %v3877_v13 = vcombine.low %v3033_v59, %v3041_v27  ;;  %v5860_v51 = vpop.f32.mrb[37].mxu0  ;;  %v925_v42 = vpop.permute.xlu0 %924  ;;  %v3048_v6 = vrot.slane %v3034_v5, %v7730_v62  ;;  %v3049_v41 = vcombine.high %v3041_v27, %v3041_v27  ;;  %v2132_v55 = vsel %vm2079_vm11, %v2075_v52, %v1617_v63  ;;  %v12213_v63 = vld [vmem:[#allocation159_spill] sm:$0xff] }
 0x3d8   :  { %v3057_v18 = vrot.slane %v2132_v55, %v7730_v62  ;;  %v3050_v3 = vcombine.high %v2132_v55, %v2132_v55  ;;  %v1905_v28 = vsel %vm1851_vm7, %v1848_v7, %v925_v42  ;;  %v1735_v52 = vsel %vm1680_vm5, %v9092_v45, %v12213_v63 }
 0x3d9   :  { %v3891_v17 = vrot.slane %v3877_v13, %v7730_v62  ;;  %v3893_v22 = vcombine.low %v3049_v41, %v3048_v6  ;;  %v12214_v41 = vld [vmem:[#allocation201_spill] sm:$0xff] }
 0x3da   :  { %v1271_v12 = vpop.permute.xlu1 %1270  ;;  %v3065_v48 = vcombine.high %v3057_v18, %v3057_v18  ;;  %v3064_v60 = vrot.slane %v3050_v3, %v7730_v62  ;;  %v1792_v55 = vsel %vm1737_vm4, %v1735_v52, %v12214_v41 }
 0x3db   :  { %v1099_v9 = vpop.permute.xlu0 %1098  ;;  %v3892_v61 = vcombine.low %v3884_v14, %v3891_v17  ;;  %v3901_v58 = vrot.slane %v3893_v22, %v7730_v62  ;;  %v12215_v17 = vld [vmem:[#allocation220_spill] sm:$0xff] }
 0x3dc   :  { %v3894_v46 = vcombine.low %v3057_v18, %v3065_v48  ;;  %v1962_v50 = vsel %vm1908_vm8, %v1905_v28, %v1099_v9  ;;  %v3066_v13 = vcombine.high %v3064_v60, %v3064_v60  ;;  %v1849_v18 = vsel %vm1794_vm6, %v1792_v55, %v12215_v17 }
 0x3dd   :  { %5937 = vmatmul.mubr.msk.f32.gmra.mrb[38].mxu1 %vm3961_vm12, %v3892_v61  ;;  %v2019_v59 = vsel %vm1965_vm9, %v1962_v50, %v1271_v12 }
 0x3de   :  { %v927_v19 = vpop.permute.xlu1 %926  ;;  %5939 = vmatprep.mubr.msk.f32.mxu1 %vm6074_vm3, %v12008_v34  ;;  %v3908_v43 = vrot.slane %v3894_v46, %v7730_v62  ;;  %v3910_v38 = vcombine.low %v3064_v60, %v3066_v13  ;;  %v12218_v13 = vld [vmem:[#allocation80_spill] sm:$0xff] }
 0x3df   :  { %v1445_v23 = vpop.permute.xlu0 %1444  ;;  %v1906_v45 = vsel %vm1851_vm7, %v1849_v18, %v927_v19 }
 0x3e0   :  { %v3909_v11 = vcombine.low %v3901_v58, %v3908_v43  ;;  %v2076_v51 = vsel %vm2022_vm10, %v2019_v59, %v1445_v23  ;;  %v3918_v28 = vrot.slane %v3910_v38, %v7730_v62  ;;  %v12216_v23 = vld [vmem:[#allocation158_spill] sm:$0xff] }
 0x3e1   :  { %v1736_v58 = vsel %vm1680_vm5, %v9186_v40, %v12216_v23 }
 0x3e2   :  { %v9549_v5 = vpop.f32.mrb[12].mxu1  ;;  %v1101_v27 = vpop.permute.xlu1 %1100  ;;  %5940 = vmatmul.mubr.msk.f32.gmra.mrb[40].mxu1 %vm3961_vm12, %v3909_v11  ;;  %v12217_v11 = vld [vmem:[#allocation200_spill] sm:$0xff] }
 0x3e3   :  { %12212 = vst [vmem:[#allocation14_spill] sm:$0xff] %v9549_v5  ;;  %v5899_v42 = vpop.f32.mrb[13].mxu1  ;;  %v1619_v6 = vpop.permute.xlu0 %1618  ;;  %5942 = vmatprep.mubr.msk.f32.mxu1 %vm6074_vm3, %v12008_v34  ;;  %v1963_v3 = vsel %vm1908_vm8, %v1906_v45, %v1101_v27  ;;  %v1793_v63 = vsel %vm1737_vm4, %v1736_v58, %v12217_v11 }
 0x3e4   :  { %v2133_v14 = vsel %vm2079_vm11, %v2076_v51, %v1619_v6  ;;  %v1850_v51 = vsel %vm1794_vm6, %v1793_v63, %v12218_v13  ;;  %v9612_v13 = vld [vmem:[%s11432_s2] ss:$0 sm:$0xff] }
 0x3e5   :  { %v3074_v12 = vrot.slane %v2133_v14, %v7730_v62  ;;  %v3067_v8 = vcombine.high %v2133_v14, %v2133_v14 }
 0x3e6   :  { %v1447_v24 = vpop.permute.xlu1 %1446 }
 0x3e7   :  { %v3082_v9 = vcombine.high %v3074_v12, %v3074_v12  ;;  %v1273_v61 = vpop.permute.xlu0 %1272  ;;  %v3081_v43 = vrot.slane %v3067_v8, %v7730_v62 }
 0x3e8   :  { %v2020_v49 = vsel %vm1965_vm9, %v1963_v3, %v1273_v61 }
 0x3e9   :  { %v3911_v22 = vcombine.low %v3074_v12, %v3082_v9  ;;  %v9567_v48 = vpop.f32.mrb[38].mxu0  ;;  %v2077_v7 = vsel %vm2022_vm10, %v2020_v49, %v1447_v24 }
 0x3ea   :  { %v1621_v29 = vpop.permute.xlu1 %1620  ;;  %v5863_v46 = vpop.f32.mrb[39].mxu0 }
 0x3eb   :  { %v3925_v19 = vrot.slane %v3911_v22, %v7730_v62  ;;  %v2134_v60 = vsel %vm2079_vm11, %v2077_v7, %v1621_v29  ;;  %v929_v50 = vpop.permute.xlu0 %928 }
 0x3ec   :  { %v3083_v59 = vcombine.high %v2134_v60, %v2134_v60  ;;  %v3090_v27 = vrot.slane %v2134_v60, %v7730_v62  ;;  %v1907_v14 = vsel %vm1851_vm7, %v1850_v51, %v929_v50  ;;  %v9620_v51 = vadd.f32 %v9612_v13, %v8514_v35 }
 0x3ed   :  { %v3926_v52 = vcombine.low %v3918_v28, %v3925_v19 }
 0x3ee   :  { %v3097_v42 = vrot.slane %v3083_v59, %v7730_v62  ;;  %v3098_v6 = vcombine.high %v3090_v27, %v3090_v27  ;;  %v3927_v41 = vcombine.low %v3081_v43, %v3090_v27  ;;  %v1275_v55 = vpop.permute.xlu1 %1274 }
 0x3ef   :  { %5943 = vmatmul.mubr.msk.f32.gmra.mrb[42].mxu1 %vm3961_vm12, %v3926_v52  ;;  %v1103_v40 = vpop.permute.xlu0 %1102 }
 0x3f0   :  { %v3928_v17 = vcombine.low %v3098_v6, %v3097_v42  ;;  %v1964_v18 = vsel %vm1908_vm8, %v1907_v14, %v1103_v40  ;;  %5945 = vmatprep.mubr.msk.f32.mxu1 %vm6074_vm3, %v12008_v34  ;;  %v3935_v12 = vrot.slane %v3927_v41, %v7730_v62  ;;  %v3099_v22 = vcombine.high %v3097_v42, %v3097_v42 }
 0x3f1   :  { %v2021_v38 = vsel %vm1965_vm9, %v1964_v18, %v1275_v55  ;;  %v9624_v42 = vadd.f32 %v9612_v13, %v8593_v54  ;;  %v9632_v41 = vadd.f32 %v9612_v13, %v8643_v32  ;;  %v9644_v54 = vadd.f32 %v9612_v13, %v8677_v0 }
 0x3f2   :  { %v3942_v45 = vrot.slane %v3928_v17, %v7730_v62  ;;  %v1623_v24 = vpop.permute.xlu1 %1622  ;;  %v9654_v32 = vadd.f32 %v9612_v13, %v8699_v57  ;;  %v9666_v18 = vadd.f32 %v9612_v13, %v8766_v56 }
 0x3f3   :  { %v1449_v3 = vpop.permute.xlu0 %1448  ;;  %v9640_v35 = vcombine.high %v9624_v42, %v9624_v42  ;;  %v9650_v14 = vcombine.high %v9632_v41, %v9632_v41  ;;  %v9662_v0 = vcombine.high %v9644_v54, %v9644_v54 }
 0x3f4   :  { %v2078_v9 = vsel %vm2022_vm10, %v2021_v38, %v1449_v3  ;;  %v3943_v61 = vcombine.low %v3935_v12, %v3942_v45  ;;  %v9673_v45 = vcombine.high %v9654_v32, %v9654_v32 }
 0x3f5   :  { %v2135_v8 = vsel %vm2079_vm11, %v2078_v9, %v1623_v24  ;;  %v9593_v49 = vpop.f32.mrb[14].mxu1  ;;  %v4523_v17 = vcombine.low %v9624_v42, %v9640_v35  ;;  %v4524_v57 = vcombine.low %v9632_v41, %v9650_v14  ;;  %v9677_v24 = vadd.f32 %v9612_v13, %v8787_v10 }
 0x3f6   :  { %12219 = vst [vmem:[#allocation17_spill] sm:$0xff] %v9593_v49  ;;  %v3100_v29 = vcombine.high %v2135_v8, %v2135_v8  ;;  %v3107_v7 = vrot.slane %v2135_v8, %v7730_v62  ;;  %v5902_v46 = vpop.f32.mrb[15].mxu1  ;;  %5946 = vmatmul.mubr.msk.f32.gmra.mrb[44].mxu1 %vm3961_vm12, %v3943_v61  ;;  %v4525_v9 = vcombine.low %v9644_v54, %v9662_v0 }
 0x3f7   :  { %5948 = vmatprep.mubr.msk.f32.mxu1 %vm6074_vm3, %v12008_v34  ;;  %v4620_v56 = vsel %vm1680_vm5, %v4523_v17, 0.0  ;;  %v9687_v61 = vcombine.high %v9666_v18, %v9666_v18  ;;  %v9691_v8 = vadd.f32 %v9612_v13, %v8859_v39  ;;  %v9698_v46 = vcombine.high %v9677_v24, %v9677_v24 }
 0x3f8   :  { %v3114_v28 = vrot.slane %v3100_v29, %v7730_v62  ;;  %v3115_v19 = vcombine.high %v3107_v7, %v3107_v7  ;;  %v3944_v60 = vcombine.low %v3099_v22, %v3107_v7  ;;  %v4622_v29 = vsel %vm1680_vm5, %v4524_v57, 0.0 }
 0x3f9   :  { %v4526_v7 = vcombine.low %v9654_v32, %v9673_v45  ;;  %v4527_v39 = vcombine.low %v9666_v18, %v9687_v61  ;;  %v9735_v17 = vadd.f32 %v9612_v13, %v9105_v31 }
 0x3fa   :  { %v3945_v50 = vcombine.low %v3115_v19, %v3114_v28  ;;  %v3952_v23 = vrot.slane %v3944_v60, %v7730_v62  ;;  %v9702_v28 = vadd.f32 %v9612_v13, %v8930_v15  ;;  %v4624_v60 = vsel %vm1680_vm5, %v4525_v9, 0.0 }
 0x3fb   :  { %v4528_v15 = vcombine.low %v9677_v24, %v9698_v46 }
 0x3fc   :  { %v3959_v58 = vrot.slane %v3945_v50, %v7730_v62  ;;  %v9616_v62 = vadd.f32 %v9612_v13, %v8537_v53  ;;  %v9636_v53 = vcombine.high %v9620_v51, %v9620_v51  ;;  %v9709_v50 = vcombine.high %v9691_v8, %v9691_v8 }
 0x3fd   :  { %v4630_v57 = vsel %vm1680_vm5, %v4528_v15, 0.0 }
 0x3fe   :  { %v3960_v43 = vcombine.low %v3952_v23, %v3959_v58  ;;  %v9628_v6 = vcombine.high %v9616_v62, %v9616_v62  ;;  %v4521_v40 = vcombine.low %v9620_v51, %v9636_v53  ;;  %v9713_v23 = vadd.f32 %v9612_v13, %v8962_v21 }
 0x3ff   :  { %v4529_v21 = vcombine.low %v9691_v8, %v9709_v50 }
 0x400   :  { %5949 = vmatmul.mubr.msk.f32.gmra.mrb[46].mxu1 %vm3961_vm12, %v3960_v43  ;;  %v4522_v55 = vcombine.low %v9616_v62, %v9628_v6  ;;  %v4617_v38 = vsel %vm1680_vm5, %v4521_v40, 0.0  ;;  %v4626_v43 = vsel %vm1680_vm5, %v4526_v7, 0.0  ;;  %v9731_v40 = vcombine.high %v9713_v23, %v9713_v23 }
 0x401   :  { %v9603_v59 = vpop.f32.mrb[40].mxu0 }
 0x402   :  { %v5866_v27 = vpop.f32.mrb[41].mxu0  ;;  %v4618_v12 = vsel %vm1680_vm5, %v4522_v55, 0.0  ;;  %v4628_v55 = vsel %vm1680_vm5, %v4527_v39, 0.0  ;;  %v4531_v31 = vcombine.low %v9713_v23, %v9731_v40 }
 0x403   :  { %v4619_v10 = vadd.f32 %v4618_v12, %v4617_v38  ;;  %v9720_v27 = vcombine.high %v9702_v28, %v9702_v28 }
 0x405   :  { %v4621_v19 = vadd.f32 %v4620_v56, %v4619_v10  ;;  %v9746_v56 = vadd.f32 %v9612_v13, %v9211_v30  ;;  %v9753_v10 = vcombine.high %v9735_v17, %v9735_v17 }
 0x407   :  { %v4623_v58 = vadd.f32 %v4622_v29, %v4621_v19  ;;  %v9757_v29 = vadd.f32 %v9612_v13, %v9274_v2  ;;  %v9766_v39 = vcombine.high %v9746_v56, %v9746_v56  ;;  %v4636_v2 = vsel %vm1680_vm5, %v4531_v31, 0.0 }
 0x40b   :  { %v9605_v11 = vpop.f32.mrb[42].mxu0 }
 0x40c   :  { %v5869_v63 = vpop.f32.mrb[43].mxu0 }
 0x40d   :  { %v9724_v63 = vadd.f32 %v9612_v13, %v9017_v26  ;;  %v4530_v26 = vcombine.low %v9702_v28, %v9720_v27 }
 0x40e   :  { %v9607_v52 = vpop.f32.mrb[16].mxu1 }
 0x40f   :  { %12220 = vst [vmem:[#allocation77_spill] sm:$0xff] %v9607_v52  ;;  %v5905_v34 = vpop.f32.mrb[17].mxu1  ;;  %v9742_v38 = vcombine.high %v9724_v63, %v9724_v63  ;;  %v4634_v30 = vsel %vm1680_vm5, %v4530_v26, 0.0  ;;  %v4534_v26 = vcombine.low %v9746_v56, %v9766_v39 }
 0x410   :  { %v4625_v34 = vadd.f32 %v4624_v60, %v4623_v58  ;;  %v9770_v58 = vadd.f32 %v9612_v13, %v9395_v47 }
 0x411   :  { %v4532_v60 = vcombine.low %v9724_v63, %v9742_v38 }
 0x412   :  { %v4627_v12 = vadd.f32 %v4626_v43, %v4625_v34  ;;  %v4533_v34 = vcombine.low %v9735_v17, %v9753_v10 }
 0x413   :  { %v4638_v47 = vsel %vm1680_vm5, %v4532_v60, 0.0 }
 0x414   :  { %v4629_v9 = vadd.f32 %v4628_v55, %v4627_v12  ;;  %v9777_v55 = vcombine.high %v9757_v29, %v9757_v29 }
 0x416   :  { %v4631_v7 = vadd.f32 %v4630_v57, %v4629_v9  ;;  %v9788_v9 = vcombine.high %v9770_v58, %v9770_v58 }
 0x421   :  { %v9680_v3 = vpop.f32.mrb[18].mxu1 }
 0x422   :  { %12221 = vst [vmem:[#allocation84_spill] sm:$0xff] %v9680_v3  ;;  %v5908_v22 = vpop.f32.mrb[19].mxu1 }
 0x423   :  { %v4632_v22 = vsel %vm1680_vm5, %v4529_v21, 0.0  ;;  %v9781_v21 = vadd.f32 %v9612_v13, %v9449_v33  ;;  %v4640_v33 = vsel %vm1680_vm5, %v4533_v34, 0.0  ;;  %v9814_v34 = vadd.f32 %v9612_v13, %v9567_v48 }
 0x424   :  { %v4633_v15 = vadd.f32 %v4632_v22, %v4631_v7  ;;  %v9792_v22 = vadd.f32 %v9612_v13, %v9480_v25  ;;  %v4536_v25 = vcombine.low %v9770_v58, %v9788_v9 }
 0x425   :  { %v9799_v60 = vcombine.high %v9781_v21, %v9781_v21  ;;  %12226 = vst [vmem:[#allocation59_spill] sm:$0xff] %v9814_v34 }
 0x426   :  { %v4635_v12 = vadd.f32 %v4634_v30, %v4633_v15  ;;  %12223 = vst [vmem:[#allocation16_spill] sm:$0xff] %v9792_v22  ;;  %v4535_v30 = vcombine.low %v9757_v29, %v9777_v55  ;;  %v4646_v3 = vsel %vm1680_vm5, %v4536_v25, 0.0 }
 0x428   :  { %v4637_v7 = vadd.f32 %v4636_v2, %v4635_v12  ;;  %v9810_v2 = vcombine.high %v9792_v22, %v9792_v22 }
 0x42a   :  { %v4639_v15 = vadd.f32 %v4638_v47, %v4637_v7  ;;  %12225 = vst [vmem:[#allocation30_spill] sm:$0xff] %v9810_v2  ;;  %v4538_v48 = vcombine.low %v9792_v22, %v9810_v2 }
 0x42c   :  { %v4641_v12 = vadd.f32 %v4640_v33, %v4639_v15  ;;  %v9832_v33 = vcombine.high %v9814_v34, %v9814_v34  ;;  %v4650_v49 = vsel %vm1680_vm5, %v4538_v48, 0.0 }
 0x42e   :  { %12229 = vst [vmem:[#allocation32_spill] sm:$0xff] %v9832_v33  ;;  %v4540_v5 = vcombine.low %v9814_v34, %v9832_v33 }
 0x42f   :  { %v9759_v19 = vpop.f32.mrb[20].mxu1 }
 0x430   :  { %12222 = vst [vmem:[#allocation63_spill] sm:$0xff] %v9759_v19  ;;  %v5911_v43 = vpop.f32.mrb[21].mxu1  ;;  %v4642_v19 = vsel %vm1680_vm5, %v4534_v26, 0.0  ;;  %v9825_v26 = vadd.f32 %v9612_v13, %v9603_v59 }
 0x431   :  { %v9803_v43 = vadd.f32 %v9612_v13, %v9525_v16  ;;  %v4537_v16 = vcombine.low %v9781_v21, %v9799_v60  ;;  %v4643_v7 = vadd.f32 %v4642_v19, %v4641_v12 }
 0x432   :  { %12228 = vst [vmem:[#allocation29_spill] sm:$0xff] %v9825_v26  ;;  %v9843_v19 = vcombine.high %v9825_v26, %v9825_v26 }
 0x433   :  { %v4240_v57 = vpop.f32.mrb[44].mxu0  ;;  %12224 = vst [vmem:[#allocation81_spill] sm:$0xff] %v9803_v43  ;;  %v9821_v47 = vcombine.high %v9803_v43, %v9803_v43  ;;  %v4648_v52 = vsel %vm1680_vm5, %v4537_v16, 0.0 }
 0x434   :  { %v5872_v31 = vpop.f32.mrb[45].mxu0  ;;  %12231 = vst [vmem:[#allocation58_spill] sm:$0xff] %v9843_v19  ;;  %v4241_v25 = vadd.f32 %v9612_v13, %v4240_v57  ;;  %v4654_v57 = vsel %vm1680_vm5, %v4540_v5, 0.0 }
 0x435   :  { %v4644_v31 = vsel %vm1680_vm5, %v4535_v30, 0.0  ;;  %12227 = vst [vmem:[#allocation62_spill] sm:$0xff] %v9821_v47  ;;  %v9836_v30 = vadd.f32 %v9612_v13, %v9605_v11  ;;  %v4539_v59 = vcombine.low %v9803_v43, %v9821_v47 }
 0x436   :  { %v4645_v15 = vadd.f32 %v4644_v31, %v4643_v7  ;;  %v4541_v7 = vcombine.low %v9825_v26, %v9843_v19  ;;  %v4445_v43 = vcombine.high %v4241_v25, %v4241_v25 }
 0x437   :  { %12230 = vst [vmem:[#allocation19_spill] sm:$0xff] %v9836_v30  ;;  %v9851_v11 = vcombine.high %v9836_v30, %v9836_v30  ;;  %v4652_v16 = vsel %vm1680_vm5, %v4539_v59, 0.0 }
 0x438   :  { %v4647_v12 = vadd.f32 %v4646_v3, %v4645_v15  ;;  %v4656_v15 = vsel %vm1680_vm5, %v4541_v7, 0.0  ;;  %v4543_v34 = vcombine.low %v4241_v25, %v4445_v43 }
 0x439   :  { %12232 = vst [vmem:[#allocation67_spill] sm:$0xff] %v9851_v11  ;;  %v4542_v3 = vcombine.low %v9836_v30, %v9851_v11 }
 0x43a   :  { %v4649_v31 = vadd.f32 %v4648_v52, %v4647_v12  ;;  %v4660_v26 = vsel %vm1680_vm5, %v4543_v34, 0.0 }
 0x43b   :  { %v4658_v52 = vsel %vm1680_vm5, %v4542_v3, 0.0 }
 0x43c   :  { %v4651_v47 = vadd.f32 %v4650_v49, %v4649_v31 }
 0x43e   :  { %v4653_v48 = vadd.f32 %v4652_v16, %v4651_v47 }
 0x440   :  { %v4655_v33 = vadd.f32 %v4654_v57, %v4653_v48 }
 0x442   :  { %v4657_v2 = vadd.f32 %v4656_v15, %v4655_v33 }
 0x444   :  { %v4659_v31 = vadd.f32 %v4658_v52, %v4657_v2 }
 0x446   :  { %v4661_v16 = vadd.f32 %v4660_v26, %v4659_v31 }
 0x447   :  { %v4245_v22 = vpop.f32.mrb[46].mxu0 }
 0x448   :  { %v4246_v59 = vadd.f32 %v9612_v13, %v4245_v22  ;;  %v5875_v12 = vpop.f32.mrb[47].mxu0 }
 0x44a   :  { %v4446_v49 = vcombine.high %v4246_v59, %v4246_v59 }
 0x44b   :  { %v4250_v5 = vpop.f32.mrb[48].mxu0 }
 0x44c   :  { %v4544_v19 = vcombine.low %v4246_v59, %v4446_v49  ;;  %v9864_v30 = vadd.f32 %v9612_v13, %v4250_v5  ;;  %v5878_v47 = vpop.f32.mrb[49].mxu0 }
 0x44e   :  { %v4662_v7 = vsel %vm1680_vm5, %v4544_v19, 0.0  ;;  %v4665_v22 = vsel %vm4664_vm13, %v9864_v30, 0.0 }
 0x44f   :  { %v4663_v57 = vadd.f32 %v4662_v7, %v4661_v16  ;;  %v9869_v3 = vpop.f32.mrb[22].mxu1 }
 0x450   :  { %v5914_v34 = vpop.f32.mrb[23].mxu1 }
 0x451   :  { %v4666_v33 = vadd.f32 %v4665_v22, %v4663_v57 }
 0x453   :  { %v4667_v48 = vrot.slane %v4666_v33, 4 }
 0x455   :  { %v4668_v2 = vadd.f32 %v4667_v48, %v4666_v33  ;;  %v9892_v33 = vadd.f32 %v9612_v13, %v9161_v4  ;;  %v9915_v4 = vadd.f32 %v9612_v13, %v9387_v1 }
 0x457   :  { %v4669_v15 = vrot.slane %v4668_v2, 2  ;;  %12236 = vst [vmem:[#allocation109_spill] sm:$0xff] %v9892_v33  ;;  %12241 = vst [vmem:[#allocation34_spill] sm:$0xff] %v9915_v4 }
 0x459   :  { %v4670_v52 = vadd.f32 %v4669_v15, %v4668_v2 }
 0x45b   :  { %v4671_v12 = vrot.slane %v4670_v52, 1 }
 0x45d   :  { %v4672_v5 = vadd.f32 %v4671_v12, %v4670_v52 }
 0x45f   :  { %v9873_v31 = vmul.f32 0.0051020407, %v4672_v5 }
 0x460   :  { %v9871_v11 = vpop.f32.mrb[24].mxu1 }
 0x461   :  { %v5917_v26 = vpop.f32.mrb[25].mxu1  ;;  %v9879_v16 = vcombine.high %v9873_v31, %v9873_v31  ;;  %v9882_v7 = vsub.f32 %v4241_v25, %v9873_v31  ;;  %v9888_v22 = vsub.f32 %v4246_v59, %v9873_v31  ;;  %v9899_v48 = vsub.f32 %v9864_v30, %v9873_v31 }
 0x462   :  { %v9903_v25 = vadd.f32 %v9612_v13, %v9287_v44  ;;  %v9911_v59 = vcombine.high %v9892_v33, %v9892_v33  ;;  %v9943_v26 = vadd.f32 %v9612_v13, %v9467_v20 }
 0x463   :  { %12233 = vst [vmem:[#allocation88_spill] sm:$0xff] %v9882_v7  ;;  %v9885_v57 = vsub.f32 %v4445_v43, %v9879_v16  ;;  %12235 = vst [vmem:[#allocation31_spill] sm:$0xff] %v9888_v22  ;;  %v9895_v34 = vsub.f32 %v4446_v49, %v9879_v16  ;;  %v9907_v43 = vadd.f32 %v9612_v13, %v9355_v37 }
 0x464   :  { %12238 = vst [vmem:[#allocation18_spill] sm:$0xff] %v9903_v25  ;;  %12240 = vst [vmem:[#allocation70_spill] sm:$0xff] %v9911_v59  ;;  %v9919_v49 = vcombine.high %v9903_v25, %v9903_v25  ;;  %v4546_v44 = vcombine.low %v9911_v59, %v9903_v25  ;;  %v9931_v15 = vsub.f32 %v9636_v53, %v9879_v16 }
 0x465   :  { %v9875_v19 = vpop.f32.mrb[26].mxu1  ;;  %12234 = vst [vmem:[#allocation66_spill] sm:$0xff] %v9885_v57  ;;  %12237 = vst [vmem:[#allocation71_spill] sm:$0xff] %v9895_v34  ;;  %v9927_v37 = vcombine.high %v9907_v43, %v9907_v43  ;;  %v9937_v12 = vsub.f32 %v9628_v6, %v9879_v16  ;;  %v9951_v53 = vsub.f32 %v9616_v62, %v9873_v31 }
 0x466   :  { %v5920_v47 = vpop.f32.mrb[27].mxu1  ;;  %12239 = vst [vmem:[#allocation85_spill] sm:$0xff] %v9907_v43  ;;  %12242 = vst [vmem:[#allocation21_spill] sm:$0xff] %v9919_v49  ;;  %v4547_v1 = vcombine.low %v9919_v49, %v9907_v43  ;;  %v9958_v6 = vsel %vm1680_vm5, %v4546_v44, 0.0  ;;  %v4836_v20 = vmul.f32 %v9931_v15, %v9931_v15  ;;  %v9971_v62 = vsub.f32 %v9624_v42, %v9873_v31 }
 0x467   :  { %12243 = vst [vmem:[#allocation75_spill] sm:$0xff] %v9927_v37  ;;  %12244 = vst [vmem:[#allocation92_spill] sm:$0xff] %v9931_v15  ;;  %v4548_v5 = vcombine.low %v9927_v37, %v9915_v4  ;;  %v9947_v47 = vsub.f32 %v9620_v51, %v9873_v31  ;;  %v9962_v37 = vcombine.high %v9915_v4, %v9915_v4 }
 0x468   :  { %12245 = vst [vmem:[#allocation115_spill] sm:$0xff] %v9937_v12  ;;  %12246 = vst [vmem:[#allocation74_spill] sm:$0xff] %v9943_v26  ;;  %v9967_v51 = vsel %vm1680_vm5, %v4547_v1, 0.0  ;;  %v4838_v44 = vmul.f32 %v9937_v12, %v9937_v12  ;;  %v9984_v49 = vcombine.high %v9943_v26, %v9943_v26  ;;  %v4837_v59 = vmul.f32 %v9951_v53, %v9951_v53 }
 0x469   :  { %12248 = vst [vmem:[#allocation79_spill] sm:$0xff] %v9962_v37  ;;  %v9980_v4 = vsel %vm1680_vm5, %v4548_v5, 0.0  ;;  %v4549_v1 = vcombine.low %v9962_v37, %v9943_v26  ;;  %v4835_v42 = vmul.f32 %v9947_v47, %v9947_v47  ;;  %v9998_v5 = vsub.f32 %v9662_v0, %v9879_v16 }
 0x46a   :  { %12250 = vst [vmem:[#allocation20_spill] sm:$0xff] %v9984_v49  ;;  %v10006_v26 = vsub.f32 %v9644_v54, %v9873_v31  ;;  %v10010_v12 = vmul.f32 %v9885_v57, %v9885_v57  ;;  %v10018_v15 = vsub.f32 %v9673_v45, %v9879_v16  ;;  %v10026_v57 = vsub.f32 %v9654_v32, %v9873_v31 }
 0x46b   :  { %12252 = vst [vmem:[#allocation78_spill] sm:$0xff] %v9998_v5  ;;  %v5029_v0 = vcombine.low %v4835_v42, %v4836_v20  ;;  %v10034_v20 = vmul.f32 %v9882_v7, %v9882_v7  ;;  %v10038_v45 = vmul.f32 %v9888_v22, %v9888_v22  ;;  %v10042_v42 = vsub.f32 %v9687_v61, %v9879_v16 }
 0x46c   :  { %v4845_v7 = vmul.f32 %v10026_v57, %v10026_v57 }
 0x46d   :  { %v5125_v61 = vsel %vm1680_vm5, %v5029_v0, 0.0  ;;  %v10072_v0 = vsub.f32 %v9709_v50, %v9879_v16  ;;  %v10088_v50 = vsub.f32 %v9720_v27, %v9879_v16  ;;  %v10103_v27 = vsub.f32 %v9731_v40, %v9879_v16 }
 0x46e   :  { %v10120_v40 = vsub.f32 %v9742_v38, %v9879_v16  ;;  %v10134_v38 = vsub.f32 %v9753_v10, %v9879_v16  ;;  %v10149_v10 = vsub.f32 %v9735_v17, %v9873_v31  ;;  %v10163_v17 = vsub.f32 %v9746_v56, %v9873_v31 }
 0x46f   :  { %12254 = vst [vmem:[#allocation89_spill] sm:$0xff] %v10088_v50  ;;  %12255 = vst [vmem:[#allocation83_spill] sm:$0xff] %v10103_v27  ;;  %v10178_v56 = vsub.f32 %v9757_v29, %v9873_v31  ;;  %v10194_v29 = vsub.f32 %v9770_v58, %v9873_v31  ;;  %v10208_v58 = vsub.f32 %v9781_v21, %v9873_v31 }
 0x471   :  { %12260 = vst [vmem:[#allocation160_spill] sm:$0xff] %v10194_v29  ;;  %12262 = vst [vmem:[#allocation35_spill] sm:$0xff] %v10208_v58 }
 0x472   :  { %v9921_v2 = vpop.f32.mrb[28].mxu1 }
 0x473   :  { %v5923_v52 = vpop.f32.mrb[29].mxu1 }
 0x474   :  { %v9955_v52 = vsub.f32 %v9640_v35, %v9879_v16  ;;  %v9975_v35 = vsub.f32 %v9650_v14, %v9879_v16  ;;  %v9994_v14 = vsub.f32 %v9632_v41, %v9873_v31  ;;  %v10014_v41 = vmul.f32 %v9895_v34, %v9895_v34 }
 0x475   :  { %v10030_v34 = vsub.f32 %v9666_v18, %v9873_v31 }
 0x476   :  { %12247 = vst [vmem:[#allocation33_spill] sm:$0xff] %v9955_v52  ;;  %12249 = vst [vmem:[#allocation112_spill] sm:$0xff] %v9975_v35  ;;  %v4840_v25 = vmul.f32 %v9955_v52, %v9955_v52  ;;  %v4842_v54 = vmul.f32 %v9975_v35, %v9975_v35  ;;  %v5030_v52 = vcombine.low %v4837_v59, %v4838_v44 }
 0x477   :  { %12251 = vst [vmem:[#allocation36_spill] sm:$0xff] %v9994_v14  ;;  %v4841_v32 = vmul.f32 %v9994_v14, %v9994_v14  ;;  %v4844_v59 = vmul.f32 %v9998_v5, %v9998_v5  ;;  %v10050_v44 = vsub.f32 %v9698_v46, %v9879_v16  ;;  %v4843_v35 = vmul.f32 %v10006_v26, %v10006_v26 }
 0x478   :  { %v4846_v14 = vmul.f32 %v10018_v15, %v10018_v15  ;;  %v10064_v46 = vcombine.high %v9864_v30, %v9864_v30  ;;  %v10080_v30 = vsel %vm1680_vm5, %v4549_v1, 0.0 }
 0x479   :  { %v9990_v43 = vpop.f32.mrb[30].mxu1  ;;  %v5032_v5 = vcombine.low %v4841_v32, %v4842_v54  ;;  %v4848_v54 = vmul.f32 %v10042_v42, %v10042_v42 }
 0x47a   :  { %v5926_v37 = vpop.f32.mrb[31].mxu1  ;;  %12253 = vst [vmem:[#allocation119_spill] sm:$0xff] %v10064_v46  ;;  %v4545_v1 = vcombine.low %v10064_v46, %v9892_v33  ;;  %v10112_v46 = vadd.f32 %v9612_v13, %v9518_v36  ;;  %v4856_v33 = vmul.f32 %v10103_v27, %v10103_v27 }
 0x47b   :  { %v4839_v37 = vmul.f32 %v9971_v62, %v9971_v62 }
 0x47c   :  { %12256 = vst [vmem:[#allocation23_spill] sm:$0xff] %v10112_v46  ;;  %v4673_v36 = vsel %vm1680_vm5, %v4545_v1, 0.0  ;;  %v10153_v1 = vsub.f32 %v9766_v39, %v9879_v16  ;;  %v10167_v39 = vsub.f32 %v9777_v55, %v9879_v16  ;;  %v10182_v55 = vsub.f32 %v9788_v9, %v9879_v16 }
 0x47d   :  { %v5031_v18 = vcombine.low %v4839_v37, %v4840_v25  ;;  %v5126_v25 = vsel %vm1680_vm5, %v5030_v52, 0.0  ;;  %v10068_v37 = vsub.f32 %v9677_v24, %v9873_v31  ;;  %v5033_v52 = vcombine.low %v4843_v35, %v4844_v59 }
 0x47e   :  { %v5127_v22 = vadd.f32 %v5126_v25, %v5125_v61  ;;  %v10084_v24 = vsub.f32 %v9691_v8, %v9873_v31  ;;  %v4847_v25 = vmul.f32 %v10030_v34, %v10030_v34  ;;  %v4850_v35 = vmul.f32 %v10050_v44, %v10050_v44  ;;  %12258 = vst [vmem:[#allocation82_spill] sm:$0xff] %v10167_v39 }
 0x47f   :  { %v5128_v32 = vsel %vm1680_vm5, %v5031_v18, 0.0  ;;  %v5034_v59 = vcombine.low %v4845_v7, %v4846_v14  ;;  %v5130_v18 = vsel %vm1680_vm5, %v5032_v5, 0.0  ;;  %v10099_v8 = vsub.f32 %v9702_v28, %v9873_v31  ;;  %12259 = vst [vmem:[#allocation215_spill] sm:$0xff] %v10182_v55 }
 0x480   :  { %v5129_v61 = vadd.f32 %v5128_v32, %v5127_v22  ;;  %v4849_v32 = vmul.f32 %v10068_v37, %v10068_v37  ;;  %v4852_v7 = vmul.f32 %v10072_v0, %v10072_v0  ;;  %v5035_v14 = vcombine.low %v4847_v25, %v4848_v54 }
 0x481   :  { %v5132_v5 = vsel %vm1680_vm5, %v5033_v52, 0.0  ;;  %v10116_v28 = vsub.f32 %v9713_v23, %v9873_v31  ;;  %v4854_v54 = vmul.f32 %v10088_v50, %v10088_v50  ;;  %v5134_v25 = vsel %vm1680_vm5, %v5034_v59, 0.0 }
 0x482   :  { %v5131_v22 = vadd.f32 %v5130_v18, %v5129_v61  ;;  %v4851_v18 = vmul.f32 %v10084_v24, %v10084_v24  ;;  %v5036_v52 = vcombine.low %v4849_v32, %v4850_v35  ;;  %v10130_v23 = vsub.f32 %v9724_v63, %v9873_v31 }
 0x483   :  { %v5136_v59 = vsel %vm1680_vm5, %v5035_v14, 0.0  ;;  %v10145_v63 = vcombine.high %v10112_v46, %v10112_v46  ;;  %v4858_v14 = vmul.f32 %v10120_v40, %v10120_v40  ;;  %v4675_v50 = vadd.f32 %v9958_v6, %v4673_v36 }
 0x484   :  { %v5133_v61 = vadd.f32 %v5132_v5, %v5131_v22  ;;  %v4853_v5 = vmul.f32 %v10099_v8, %v10099_v8  ;;  %v5037_v35 = vcombine.low %v4851_v18, %v4852_v7  ;;  %v4855_v7 = vmul.f32 %v10116_v28, %v10116_v28 }
 0x485   :  { %12257 = vst [vmem:[#allocation96_spill] sm:$0xff] %v10145_v63  ;;  %v5138_v27 = vsel %vm1680_vm5, %v5036_v52, 0.0  ;;  %v4550_v6 = vcombine.low %v9984_v49, %v10112_v46  ;;  %v4859_v36 = vmul.f32 %v10149_v10, %v10149_v10  ;;  %v10198_v9 = vsub.f32 %v9799_v60, %v9879_v16  ;;  %v12263_v60 = vld [vmem:[#allocation30_spill] sm:$0xff] }
 0x486   :  { %v5135_v22 = vadd.f32 %v5134_v25, %v5133_v61  ;;  %v5038_v18 = vcombine.low %v4853_v5, %v4854_v54  ;;  %v5039_v54 = vcombine.low %v4855_v7, %v4856_v33  ;;  %v5140_v52 = vsel %vm1680_vm5, %v5037_v35, 0.0  ;;  %v12267_v46 = vld [vmem:[#allocation62_spill] sm:$0xff] }
 0x487   :  { %v4862_v33 = vmul.f32 %v10153_v1, %v10153_v1  ;;  %v4677_v7 = vadd.f32 %v9967_v51, %v4675_v50  ;;  %12261 = vst [vmem:[#allocation2_spill] sm:$0xff] %v10198_v9  ;;  %v4861_v49 = vmul.f32 %v10163_v17, %v10163_v17  ;;  %v4682_v51 = vsel %vm1680_vm5, %v4550_v6, 0.0 }
 0x488   :  { %v5137_v61 = vadd.f32 %v5136_v59, %v5135_v22  ;;  %v4857_v59 = vmul.f32 %v10130_v23, %v10130_v23  ;;  %v5142_v35 = vsel %vm1680_vm5, %v5038_v18, 0.0  ;;  %v10212_v50 = vsub.f32 %v12263_v60, %v9879_v16 }
 0x489   :  { %v4679_v6 = vadd.f32 %v9980_v4, %v4677_v7  ;;  %v10226_v60 = vsub.f32 %v12267_v46, %v9879_v16  ;;  %v12271_v7 = vld [vmem:[#allocation81_spill] sm:$0xff]  ;;  %v12272_v46 = vld [vmem:[#allocation32_spill] sm:$0xff] }
 0x48a   :  { %v10141_v32 = vpop.f32.mrb[32].mxu1  ;;  %v5139_v22 = vadd.f32 %v5138_v27, %v5137_v61  ;;  %v5040_v5 = vcombine.low %v4857_v59, %v4858_v14  ;;  %v4864_v14 = vmul.f32 %v10167_v39, %v10167_v39  ;;  %v5144_v59 = vsel %vm1680_vm5, %v5039_v54, 0.0  ;;  %12264 = vst [vmem:[#allocation22_spill] sm:$0xff] %v10212_v50  ;;  %v12274_v39 = vld [vmem:[#allocation58_spill] sm:$0xff] }
 0x48b   :  { %v5929_v25 = vpop.f32.mrb[33].mxu1  ;;  %12268 = vst [vmem:[#allocation93_spill] sm:$0xff] %v10226_v60 }
 0x48c   :  { %v4860_v25 = vmul.f32 %v10134_v38, %v10134_v38  ;;  %v5141_v27 = vadd.f32 %v5140_v52, %v5139_v22  ;;  %v5146_v54 = vsel %vm1680_vm5, %v5040_v5, 0.0  ;;  %v12269_v5 = vld [vmem:[#allocation14_spill] sm:$0xff] }
 0x48d   :  { %v10235_v4 = vadd.f32 %v9612_v13, %v12269_v5  ;;  %v4681_v5 = vadd.f32 %v10080_v30, %v4679_v6 }
 0x48e   :  { %v5143_v22 = vadd.f32 %v5142_v35, %v5141_v27  ;;  %v5041_v18 = vcombine.low %v4859_v36, %v4860_v25  ;;  %v4863_v35 = vmul.f32 %v10178_v56, %v10178_v56  ;;  %v5042_v25 = vcombine.low %v4861_v49, %v4862_v33  ;;  %v12265_v36 = vld [vmem:[#allocation16_spill] sm:$0xff] }
 0x48f   :  { %v10222_v21 = vsub.f32 %v12265_v36, %v9873_v31  ;;  %12270 = vst [vmem:[#allocation87_spill] sm:$0xff] %v10235_v4  ;;  %v10239_v36 = vsub.f32 %v12271_v7, %v9873_v31  ;;  %v4551_v30 = vcombine.low %v10145_v63, %v10235_v4 }
 0x490   :  { %v10189_v61 = vpop.f32.mrb[34].mxu1  ;;  %v5145_v27 = vadd.f32 %v5144_v59, %v5143_v22  ;;  %v4865_v59 = vmul.f32 %v10194_v29, %v10194_v29  ;;  %v5043_v49 = vcombine.low %v4863_v35, %v4864_v14  ;;  %v5148_v33 = vsel %vm1680_vm5, %v5041_v18, 0.0 }
 0x491   :  { %v5932_v52 = vpop.f32.mrb[35].mxu1  ;;  %12266 = vst [vmem:[#allocation116_spill] sm:$0xff] %v10222_v21  ;;  %v4867_v29 = vmul.f32 %v10208_v58, %v10208_v58  ;;  %v4870_v14 = vmul.f32 %v10212_v50, %v10212_v50  ;;  %v5150_v35 = vsel %vm1680_vm5, %v5042_v25, 0.0  ;;  %v4872_v50 = vmul.f32 %v10226_v60, %v10226_v60  ;;  %v12278_v60 = vld [vmem:[#allocation17_spill] sm:$0xff] }
 0x492   :  { %v4866_v52 = vmul.f32 %v10182_v55, %v10182_v55  ;;  %v5147_v22 = vadd.f32 %v5146_v54, %v5145_v27  ;;  %v4868_v55 = vmul.f32 %v10198_v9, %v10198_v9  ;;  %v10243_v27 = vsub.f32 %v12272_v46, %v9879_v16  ;;  %v12273_v9 = vld [vmem:[#allocation59_spill] sm:$0xff] }
 0x493   :  { %v10253_v7 = vsub.f32 %v12273_v9, %v9873_v31  ;;  %v10257_v46 = vsub.f32 %v12274_v39, %v9879_v16  ;;  %v5152_v25 = vsel %vm1680_vm5, %v5043_v49, 0.0  ;;  %v12275_v9 = vld [vmem:[#allocation29_spill] sm:$0xff]  ;;  %v12276_v39 = vld [vmem:[#allocation67_spill] sm:$0xff]  ;;  %v10281_v63 = vadd.f32 %v9612_v13, %v12278_v60 }
 0x494   :  { %v5149_v54 = vadd.f32 %v5148_v33, %v5147_v22  ;;  %v5044_v18 = vcombine.low %v4865_v59, %v4866_v52  ;;  %v4869_v33 = vmul.f32 %v10222_v21, %v10222_v21  ;;  %v5045_v52 = vcombine.low %v4867_v29, %v4868_v55  ;;  %v12280_v21 = vld [vmem:[#allocation19_spill] sm:$0xff] }
 0x495   :  { %v10268_v6 = vsub.f32 %v12275_v9, %v9873_v31  ;;  %v10272_v59 = vsub.f32 %v12276_v39, %v9879_v16  ;;  %v4874_v55 = vmul.f32 %v10243_v27, %v10243_v27  ;;  %12279 = vst [vmem:[#allocation111_spill] sm:$0xff] %v10281_v63  ;;  %v4683_v9 = vadd.f32 %v4682_v51, %v4681_v5 }
 0x496   :  { %v5151_v22 = vadd.f32 %v5150_v35, %v5149_v54  ;;  %v4871_v35 = vmul.f32 %v10239_v36, %v10239_v36  ;;  %v5046_v29 = vcombine.low %v4869_v33, %v4870_v14  ;;  %v5154_v49 = vsel %vm1680_vm5, %v5044_v18, 0.0 }
 0x497   :  { %12277 = vst [vmem:[#allocation218_spill] sm:$0xff] %v10272_v59  ;;  %v10285_v58 = vsub.f32 %v12280_v21, %v9873_v31  ;;  %v5156_v14 = vsel %vm1680_vm5, %v5045_v52, 0.0  ;;  %v10294_v18 = vcombine.high %v10235_v4, %v10235_v4  ;;  %v4875_v31 = vmul.f32 %v10268_v6, %v10268_v6 }
 0x498   :  { %v5153_v54 = vadd.f32 %v5152_v25, %v5151_v22  ;;  %v4873_v22 = vmul.f32 %v10253_v7, %v10253_v7  ;;  %v4876_v25 = vmul.f32 %v10257_v46, %v10257_v46  ;;  %v5047_v39 = vcombine.low %v4871_v35, %v4872_v50  ;;  %v12282_v35 = vld [vmem:[#allocation77_spill] sm:$0xff] }
 0x499   :  { %12281 = vst [vmem:[#allocation38_spill] sm:$0xff] %v10294_v18  ;;  %v4878_v21 = vmul.f32 %v10272_v59, %v10272_v59  ;;  %v5158_v33 = vsel %vm1680_vm5, %v5046_v29, 0.0  ;;  %v4684_v50 = vsel %vm1680_vm5, %v4551_v30, 0.0  ;;  %v4552_v52 = vcombine.low %v10294_v18, %v10281_v63 }
 0x49a   :  { %v5155_v16 = vadd.f32 %v5154_v49, %v5153_v54  ;;  %v5048_v5 = vcombine.low %v4873_v22, %v4874_v55  ;;  %v10308_v49 = vadd.f32 %v9612_v13, %v12282_v35  ;;  %v5049_v4 = vcombine.low %v4875_v31, %v4876_v25 }
 0x49b   :  { %v5160_v59 = vsel %vm1680_vm5, %v5047_v39, 0.0  ;;  %v4685_v55 = vadd.f32 %v4684_v50, %v4683_v9  ;;  %v10315_v29 = vcombine.high %v10281_v63, %v10281_v63  ;;  %v4686_v18 = vsel %vm1680_vm5, %v4552_v52, 0.0  ;;  %v12288_v52 = vld [vmem:[#allocation63_spill] sm:$0xff] }
 0x49c   :  { %v5157_v60 = vadd.f32 %v5156_v14, %v5155_v16  ;;  %12283 = vst [vmem:[#allocation162_spill] sm:$0xff] %v10308_v49  ;;  %v4877_v14 = vmul.f32 %v10285_v58, %v10285_v58  ;;  %v5164_v9 = vsel %vm1680_vm5, %v5049_v4, 0.0  ;;  %v10328_v31 = vcombine.high %v10308_v49, %v10308_v49 }
 0x49d   :  { %12284 = vst [vmem:[#allocation175_spill] sm:$0xff] %v10315_v29  ;;  %v4687_v39 = vadd.f32 %v4686_v18, %v4685_v55  ;;  %v4883_v4 = vmul.f32 %v9899_v48, %v9899_v48  ;;  %v12290_v18 = vcombine.low %v10034_v20, %v10010_v12  ;;  %v10357_v12 = vadd.f32 %v9612_v13, %v9869_v3 }
 0x49e   :  { %v5159_v16 = vadd.f32 %v5158_v33, %v5157_v60  ;;  %v5050_v22 = vcombine.low %v4877_v14, %v4878_v21  ;;  %v4553_v60 = vcombine.low %v10315_v29, %v10308_v49  ;;  %v12285_v33 = vld [vmem:[#allocation84_spill] sm:$0xff]  ;;  %12287 = vst [vmem:[#allocation4_spill] sm:$0xff] %v10328_v31 }
 0x49f   :  { %v10296_v51 = vpop.f32.mrb[36].mxu1  ;;  %v10323_v35 = vadd.f32 %v9612_v13, %v12285_v33  ;;  %v5168_v55 = vsel %vm1680_vm5, %v12290_v18, 0.0  ;;  %12293 = vst [vmem:[#allocation100_spill] sm:$0xff] %v10357_v12  ;;  %v5172_v20 = vsel %vm4664_vm13, %v4883_v4, 0.0 }
 0x4a0   :  { %v5935_v54 = vpop.f32.mrb[37].mxu1  ;;  %v5161_v30 = vadd.f32 %v5160_v59, %v5159_v16  ;;  %v5166_v21 = vsel %vm1680_vm5, %v5050_v22, 0.0  ;;  %v10336_v16 = vadd.f32 %v9612_v13, %v12288_v52 }
 0x4a1   :  { %v5162_v54 = vsel %vm1680_vm5, %v5048_v5, 0.0  ;;  %12286 = vst [vmem:[#allocation26_spill] sm:$0xff] %v10323_v35  ;;  %v4688_v5 = vsel %vm1680_vm5, %v4553_v60, 0.0  ;;  %v4554_v50 = vcombine.low %v10328_v31, %v10323_v35  ;;  %v10346_v22 = vcombine.high %v10323_v35, %v10323_v35 }
 0x4a2   :  { %v5163_v25 = vadd.f32 %v5162_v54, %v5161_v30  ;;  %12289 = vst [vmem:[#allocation202_spill] sm:$0xff] %v10336_v16  ;;  %v4689_v30 = vadd.f32 %v4688_v5, %v4687_v39  ;;  %v12292_v60 = vcombine.low %v10038_v45, %v10014_v41 }
 0x4a3   :  { %12291 = vst [vmem:[#allocation123_spill] sm:$0xff] %v10346_v22 }
 0x4a4   :  { %v5165_v59 = vadd.f32 %v5164_v9, %v5163_v25  ;;  %v5170_v33 = vsel %vm1680_vm5, %v12292_v60, 0.0  ;;  %v4690_v25 = vsel %vm1680_vm5, %v4554_v50, 0.0  ;;  %v4555_v9 = vcombine.low %v10346_v22, %v10336_v16 }
 0x4a5   :  { %v4691_v39 = vadd.f32 %v4690_v25, %v4689_v30  ;;  %v10377_v30 = vadd.f32 %v9612_v13, %v9875_v19 }
 0x4a6   :  { %v5167_v14 = vadd.f32 %v5166_v21, %v5165_v59  ;;  %v10362_v21 = vcombine.high %v10336_v16, %v10336_v16  ;;  %v4692_v5 = vsel %vm1680_vm5, %v4555_v9, 0.0  ;;  %v12336_v16 = vld [vmem:[#allocation93_spill] sm:$0xff] }
 0x4a7   :  { %v4693_v18 = vadd.f32 %v4692_v5, %v4691_v39  ;;  %12297 = vst [vmem:[#allocation86_spill] sm:$0xff] %v10377_v30  ;;  %v10406_v5 = vadd.f32 %v9612_v13, %v10141_v32  ;;  %v10420_v32 = vadd.f32 %v9612_v13, %v10189_v61 }
 0x4a8   :  { %v5169_v54 = vadd.f32 %v5168_v55, %v5167_v14  ;;  %12294 = vst [vmem:[#allocation110_spill] sm:$0xff] %v10362_v21  ;;  %v4556_v52 = vcombine.low %v10362_v21, %v10357_v12  ;;  %v10369_v14 = vadd.f32 %v9612_v13, %v9871_v11  ;;  %v10373_v55 = vcombine.high %v10357_v12, %v10357_v12  ;;  %v12334_v21 = vld [vmem:[#allocation116_spill] sm:$0xff] }
 0x4a9   :  { %12303 = vst [vmem:[#allocation91_spill] sm:$0xff] %v10406_v5  ;;  %12305 = vst [vmem:[#allocation164_spill] sm:$0xff] %v10420_v32  ;;  %v10436_v61 = vcombine.high %v10420_v32, %v10420_v32 }
 0x4aa   :  { %v5171_v59 = vadd.f32 %v5170_v33, %v5169_v54  ;;  %12295 = vst [vmem:[#allocation174_spill] sm:$0xff] %v10369_v14  ;;  %12296 = vst [vmem:[#allocation68_spill] sm:$0xff] %v10373_v55  ;;  %v10381_v54 = vadd.f32 %v9612_v13, %v9921_v2  ;;  %v4694_v33 = vsel %vm1680_vm5, %v4556_v52, 0.0  ;;  %v10386_v11 = vcombine.high %v10369_v14, %v10369_v14 }
 0x4ab   :  { %v4557_v25 = vcombine.low %v10373_v55, %v10369_v14  ;;  %v4695_v9 = vadd.f32 %v4694_v33, %v4693_v18  ;;  %v10396_v2 = vcombine.high %v10377_v30, %v10377_v30  ;;  %12308 = vst [vmem:[#allocation40_spill] sm:$0xff] %v10436_v61  ;;  %v12332_v55 = vld [vmem:[#allocation35_spill] sm:$0xff]  ;;  %v12333_v14 = vld [vmem:[#allocation2_spill] sm:$0xff] }
 0x4ac   :  { %v5173_v41 = vadd.f32 %v5172_v20, %v5171_v59  ;;  %12298 = vst [vmem:[#allocation221_spill] sm:$0xff] %v10381_v54  ;;  %12299 = vst [vmem:[#allocation37_spill] sm:$0xff] %v10386_v11  ;;  %v10392_v59 = vadd.f32 %v9612_v13, %v9990_v43  ;;  %v4558_v20 = vcombine.low %v10386_v11, %v10377_v30  ;;  %v12331_v30 = vld [vmem:[#allocation215_spill] sm:$0xff] }
 0x4ad   :  { %12301 = vst [vmem:[#allocation24_spill] sm:$0xff] %v10396_v2  ;;  %v4696_v52 = vsel %vm1680_vm5, %v4557_v25, 0.0 }
 0x4ae   :  { %v5174_v50 = vrot.slane %v5173_v41, 4  ;;  %12300 = vst [vmem:[#allocation161_spill] sm:$0xff] %v10392_v59  ;;  %v4697_v18 = vadd.f32 %v4696_v52, %v4695_v9  ;;  %v4698_v11 = vsel %vm1680_vm5, %v4558_v20, 0.0  ;;  %v10427_v52 = vcombine.high %v10406_v5, %v10406_v5 }
 0x4b0   :  { %v4350_v45 = vpop.f32.mrb[38].mxu1  ;;  %v5175_v4 = vadd.f32 %v5174_v50, %v5173_v41  ;;  %v10402_v41 = vcombine.high %v10381_v54, %v10381_v54  ;;  %12306 = vst [vmem:[#allocation97_spill] sm:$0xff] %v10427_v52 }
 0x4b1   :  { %v5938_v3 = vpop.f32.mrb[39].mxu1 }
 0x4b2   :  { %v5176_v60 = vrot.slane %v5175_v4, 2  ;;  %12302 = vst [vmem:[#allocation3_spill] sm:$0xff] %v10402_v41  ;;  %v4559_v3 = vcombine.low %v10396_v2, %v10381_v54 }
 0x4b4   :  { %v5177_v19 = vadd.f32 %v5176_v60, %v5175_v4  ;;  %v10413_v4 = vcombine.high %v10392_v59, %v10392_v59  ;;  %v4560_v60 = vcombine.low %v10402_v41, %v10392_v59  ;;  %v4700_v9 = vsel %vm1680_vm5, %v4559_v3, 0.0 }
 0x4b5   :  { %v4355_v39 = vpop.f32.mrb[40].mxu1  ;;  %v10431_v41 = vadd.f32 %v9612_v13, %v10296_v51  ;;  %v10441_v3 = vadd.f32 %v9612_v13, %v4350_v45 }
 0x4b6   :  { %v5941_v50 = vpop.f32.mrb[41].mxu1  ;;  %v5178_v43 = vrot.slane %v5177_v19, 1  ;;  %12304 = vst [vmem:[#allocation120_spill] sm:$0xff] %v10413_v4  ;;  %v4561_v25 = vcombine.low %v10413_v4, %v10406_v5  ;;  %v4702_v20 = vsel %vm1680_vm5, %v4560_v60, 0.0 }
 0x4b7   :  { %12307 = vst [vmem:[#allocation6_spill] sm:$0xff] %v10431_v41  ;;  %12309 = vst [vmem:[#allocation114_spill] sm:$0xff] %v10441_v3  ;;  %v10446_v51 = vcombine.high %v10431_v41, %v10431_v41 }
 0x4b8   :  { %v5179_v33 = vadd.f32 %v5178_v43, %v5177_v19  ;;  %v4699_v19 = vadd.f32 %v4698_v11, %v4697_v18  ;;  %v4704_v5 = vsel %vm1680_vm5, %v4561_v25, 0.0  ;;  %v4563_v11 = vcombine.low %v10436_v61, %v10431_v41 }
 0x4b9   :  { %12310 = vst [vmem:[#allocation177_spill] sm:$0xff] %v10446_v51  ;;  %v10451_v18 = vadd.f32 %v9612_v13, %v4355_v39  ;;  %v4564_v45 = vcombine.low %v10446_v51, %v10441_v3  ;;  %v10462_v61 = vcombine.high %v10441_v3, %v10441_v3 }
 0x4ba   :  { %v5235_v50 = vmul.f32 0.0051020407, %v5179_v33  ;;  %v4562_v33 = vcombine.low %v10427_v52, %v10420_v32  ;;  %v4701_v4 = vadd.f32 %v4700_v9, %v4699_v19 }
 0x4bb   :  { %12311 = vst [vmem:[#allocation204_spill] sm:$0xff] %v10451_v18  ;;  %12313 = vst [vmem:[#allocation28_spill] sm:$0xff] %v10462_v61  ;;  %v10466_v39 = vcombine.high %v10451_v18, %v10451_v18 }
 0x4bc   :  { %v5237_v43 = vadd.f32 1e-05, %v5235_v50  ;;  %v4703_v60 = vadd.f32 %v4702_v20, %v4701_v4  ;;  %v4706_v52 = vsel %vm1680_vm5, %v4562_v33, 0.0  ;;  %v4710_v20 = vsel %vm1680_vm5, %v4564_v45, 0.0 }
 0x4bd   :  { %12314 = vst [vmem:[#allocation104_spill] sm:$0xff] %v10466_v39  ;;  %v4565_v33 = vcombine.low %v10462_v61, %v10451_v18 }
 0x4be   :  { %5975 = vrsqrt.f32 %v5237_v43  ;;  %v4705_v19 = vadd.f32 %v4704_v5, %v4703_v60  ;;  %v4708_v43 = vsel %vm1680_vm5, %v4563_v11, 0.0 }
 0x4bf   :  { %v10476_v3 = vsel %vm1680_vm5, %v4565_v33, 0.0  ;;  %v12320_v33 = vld [vmem:[#allocation36_spill] sm:$0xff] }
 0x4c0   :  { %v4707_v4 = vadd.f32 %v4706_v52, %v4705_v19  ;;  %12316 = vst [vmem:[#allocation39_spill] sm:$0xff] %v10476_v3 }
 0x4c2   :  { %v4360_v50 = vpop.f32.mrb[42].mxu1  ;;  %v4709_v5 = vadd.f32 %v4708_v43, %v4707_v4 }
 0x4c3   :  { %v10457_v25 = vadd.f32 %v9612_v13, %v4360_v50  ;;  %v5944_v9 = vpop.f32.mrb[43].mxu1 }
 0x4c4   :  { %v10473_v11 = vadd.f32 %v4710_v20, %v4709_v5 }
 0x4c5   :  { %12312 = vst [vmem:[#allocation127_spill] sm:$0xff] %v10457_v25  ;;  %v4566_v50 = vcombine.low %v10466_v39, %v10457_v25  ;;  %v10480_v52 = vcombine.high %v10457_v25, %v10457_v25 }
 0x4c6   :  { %12315 = vst [vmem:[#allocation113_spill] sm:$0xff] %v10473_v11 }
 0x4c7   :  { %12317 = vst [vmem:[#allocation176_spill] sm:$0xff] %v10480_v52  ;;  %v10483_v45 = vsel %vm1680_vm5, %v4566_v50, 0.0 }
 0x4c8   :  { %v5976_v51 = vpop.eup %5975  ;;  %12318 = vst [vmem:[#allocation203_spill] sm:$0xff] %v10483_v45 }
 0x4c9   :  { %v4365_v60 = vpop.f32.mrb[44].mxu1  ;;  %v5243_v39 = vcombine.high %v5976_v51, %v5976_v51  ;;  %v10489_v43 = vmul.f32 %v5976_v51, %v9947_v47  ;;  %v10492_v4 = vmul.f32 %v5976_v51, %v9951_v53  ;;  %v10495_v20 = vmul.f32 %v5976_v51, %v9971_v62  ;;  %v12321_v47 = vld [vmem:[#allocation92_spill] sm:$0xff]  ;;  %v12322_v53 = vld [vmem:[#allocation115_spill] sm:$0xff]  ;;  %v12323_v62 = vld [vmem:[#allocation33_spill] sm:$0xff] }
 0x4ca   :  { %v5947_v9 = vpop.f32.mrb[45].mxu1  ;;  %v10486_v19 = vadd.f32 %v9612_v13, %v4365_v60  ;;  %v10498_v5 = vmul.f32 %v5976_v51, %v12320_v33  ;;  %v10504_v50 = vmul.f32 %v5976_v51, %v10026_v57  ;;  %v10507_v13 = vmul.f32 %v5976_v51, %v10030_v34  ;;  %v12324_v33 = vld [vmem:[#allocation112_spill] sm:$0xff] }
 0x4cb   :  { %v10501_v9 = vmul.f32 %v5976_v51, %v10006_v26  ;;  %v10510_v60 = vmul.f32 %v5243_v39, %v12321_v47  ;;  %v10513_v25 = vmul.f32 %v5243_v39, %v12322_v53  ;;  %v10516_v61 = vmul.f32 %v5243_v39, %v12323_v62  ;;  %v12325_v26 = vld [vmem:[#allocation78_spill] sm:$0xff] }
 0x4cc   :  { %12319 = vst [vmem:[#allocation124_spill] sm:$0xff] %v10486_v19  ;;  %v10519_v18 = vmul.f32 %v5243_v39, %v12324_v33  ;;  %v10522_v41 = vmul.f32 %v5243_v39, %v12325_v26  ;;  %v10525_v57 = vmul.f32 %v5243_v39, %v10018_v15  ;;  %v10528_v34 = vmul.f32 %v5243_v39, %v10042_v42  ;;  %v12326_v15 = vld [vmem:[#allocation89_spill] sm:$0xff] }
 0x4cd   :  { %v10531_v47 = vmul.f32 %v5976_v51, %v10068_v37  ;;  %v10534_v53 = vmul.f32 %v5243_v39, %v10050_v44  ;;  %v10537_v62 = vmul.f32 %v5976_v51, %v10084_v24  ;;  %v10540_v33 = vmul.f32 %v5243_v39, %v10072_v0  ;;  %v12327_v37 = vld [vmem:[#allocation83_spill] sm:$0xff] }
 0x4ce   :  { %v10543_v26 = vmul.f32 %v5976_v51, %v10099_v8  ;;  %v10546_v32 = vmul.f32 %v5243_v39, %v12326_v15  ;;  %v10549_v42 = vmul.f32 %v5976_v51, %v10116_v28  ;;  %v10552_v59 = vmul.f32 %v5243_v39, %v12327_v37 }
 0x4cf   :  { %v10555_v44 = vmul.f32 %v5976_v51, %v10130_v23  ;;  %v10558_v24 = vmul.f32 %v5243_v39, %v10120_v40  ;;  %v10561_v0 = vmul.f32 %v5976_v51, %v10149_v10  ;;  %v10564_v8 = vmul.f32 %v5243_v39, %v10134_v38  ;;  %v12328_v23 = vld [vmem:[#allocation82_spill] sm:$0xff]  ;;  %v12329_v40 = vld [vmem:[#allocation160_spill] sm:$0xff] }
 0x4d0   :  { %v10567_v15 = vmul.f32 %v5976_v51, %v10163_v17  ;;  %v10570_v28 = vmul.f32 %v5243_v39, %v10153_v1  ;;  %v10573_v37 = vmul.f32 %v5976_v51, %v10178_v56  ;;  %v10576_v2 = vmul.f32 %v5243_v39, %v12328_v23  ;;  %v12335_v23 = vld [vmem:[#allocation22_spill] sm:$0xff] }
 0x4d1   :  { %v10579_v54 = vmul.f32 %v5976_v51, %v12329_v40  ;;  %v10584_v38 = vmul.f32 %v5243_v39, %v12331_v30  ;;  %v10587_v17 = vmul.f32 %v5976_v51, %v12332_v55  ;;  %v10590_v1 = vmul.f32 %v5243_v39, %v12333_v14 }
 0x4d2   :  { %v10593_v56 = vmul.f32 %v5976_v51, %v12334_v21  ;;  %v10596_v22 = vmul.f32 %v5243_v39, %v12335_v23  ;;  %v10599_v40 = vmul.f32 %v5976_v51, %v10239_v36  ;;  %v10602_v31 = vmul.f32 %v5243_v39, %v12336_v16  ;;  %v12337_v36 = vld [vmem:[#allocation218_spill] sm:$0xff]  ;;  %v12338_v16 = vld [vmem:[#allocation88_spill] sm:$0xff] }
 0x4d3   :  { %v10581_v10 = vpop.f32.mrb[46].mxu1  ;;  %v10605_v30 = vmul.f32 %v5976_v51, %v10253_v7  ;;  %v10608_v55 = vmul.f32 %v5243_v39, %v10243_v27  ;;  %v10611_v14 = vmul.f32 %v5976_v51, %v10268_v6  ;;  %v10617_v21 = vmul.f32 %v5976_v51, %v10285_v58  ;;  %v12339_v7 = vld [vmem:[#allocation66_spill] sm:$0xff]  ;;  %v12340_v27 = vld [vmem:[#allocation31_spill] sm:$0xff] }
 0x4d4   :  { %12330 = vst [vmem:[#allocation118_spill] sm:$0xff] %v10581_v10  ;;  %v5950_v12 = vpop.f32.mrb[47].mxu1  ;;  %v10620_v23 = vmul.f32 %v5243_v39, %v12337_v36  ;;  %v10623_v35 = vmul.f32 %v5976_v51, %v12338_v16  ;;  %v10626_v29 = vmul.f32 %v5243_v39, %v12339_v7  ;;  %v10629_v49 = vmul.f32 %v5976_v51, %v12340_v27  ;;  %v12341_v6 = vld [vmem:[#allocation71_spill] sm:$0xff] }
 0x4d5   :  { %v10614_v12 = vmul.f32 %v5243_v39, %v10257_v46  ;;  %v10632_v63 = vmul.f32 %v5243_v39, %v12341_v6  ;;  %v5295_v46 = vmul.f32 %v5976_v51, %v9899_v48  ;;  %v5345_v58 = vmax.f32 %v10489_v43, 0.0 }
 0x4d6   :  { %v5346_v45 = vmax.f32 %v10510_v60, 0.0  ;;  %v5347_v36 = vmax.f32 %v10492_v4, 0.0  ;;  %v5348_v16 = vmax.f32 %v10513_v25, 0.0  ;;  %v5349_v10 = vmax.f32 %v10495_v20, 0.0 }
 0x4d7   :  { %v5350_v7 = vmax.f32 %v10516_v61, 0.0  ;;  %v5351_v27 = vmax.f32 %v10498_v5, 0.0  ;;  %v5352_v52 = vmax.f32 %v10519_v18, 0.0  ;;  %v5353_v39 = vmax.f32 %v10501_v9, 0.0 }
 0x4d8   :  { %v5354_v48 = vmax.f32 %v10522_v41, 0.0  ;;  %v5355_v51 = vmax.f32 %v10504_v50, 0.0  ;;  %v5356_v43 = vmax.f32 %v10525_v57, 0.0  ;;  %v5357_v4 = vmax.f32 %v10507_v13, 0.0 }
 0x4d9   :  { %v5358_v25 = vmax.f32 %v10528_v34, 0.0  ;;  %v5359_v20 = vmax.f32 %v10531_v47, 0.0  ;;  %v5360_v61 = vmax.f32 %v10534_v53, 0.0  ;;  %v5361_v5 = vmax.f32 %v10537_v62, 0.0 }
 0x4da   :  { %v5362_v18 = vmax.f32 %v10540_v33, 0.0  ;;  %v5363_v9 = vmax.f32 %v10543_v26, 0.0  ;;  %v5364_v41 = vmax.f32 %v10546_v32, 0.0  ;;  %v5365_v50 = vmax.f32 %v10549_v42, 0.0 }
 0x4db   :  { %v5366_v60 = vmax.f32 %v10552_v59, 0.0  ;;  %v5367_v13 = vmax.f32 %v10555_v44, 0.0  ;;  %v5368_v57 = vmax.f32 %v10558_v24, 0.0  ;;  %v5369_v34 = vmax.f32 %v10561_v0, 0.0 }
 0x4dc   :  { %v5370_v47 = vmax.f32 %v10564_v8, 0.0  ;;  %v5371_v53 = vmax.f32 %v10567_v15, 0.0  ;;  %v5372_v62 = vmax.f32 %v10570_v28, 0.0  ;;  %v5373_v33 = vmax.f32 %v10573_v37, 0.0 }
 0x4dd   :  { %v5374_v32 = vmax.f32 %v10576_v2, 0.0  ;;  %v5375_v26 = vmax.f32 %v10579_v54, 0.0  ;;  %v5376_v59 = vmax.f32 %v10584_v38, 0.0  ;;  %v5377_v42 = vmax.f32 %v10587_v17, 0.0 }
 0x4de   :  { %v5378_v44 = vmax.f32 %v10590_v1, 0.0  ;;  %v5379_v24 = vmax.f32 %v10593_v56, 0.0  ;;  %v5380_v0 = vmax.f32 %v10596_v22, 0.0  ;;  %v5381_v8 = vmax.f32 %v10599_v40, 0.0 }
 0x4df   :  { %v5382_v15 = vmax.f32 %v10602_v31, 0.0  ;;  %v5383_v28 = vmax.f32 %v10605_v30, 0.0  ;;  %v5384_v2 = vmax.f32 %v10608_v55, 0.0  ;;  %v5385_v54 = vmax.f32 %v10611_v14, 0.0 }
 0x4e0   :  { %v5386_v37 = vmax.f32 %v10614_v12, 0.0  ;;  %v5387_v38 = vmax.f32 %v10617_v21, 0.0  ;;  %v5388_v17 = vmax.f32 %v10620_v23, 0.0  ;;  %v5389_v1 = vmax.f32 %v10623_v35, 0.0 }
 0x4e1   :  { %v5390_v22 = vmax.f32 %v10626_v29, 0.0  ;;  %v5391_v56 = vmax.f32 %v10629_v49, 0.0  ;;  %v5392_v31 = vmax.f32 %v10632_v63, 0.0  ;;  %v5393_v40 = vmax.f32 %v5295_v46, 0.0 }
 0x4e2   :  { %v5539_v30 = vcombine.low %v5345_v58, %v5346_v45  ;;  %v5540_v6 = vcombine.low %v5347_v36, %v5348_v16  ;;  %v5541_v55 = vcombine.low %v5349_v10, %v5350_v7  ;;  %v5542_v19 = vcombine.low %v5351_v27, %v5352_v52  ;;  %v12342_v7 = vld [vmem:[#allocation113_spill] sm:$0xff]  ;;  %v12343_v27 = vld [vmem:[#allocation39_spill] sm:$0xff] }
 0x4e3   :  { %v5543_v14 = vcombine.low %v5353_v39, %v5354_v48  ;;  %v5544_v3 = vcombine.low %v5355_v51, %v5356_v43  ;;  %v5545_v12 = vcombine.low %v5357_v4, %v5358_v25  ;;  %v5546_v11 = vcombine.low %v5359_v20, %v5360_v61  ;;  %5659 = vst.msk [vmem:[%s11433_s3 + $0xc0] sm:$0xf] %vm4664_vm13, %v5393_v40  ;;  %v12344_v48 = vld [vmem:[#allocation124_spill] sm:$0xff]  ;;  %v6064_v25 = vld [vmem:[%s11432_s2] ss:$0 sm:$0xff] }
 0x4e4   :  { %v5547_v21 = vcombine.low %v5361_v5, %v5362_v18  ;;  %5635 = vst.msk [vmem:[%s11433_s3] sm:$0xff] %vm1680_vm5, %v5539_v30  ;;  %v5548_v63 = vcombine.low %v5363_v9, %v5364_v41  ;;  %v5549_v49 = vcombine.low %v5365_v50, %v5366_v60  ;;  %v5550_v29 = vcombine.low %v5367_v13, %v5368_v57  ;;  %v12345_v43 = vld [vmem:[#allocation176_spill] sm:$0xff]  ;;  %v12346_v20 = vld [vmem:[#allocation118_spill] sm:$0xff]  ;;  %v12347_v5 = vld [vmem:[#allocation203_spill] sm:$0xff] }
 0x4e5   :  { %v5551_v35 = vcombine.low %v5369_v34, %v5370_v47  ;;  %5636 = vst.msk [vmem:[%s11433_s3 + $0x8] sm:$0xff] %vm1680_vm5, %v5540_v6  ;;  %5637 = vst.msk [vmem:[%s11433_s3 + $0x10] sm:$0xff] %vm1680_vm5, %v5541_v55  ;;  %v5552_v52 = vcombine.low %v5371_v53, %v5372_v62  ;;  %v5553_v45 = vcombine.low %v5373_v33, %v5374_v32  ;;  %v12357_v6 = vld [vmem:[#allocation21_spill] sm:$0xff] }
 0x4e6   :  { %5638 = vst.msk [vmem:[%s11433_s3 + $0x18] sm:$0xff] %vm1680_vm5, %v5542_v19  ;;  %5639 = vst.msk [vmem:[%s11433_s3 + $0x20] sm:$0xff] %vm1680_vm5, %v5543_v14  ;;  %v5554_v10 = vcombine.low %v5375_v26, %v5376_v59  ;;  %v5555_v23 = vcombine.low %v5377_v42, %v5378_v44  ;;  %v5556_v19 = vcombine.low %v5379_v24, %v5380_v0  ;;  %v12358_v14 = vld [vmem:[#allocation34_spill] sm:$0xff] }
 0x4e7   :  { %5640 = vst.msk [vmem:[%s11433_s3 + $0x28] sm:$0xff] %vm1680_vm5, %v5544_v3  ;;  %5641 = vst.msk [vmem:[%s11433_s3 + $0x30] sm:$0xff] %vm1680_vm5, %v5545_v12  ;;  %v5557_v46 = vcombine.low %v5381_v8, %v5382_v15  ;;  %v5558_v58 = vcombine.low %v5383_v28, %v5384_v2  ;;  %v5559_v36 = vcombine.low %v5385_v54, %v5386_v37  ;;  %v12352_v2 = vld [vmem:[#allocation109_spill] sm:$0xff]  ;;  %v12353_v37 = vld [vmem:[#allocation18_spill] sm:$0xff] }
 0x4e8   :  { %5642 = vst.msk [vmem:[%s11433_s3 + $0x38] sm:$0xff] %vm1680_vm5, %v5546_v11  ;;  %5643 = vst.msk [vmem:[%s11433_s3 + $0x40] sm:$0xff] %vm1680_vm5, %v5547_v21  ;;  %v5560_v3 = vcombine.low %v5387_v38, %v5388_v17  ;;  %v5561_v11 = vcombine.low %v5389_v1, %v5390_v22  ;;  %v5562_v16 = vcombine.low %v5391_v56, %v5392_v31  ;;  %v12354_v17 = vld [vmem:[#allocation119_spill] sm:$0xff]  ;;  %v12355_v22 = vld [vmem:[#allocation70_spill] sm:$0xff] }
 0x4e9   :  { %5644 = vst.msk [vmem:[%s11433_s3 + $0x48] sm:$0xff] %vm1680_vm5, %v5548_v63  ;;  %5645 = vst.msk [vmem:[%s11433_s3 + $0x50] sm:$0xff] %vm1680_vm5, %v5549_v49  ;;  %v4713_v39 = vadd.f32 %v12343_v27, %v12342_v7  ;;  %v4470_v51 = vcombine.high %v12344_v48, %v12344_v48  ;;  %v4567_v4 = vcombine.low %v12345_v43, %v12344_v48  ;;  %v12356_v31 = vld [vmem:[#allocation85_spill] sm:$0xff]  ;;  %v12359_v49 = vld [vmem:[#allocation75_spill] sm:$0xff] }
 0x4ea   :  { %5646 = vst.msk [vmem:[%s11433_s3 + $0x58] sm:$0xff] %vm1680_vm5, %v5550_v29  ;;  %5647 = vst.msk [vmem:[%s11433_s3 + $0x60] sm:$0xff] %vm1680_vm5, %v5551_v35  ;;  %v4371_v61 = vadd.f32 %v6064_v25, %v12346_v20  ;;  %v12360_v35 = vld [vmem:[#allocation74_spill] sm:$0xff]  ;;  %v12365_v20 = vld [vmem:[#allocation87_spill] sm:$0xff] }
 0x4eb   :  { %5648 = vst.msk [vmem:[%s11433_s3 + $0x68] sm:$0xff] %vm1680_vm5, %v5552_v52  ;;  %5649 = vst.msk [vmem:[%s11433_s3 + $0x70] sm:$0xff] %vm1680_vm5, %v5553_v45  ;;  %v4715_v18 = vadd.f32 %v12347_v5, %v4713_v39  ;;  %v4716_v9 = vsel %vm1680_vm5, %v4567_v4, 0.0  ;;  %v12363_v39 = vld [vmem:[#allocation20_spill] sm:$0xff] }
 0x4ec   :  { %5650 = vst.msk [vmem:[%s11433_s3 + $0x78] sm:$0xff] %vm1680_vm5, %v5554_v10  ;;  %5651 = vst.msk [vmem:[%s11433_s3 + $0x80] sm:$0xff] %vm1680_vm5, %v5555_v23  ;;  %v4471_v41 = vcombine.high %v4371_v61, %v4371_v61  ;;  %v4568_v50 = vcombine.low %v4470_v51, %v4371_v61  ;;  %v12361_v23 = vld [vmem:[#allocation79_spill] sm:$0xff] }
 0x4ed   :  { %5652 = vst.msk [vmem:[%s11433_s3 + $0x88] sm:$0xff] %vm1680_vm5, %v5556_v19  ;;  %5653 = vst.msk [vmem:[%s11433_s3 + $0x90] sm:$0xff] %vm1680_vm5, %v5557_v46  ;;  %v4717_v60 = vadd.f32 %v4716_v9, %v4715_v18 }
 0x4ee   :  { %5654 = vst.msk [vmem:[%s11433_s3 + $0x98] sm:$0xff] %vm1680_vm5, %v5558_v58  ;;  %5655 = vst.msk [vmem:[%s11433_s3 + $0xa0] sm:$0xff] %vm1680_vm5, %v5559_v36  ;;  %v4718_v13 = vsel %vm1680_vm5, %v4568_v50, 0.0  ;;  %v4720_v34 = vsel %vm4664_vm13, %v4471_v41, 0.0 }
 0x4ef   :  { %5656 = vst.msk [vmem:[%s11433_s3 + $0xa8] sm:$0xff] %vm1680_vm5, %v5560_v3  ;;  %5657 = vst.msk [vmem:[%s11433_s3 + $0xb0] sm:$0xff] %vm1680_vm5, %v5561_v11  ;;  %v4719_v57 = vadd.f32 %v4718_v13, %v4717_v60  ;;  %v12362_v3 = vld [vmem:[#allocation23_spill] sm:$0xff] }
 0x4f0   :  { %5658 = vst.msk [vmem:[%s11433_s3 + $0xb8] sm:$0xff] %vm1680_vm5, %v5562_v16 }
 0x4f1   :  { %v4721_v47 = vadd.f32 %v4720_v34, %v4719_v57 }
 0x4f3   :  { %v4722_v53 = vrot.slane %v4721_v47, 4 }
 0x4f5   :  { %v4723_v62 = vadd.f32 %v4722_v53, %v4721_v47 }
 0x4f7   :  { %v4724_v33 = vrot.slane %v4723_v62, 2 }
 0x4f9   :  { %v4725_v32 = vadd.f32 %v4724_v33, %v4723_v62  ;;  %v12367_v33 = vld [vmem:[#allocation38_spill] sm:$0xff] }
 0x4fb   :  { %v4726_v26 = vrot.slane %v4725_v32, 1 }
 0x4fd   :  { %v4727_v59 = vadd.f32 %v4726_v26, %v4725_v32  ;;  %v12368_v26 = vld [vmem:[#allocation162_spill] sm:$0xff] }
 0x4ff   :  { %v10797_v42 = vmul.f32 0.0051020407, %v4727_v59 }
 0x501   :  { %v10801_v44 = vcombine.high %v10797_v42, %v10797_v42  ;;  %v10805_v24 = vsub.f32 %v12345_v43, %v10797_v42  ;;  %v10812_v8 = vsub.f32 %v4470_v51, %v10797_v42  ;;  %v10818_v28 = vsub.f32 %v4471_v41, %v10797_v42  ;;  %v12364_v51 = vld [vmem:[#allocation96_spill] sm:$0xff]  ;;  %v12366_v41 = vld [vmem:[#allocation111_spill] sm:$0xff] }
 0x502   :  { %v10830_v1 = vsub.f32 %v12354_v17, %v10797_v42  ;;  %v10834_v56 = vsub.f32 %v12355_v22, %v10797_v42  ;;  %v10844_v55 = vsub.f32 %v12357_v6, %v10797_v42  ;;  %v10856_v29 = vsub.f32 %v12359_v49, %v10797_v42 }
 0x503   :  { %12348 = vst [vmem:[#allocation90_spill] sm:$0xff] %v10805_v24  ;;  %v10809_v0 = vsub.f32 %v12344_v48, %v10801_v44  ;;  %12350 = vst [vmem:[#allocation163_spill] sm:$0xff] %v10812_v8  ;;  %v10815_v15 = vsub.f32 %v4371_v61, %v10801_v44  ;;  %v10822_v54 = vsub.f32 %v12352_v2, %v10801_v44 }
 0x504   :  { %v10826_v38 = vsub.f32 %v12353_v37, %v10801_v44  ;;  %v10838_v40 = vsub.f32 %v12356_v31, %v10801_v44  ;;  %v10848_v12 = vsub.f32 %v12358_v14, %v10801_v44  ;;  %v4884_v63 = vmul.f32 %v10830_v1, %v10830_v1  ;;  %v12370_v14 = vld [vmem:[#allocation26_spill] sm:$0xff] }
 0x505   :  { %12349 = vst [vmem:[#allocation179_spill] sm:$0xff] %v10809_v0  ;;  %12351 = vst [vmem:[#allocation205_spill] sm:$0xff] %v10815_v15  ;;  %v4885_v30 = vmul.f32 %v10822_v54, %v10822_v54  ;;  %v10860_v52 = vsub.f32 %v12360_v35, %v10801_v44  ;;  %v4886_v45 = vmul.f32 %v10834_v56, %v10834_v56 }
 0x506   :  { %v4887_v21 = vmul.f32 %v10826_v38, %v10826_v38  ;;  %v4889_v10 = vmul.f32 %v10838_v40, %v10838_v40  ;;  %v10868_v19 = vsub.f32 %v12361_v23, %v10797_v42  ;;  %v10872_v46 = vmul.f32 %v10809_v0, %v10809_v0  ;;  %v12371_v23 = vld [vmem:[#allocation4_spill] sm:$0xff] }
 0x507   :  { %v10876_v58 = vmul.f32 %v10815_v15, %v10815_v15  ;;  %v5053_v36 = vcombine.low %v4884_v63, %v4885_v30  ;;  %v10880_v11 = vsub.f32 %v12362_v3, %v10801_v44  ;;  %v4888_v16 = vmul.f32 %v10844_v55, %v10844_v55  ;;  %v12369_v30 = vld [vmem:[#allocation175_spill] sm:$0xff]  ;;  %v12372_v3 = vld [vmem:[#allocation202_spill] sm:$0xff] }
 0x508   :  { %v4891_v7 = vmul.f32 %v10848_v12, %v10848_v12  ;;  %v5054_v27 = vcombine.low %v4886_v45, %v4887_v21  ;;  %v10888_v48 = vsub.f32 %v12363_v39, %v10797_v42  ;;  %v10892_v43 = vsub.f32 %v12364_v51, %v10797_v42 }
 0x509   :  { %v10896_v4 = vmul.f32 %v10805_v24, %v10805_v24  ;;  %v10900_v25 = vmul.f32 %v10812_v8, %v10812_v8  ;;  %v10904_v61 = vsub.f32 %v12365_v20, %v10801_v44  ;;  %v4890_v5 = vmul.f32 %v10856_v29, %v10856_v29 }
 0x50a   :  { %v4893_v18 = vmul.f32 %v10860_v52, %v10860_v52  ;;  %v5055_v9 = vcombine.low %v4888_v16, %v4889_v10  ;;  %v10912_v50 = vsub.f32 %v12366_v41, %v10801_v44  ;;  %v5180_v57 = vsel %vm1680_vm5, %v5053_v36, 0.0 }
 0x50b   :  { %v4892_v34 = vmul.f32 %v10868_v19, %v10868_v19  ;;  %v4895_v47 = vmul.f32 %v10880_v11, %v10880_v11  ;;  %v5056_v53 = vcombine.low %v4890_v5, %v4891_v7  ;;  %v5181_v62 = vsel %vm1680_vm5, %v5054_v27, 0.0  ;;  %v12373_v5 = vld [vmem:[#allocation123_spill] sm:$0xff] }
 0x50c   :  { %v10926_v32 = vsub.f32 %v12367_v33, %v10797_v42  ;;  %v10930_v59 = vsub.f32 %v12368_v26, %v10801_v44  ;;  %v5182_v2 = vadd.f32 %v5181_v62, %v5180_v57  ;;  %v4894_v37 = vmul.f32 %v10888_v48, %v10888_v48  ;;  %v12375_v33 = vld [vmem:[#allocation110_spill] sm:$0xff] }
 0x50d   :  { %v4897_v17 = vmul.f32 %v10904_v61, %v10904_v61  ;;  %v5057_v22 = vcombine.low %v4892_v34, %v4893_v18  ;;  %v5183_v31 = vsel %vm1680_vm5, %v5055_v9, 0.0  ;;  %v10939_v6 = vsub.f32 %v12369_v30, %v10797_v42  ;;  %v12374_v9 = vld [vmem:[#allocation100_spill] sm:$0xff] }
 0x50e   :  { %v10943_v21 = vsub.f32 %v12370_v14, %v10801_v44  ;;  %v5184_v63 = vadd.f32 %v5183_v31, %v5182_v2  ;;  %v4896_v49 = vmul.f32 %v10892_v43, %v10892_v43  ;;  %v4899_v35 = vmul.f32 %v10912_v50, %v10912_v50  ;;  %v12376_v2 = vld [vmem:[#allocation174_spill] sm:$0xff] }
 0x50f   :  { %v5058_v45 = vcombine.low %v4894_v37, %v4895_v47  ;;  %v5185_v10 = vsel %vm1680_vm5, %v5056_v53, 0.0  ;;  %v10952_v36 = vsub.f32 %v12371_v23, %v10797_v42  ;;  %v10956_v16 = vsub.f32 %v12372_v3, %v10801_v44 }
 0x510   :  { %v5186_v7 = vadd.f32 %v5185_v10, %v5184_v63  ;;  %v4898_v27 = vmul.f32 %v10926_v32, %v10926_v32  ;;  %v4901_v39 = vmul.f32 %v10930_v59, %v10930_v59  ;;  %v5059_v51 = vcombine.low %v4896_v49, %v4897_v17  ;;  %v12377_v63 = vld [vmem:[#allocation68_spill] sm:$0xff] }
 0x511   :  { %v5187_v20 = vsel %vm1680_vm5, %v5057_v22, 0.0  ;;  %v10965_v18 = vsub.f32 %v12373_v5, %v10797_v42  ;;  %v10969_v41 = vsub.f32 %v12374_v9, %v10801_v44  ;;  %v4900_v34 = vmul.f32 %v10939_v6, %v10939_v6 }
 0x512   :  { %v5188_v57 = vadd.f32 %v5187_v20, %v5186_v7  ;;  %v4903_v47 = vmul.f32 %v10943_v21, %v10943_v21  ;;  %v5060_v53 = vcombine.low %v4898_v27, %v4899_v35  ;;  %v5189_v62 = vsel %vm1680_vm5, %v5058_v45, 0.0  ;;  %v12378_v35 = vld [vmem:[#allocation86_spill] sm:$0xff]  ;;  %v12380_v20 = vld [vmem:[#allocation221_spill] sm:$0xff] }
 0x513   :  { %v10978_v26 = vsub.f32 %v12375_v33, %v10797_v42  ;;  %v10982_v37 = vsub.f32 %v12376_v2, %v10801_v44  ;;  %v4902_v22 = vmul.f32 %v10952_v36, %v10952_v36  ;;  %v4905_v31 = vmul.f32 %v10956_v16, %v10956_v16  ;;  %v12382_v2 = vld [vmem:[#allocation161_spill] sm:$0xff] }
 0x514   :  { %v5190_v17 = vadd.f32 %v5189_v62, %v5188_v57  ;;  %v5061_v30 = vcombine.low %v4900_v34, %v4901_v39  ;;  %v5191_v14 = vsel %vm1680_vm5, %v5059_v51, 0.0  ;;  %v10991_v49 = vsub.f32 %v12377_v63, %v10797_v42  ;;  %v12379_v39 = vld [vmem:[#allocation37_spill] sm:$0xff] }
 0x515   :  { %v10995_v45 = vsub.f32 %v12378_v35, %v10801_v44  ;;  %v4904_v23 = vmul.f32 %v10965_v18, %v10965_v18  ;;  %v4907_v3 = vmul.f32 %v10969_v41, %v10969_v41  ;;  %v5062_v7 = vcombine.low %v4902_v22, %v4903_v47 }
 0x516   :  { %v5192_v10 = vadd.f32 %v5191_v14, %v5190_v17  ;;  %v5193_v27 = vsel %vm1680_vm5, %v5060_v53, 0.0  ;;  %v11004_v51 = vsub.f32 %v12379_v39, %v10797_v42  ;;  %v11008_v5 = vsub.f32 %v12380_v20, %v10801_v44  ;;  %v12381_v53 = vld [vmem:[#allocation24_spill] sm:$0xff] }
 0x517   :  { %v4906_v57 = vmul.f32 %v10978_v26, %v10978_v26  ;;  %v4909_v34 = vmul.f32 %v10982_v37, %v10982_v37  ;;  %v5063_v62 = vcombine.low %v4904_v23, %v4905_v31  ;;  %v5195_v47 = vsel %vm1680_vm5, %v5061_v30, 0.0  ;;  %v12383_v30 = vld [vmem:[#allocation3_spill] sm:$0xff] }
 0x518   :  { %v5194_v9 = vadd.f32 %v5193_v27, %v5192_v10  ;;  %v11017_v33 = vsub.f32 %v12381_v53, %v10797_v42  ;;  %v11021_v17 = vsub.f32 %v12382_v2, %v10801_v44  ;;  %v4908_v14 = vmul.f32 %v10991_v49, %v10991_v49  ;;  %v12384_v23 = vld [vmem:[#allocation91_spill] sm:$0xff]  ;;  %v12386_v53 = vld [vmem:[#allocation164_spill] sm:$0xff] }
 0x519   :  { %v4911_v63 = vmul.f32 %v10995_v45, %v10995_v45  ;;  %v5064_v35 = vcombine.low %v4906_v57, %v4907_v3  ;;  %v5197_v31 = vsel %vm1680_vm5, %v5062_v7, 0.0  ;;  %v11030_v10 = vsub.f32 %v12383_v30, %v10797_v42  ;;  %v12385_v7 = vld [vmem:[#allocation120_spill] sm:$0xff] }
 0x51a   :  { %v5196_v22 = vadd.f32 %v5195_v47, %v5194_v9  ;;  %v11034_v27 = vsub.f32 %v12384_v23, %v10801_v44  ;;  %v4910_v20 = vmul.f32 %v11004_v51, %v11004_v51  ;;  %v4913_v9 = vmul.f32 %v11008_v5, %v11008_v5 }
 0x51b   :  { %v5065_v47 = vcombine.low %v4908_v14, %v4909_v34  ;;  %v5199_v3 = vsel %vm1680_vm5, %v5063_v62, 0.0  ;;  %v11043_v57 = vsub.f32 %v12385_v7, %v10797_v42  ;;  %v11047_v2 = vsub.f32 %v12386_v53, %v10801_v44  ;;  %v12388_v62 = vld [vmem:[#allocation97_spill] sm:$0xff]  ;;  %v12390_v7 = vld [vmem:[#allocation6_spill] sm:$0xff] }
 0x51c   :  { %v5198_v39 = vadd.f32 %v5197_v31, %v5196_v22  ;;  %v4912_v22 = vmul.f32 %v11017_v33, %v11017_v33  ;;  %v4915_v31 = vmul.f32 %v11021_v17, %v11021_v17  ;;  %v5066_v23 = vcombine.low %v4910_v20, %v4911_v63 }
 0x51d   :  { %12387 = vst [vmem:[#allocation5_spill] sm:$0xff] %v11047_v2  ;;  %v5201_v34 = vsel %vm1680_vm5, %v5064_v35, 0.0  ;;  %v11056_v14 = vsub.f32 %v12388_v62, %v10797_v42  ;;  %v11060_v13 = vsub.f32 %v12390_v7, %v10801_v44  ;;  %v5203_v63 = vsel %vm1680_vm5, %v5065_v47, 0.0  ;;  %v12392_v35 = vld [vmem:[#allocation40_spill] sm:$0xff]  ;;  %v12393_v62 = vld [vmem:[#allocation114_spill] sm:$0xff]  ;;  %v12394_v47 = vld [vmem:[#allocation177_spill] sm:$0xff] }
 0x51e   :  { %v5200_v30 = vadd.f32 %v5199_v3, %v5198_v39  ;;  %v4914_v39 = vmul.f32 %v11030_v10, %v11030_v10  ;;  %v4917_v3 = vmul.f32 %v11034_v27, %v11034_v27  ;;  %v5067_v60 = vcombine.low %v4912_v22, %v4913_v9 }
 0x51f   :  { %12389 = vst [vmem:[#allocation27_spill] sm:$0xff] %v11056_v14  ;;  %12391 = vst [vmem:[#allocation95_spill] sm:$0xff] %v11060_v13  ;;  %v11069_v20 = vsub.f32 %v12392_v35, %v10797_v42  ;;  %v11073_v15 = vsub.f32 %v12393_v62, %v10801_v44  ;;  %v5205_v9 = vsel %vm1680_vm5, %v5066_v23, 0.0  ;;  %v11082_v22 = vsub.f32 %v12394_v47, %v10797_v42  ;;  %v12395_v35 = vld [vmem:[#allocation204_spill] sm:$0xff]  ;;  %v12399_v47 = vld [vmem:[#allocation127_spill] sm:$0xff] }
 0x520   :  { %v5202_v53 = vadd.f32 %v5201_v34, %v5200_v30  ;;  %v4916_v30 = vmul.f32 %v11043_v57, %v11043_v57  ;;  %v4919_v34 = vmul.f32 %v11047_v2, %v11047_v2  ;;  %v5068_v8 = vcombine.low %v4914_v39, %v4915_v31  ;;  %v12397_v23 = vld [vmem:[#allocation28_spill] sm:$0xff] }
 0x521   :  { %v11086_v0 = vsub.f32 %v12395_v35, %v10801_v44  ;;  %v5207_v31 = vsel %vm1680_vm5, %v5067_v60, 0.0  ;;  %v11095_v39 = vsub.f32 %v12397_v23, %v10797_v42  ;;  %v11099_v2 = vsub.f32 %v12399_v47, %v10801_v44  ;;  %v12401_v60 = vld [vmem:[#allocation104_spill] sm:$0xff] }
 0x522   :  { %v5204_v7 = vadd.f32 %v5203_v63, %v5202_v53  ;;  %v4918_v53 = vmul.f32 %v11056_v14, %v11056_v14  ;;  %v4921_v63 = vmul.f32 %v11060_v13, %v11060_v13  ;;  %v5069_v24 = vcombine.low %v4916_v30, %v4917_v3 }
 0x523   :  { %12396 = vst [vmem:[#allocation101_spill] sm:$0xff] %v11086_v0  ;;  %12398 = vst [vmem:[#allocation166_spill] sm:$0xff] %v11095_v39  ;;  %v5209_v3 = vsel %vm1680_vm5, %v5068_v8, 0.0  ;;  %v11108_v30 = vsub.f32 %v12401_v60, %v10797_v42  ;;  %v4922_v13 = vmul.f32 %v11082_v22, %v11082_v22  ;;  %v4925_v44 = vmul.f32 %v11086_v0, %v11086_v0 }
 0x524   :  { %v5206_v62 = vadd.f32 %v5205_v9, %v5204_v7  ;;  %12400 = vst [vmem:[#allocation8_spill] sm:$0xff] %v11099_v2  ;;  %v4920_v7 = vmul.f32 %v11069_v20, %v11069_v20  ;;  %v4923_v9 = vmul.f32 %v11073_v15, %v11073_v15  ;;  %v5070_v14 = vcombine.low %v4918_v53, %v4919_v34 }
 0x525   :  { %v4924_v34 = vmul.f32 %v11095_v39, %v11095_v39  ;;  %v4927_v8 = vmul.f32 %v11099_v2, %v11099_v2 }
 0x526   :  { %v5208_v35 = vadd.f32 %v5207_v31, %v5206_v62  ;;  %v5071_v62 = vcombine.low %v4920_v7, %v4921_v63  ;;  %v5211_v31 = vsel %vm1680_vm5, %v5069_v24, 0.0  ;;  %v5072_v53 = vcombine.low %v4922_v13, %v4923_v9 }
 0x527   :  { %v5213_v42 = vsel %vm1680_vm5, %v5070_v14, 0.0  ;;  %v5073_v60 = vcombine.low %v4924_v34, %v4925_v44  ;;  %v4932_v14 = vmul.f32 %v10818_v28, %v10818_v28  ;;  %v12402_v9 = vcombine.low %v10896_v4, %v10872_v46 }
 0x528   :  { %v5210_v23 = vadd.f32 %v5209_v3, %v5208_v35  ;;  %v4926_v3 = vmul.f32 %v11108_v30, %v11108_v30  ;;  %v5215_v0 = vsel %vm1680_vm5, %v5071_v62, 0.0  ;;  %v5217_v24 = vsel %vm1680_vm5, %v5072_v53, 0.0 }
 0x529   :  { %v5223_v44 = vsel %vm1680_vm5, %v12402_v9, 0.0 }
 0x52a   :  { %v5212_v47 = vadd.f32 %v5211_v31, %v5210_v23  ;;  %v5074_v7 = vcombine.low %v4926_v3, %v4927_v8  ;;  %v5219_v31 = vsel %vm1680_vm5, %v5073_v60, 0.0  ;;  %v5227_v8 = vsel %vm4664_vm13, %v4932_v14, 0.0 }
 0x52c   :  { %v5214_v35 = vadd.f32 %v5213_v42, %v5212_v47  ;;  %v5221_v2 = vsel %vm1680_vm5, %v5074_v7, 0.0 }
 0x52e   :  { %v5216_v63 = vadd.f32 %v5215_v0, %v5214_v35  ;;  %v12403_v0 = vcombine.low %v10900_v25, %v10876_v58 }
 0x530   :  { %v5218_v23 = vadd.f32 %v5217_v24, %v5216_v63  ;;  %v5225_v47 = vsel %vm1680_vm5, %v12403_v0, 0.0 }
 0x532   :  { %v5220_v39 = vadd.f32 %v5219_v31, %v5218_v23 }
 0x534   :  { %v5222_v13 = vadd.f32 %v5221_v2, %v5220_v39 }
 0x536   :  { %v5224_v62 = vadd.f32 %v5223_v44, %v5222_v13 }
 0x538   :  { %v5226_v34 = vadd.f32 %v5225_v47, %v5224_v62  ;;  %v12408_v47 = vld [vmem:[#allocation101_spill] sm:$0xff] }
 0x53a   :  { %v5228_v53 = vadd.f32 %v5227_v8, %v5226_v34 }
 0x53c   :  { %v5229_v42 = vrot.slane %v5228_v53, 4 }
 0x53e   :  { %v5230_v2 = vadd.f32 %v5229_v42, %v5228_v53  ;;  %v12410_v42 = vld [vmem:[#allocation90_spill] sm:$0xff] }
 0x540   :  { %v5231_v39 = vrot.slane %v5230_v2, 2 }
 0x542   :  { %v5232_v35 = vadd.f32 %v5231_v39, %v5230_v2 }
 0x544   :  { %v5233_v3 = vrot.slane %v5232_v35, 1 }
 0x546   :  { %v5234_v60 = vadd.f32 %v5233_v3, %v5232_v35  ;;  %v12413_v3 = vld [vmem:[#allocation205_spill] sm:$0xff] }
 0x548   :  { %v5236_v63 = vmul.f32 0.0051020407, %v5234_v60 }
 0x54a   :  { %v5238_v46 = vadd.f32 1e-05, %v5236_v63 }
 0x54c   :  { %5977 = vrsqrt.f32 %v5238_v46 }
 0x556   :  { %v5978_v4 = vpop.eup %5977 }
 0x557   :  { %v5244_v7 = vcombine.high %v5978_v4, %v5978_v4  ;;  %v11138_v24 = vmul.f32 %v5978_v4, %v10830_v1  ;;  %v11141_v58 = vmul.f32 %v5978_v4, %v10834_v56  ;;  %v11144_v25 = vmul.f32 %v5978_v4, %v10844_v55 }
 0x558   :  { %v11147_v23 = vmul.f32 %v5978_v4, %v10856_v29  ;;  %v11150_v31 = vmul.f32 %v5978_v4, %v10868_v19  ;;  %v11153_v13 = vmul.f32 %v5978_v4, %v10888_v48  ;;  %v11156_v14 = vmul.f32 %v5978_v4, %v10892_v43 }
 0x559   :  { %v11159_v1 = vmul.f32 %v5244_v7, %v10822_v54  ;;  %v11162_v56 = vmul.f32 %v5244_v7, %v10826_v38  ;;  %v11165_v55 = vmul.f32 %v5244_v7, %v10838_v40  ;;  %v11168_v29 = vmul.f32 %v5244_v7, %v10848_v12 }
 0x55a   :  { %v11171_v19 = vmul.f32 %v5244_v7, %v10860_v52  ;;  %v11174_v48 = vmul.f32 %v5244_v7, %v10880_v11  ;;  %v11177_v43 = vmul.f32 %v5244_v7, %v10904_v61  ;;  %v11180_v54 = vmul.f32 %v5978_v4, %v10926_v32 }
 0x55b   :  { %v11183_v38 = vmul.f32 %v5244_v7, %v10912_v50  ;;  %v11186_v40 = vmul.f32 %v5978_v4, %v10939_v6  ;;  %v11189_v12 = vmul.f32 %v5244_v7, %v10930_v59  ;;  %v11192_v52 = vmul.f32 %v5978_v4, %v10952_v36 }
 0x55c   :  { %v11195_v11 = vmul.f32 %v5244_v7, %v10943_v21  ;;  %v11198_v61 = vmul.f32 %v5978_v4, %v10965_v18  ;;  %v11201_v32 = vmul.f32 %v5244_v7, %v10956_v16  ;;  %v11204_v50 = vmul.f32 %v5978_v4, %v10978_v26 }
 0x55d   :  { %v11207_v6 = vmul.f32 %v5244_v7, %v10969_v41  ;;  %v11210_v59 = vmul.f32 %v5978_v4, %v10991_v49  ;;  %v11213_v36 = vmul.f32 %v5244_v7, %v10982_v37  ;;  %v11216_v21 = vmul.f32 %v5978_v4, %v11004_v51 }
 0x55e   :  { %v11219_v18 = vmul.f32 %v5244_v7, %v10995_v45  ;;  %v11222_v16 = vmul.f32 %v5978_v4, %v11017_v33  ;;  %v11225_v26 = vmul.f32 %v5244_v7, %v11008_v5  ;;  %v11228_v41 = vmul.f32 %v5978_v4, %v11030_v10  ;;  %v12404_v45 = vld [vmem:[#allocation27_spill] sm:$0xff]  ;;  %v12405_v33 = vld [vmem:[#allocation5_spill] sm:$0xff] }
 0x55f   :  { %v11231_v49 = vmul.f32 %v5244_v7, %v11021_v17  ;;  %v11234_v37 = vmul.f32 %v5978_v4, %v11043_v57  ;;  %v11237_v51 = vmul.f32 %v5244_v7, %v11034_v27  ;;  %v11240_v9 = vmul.f32 %v5978_v4, %v12404_v45  ;;  %v12406_v10 = vld [vmem:[#allocation95_spill] sm:$0xff]  ;;  %v12407_v27 = vld [vmem:[#allocation166_spill] sm:$0xff] }
 0x560   :  { %v11243_v44 = vmul.f32 %v5244_v7, %v12405_v33  ;;  %v11246_v5 = vmul.f32 %v5978_v4, %v11069_v20  ;;  %v11249_v62 = vmul.f32 %v5244_v7, %v12406_v10  ;;  %v11252_v17 = vmul.f32 %v5978_v4, %v11082_v22  ;;  %v12409_v20 = vld [vmem:[#allocation8_spill] sm:$0xff]  ;;  %v12411_v22 = vld [vmem:[#allocation179_spill] sm:$0xff] }
 0x561   :  { %v11255_v57 = vmul.f32 %v5244_v7, %v11073_v15  ;;  %v11258_v0 = vmul.f32 %v5978_v4, %v12407_v27  ;;  %v11261_v34 = vmul.f32 %v5244_v7, %v12408_v47  ;;  %v11264_v8 = vmul.f32 %v5978_v4, %v11108_v30  ;;  %v12412_v15 = vld [vmem:[#allocation163_spill] sm:$0xff] }
 0x562   :  { %v11267_v53 = vmul.f32 %v5244_v7, %v12409_v20  ;;  %v11270_v2 = vmul.f32 %v5978_v4, %v12410_v42  ;;  %v11273_v39 = vmul.f32 %v5244_v7, %v12411_v22  ;;  %v11276_v35 = vmul.f32 %v5978_v4, %v12412_v15 }
 0x563   :  { %v11279_v60 = vmul.f32 %v5244_v7, %v12413_v3  ;;  %v5344_v63 = vmul.f32 %v5978_v4, %v10818_v28  ;;  %v5394_v30 = vmax.f32 %v11138_v24, 0.0  ;;  %v5395_v46 = vmax.f32 %v11159_v1, 0.0 }
 0x564   :  { %v5396_v45 = vmax.f32 %v11141_v58, 0.0  ;;  %v5397_v33 = vmax.f32 %v11162_v56, 0.0  ;;  %v5398_v10 = vmax.f32 %v11144_v25, 0.0  ;;  %v5399_v27 = vmax.f32 %v11165_v55, 0.0 }
 0x565   :  { %v5400_v47 = vmax.f32 %v11147_v23, 0.0  ;;  %v5401_v20 = vmax.f32 %v11168_v29, 0.0  ;;  %v5402_v7 = vmax.f32 %v11150_v31, 0.0  ;;  %v5403_v28 = vmax.f32 %v11171_v19, 0.0 }
 0x566   :  { %v5404_v4 = vmax.f32 %v11153_v13, 0.0  ;;  %v5405_v24 = vmax.f32 %v11174_v48, 0.0  ;;  %v5406_v58 = vmax.f32 %v11156_v14, 0.0  ;;  %v5407_v1 = vmax.f32 %v11177_v43, 0.0 }
 0x567   :  { %v5408_v25 = vmax.f32 %v11180_v54, 0.0  ;;  %v5409_v56 = vmax.f32 %v11183_v38, 0.0  ;;  %v5410_v23 = vmax.f32 %v11186_v40, 0.0  ;;  %v5411_v55 = vmax.f32 %v11189_v12, 0.0 }
 0x568   :  { %v5412_v31 = vmax.f32 %v11192_v52, 0.0  ;;  %v5413_v29 = vmax.f32 %v11195_v11, 0.0  ;;  %v5414_v13 = vmax.f32 %v11198_v61, 0.0  ;;  %v5415_v19 = vmax.f32 %v11201_v32, 0.0 }
 0x569   :  { %v5416_v14 = vmax.f32 %v11204_v50, 0.0  ;;  %v5417_v48 = vmax.f32 %v11207_v6, 0.0  ;;  %v5418_v43 = vmax.f32 %v11210_v59, 0.0  ;;  %v5419_v54 = vmax.f32 %v11213_v36, 0.0 }
 0x56a   :  { %v5420_v38 = vmax.f32 %v11216_v21, 0.0  ;;  %v5421_v40 = vmax.f32 %v11219_v18, 0.0  ;;  %v5422_v12 = vmax.f32 %v11222_v16, 0.0  ;;  %v5423_v52 = vmax.f32 %v11225_v26, 0.0 }
 0x56b   :  { %v5424_v11 = vmax.f32 %v11228_v41, 0.0  ;;  %v5425_v61 = vmax.f32 %v11231_v49, 0.0  ;;  %v5426_v32 = vmax.f32 %v11234_v37, 0.0  ;;  %v5427_v50 = vmax.f32 %v11237_v51, 0.0 }
 0x56c   :  { %v5428_v6 = vmax.f32 %v11240_v9, 0.0  ;;  %v5429_v59 = vmax.f32 %v11243_v44, 0.0  ;;  %v5430_v36 = vmax.f32 %v11246_v5, 0.0  ;;  %v5431_v21 = vmax.f32 %v11249_v62, 0.0 }
 0x56d   :  { %v5432_v18 = vmax.f32 %v11252_v17, 0.0  ;;  %v5433_v16 = vmax.f32 %v11255_v57, 0.0  ;;  %v5434_v26 = vmax.f32 %v11258_v0, 0.0  ;;  %v5435_v41 = vmax.f32 %v11261_v34, 0.0 }
 0x56e   :  { %v5436_v49 = vmax.f32 %v11264_v8, 0.0  ;;  %v5437_v37 = vmax.f32 %v11267_v53, 0.0  ;;  %v5438_v51 = vmax.f32 %v11270_v2, 0.0  ;;  %v5439_v9 = vmax.f32 %v11273_v39, 0.0 }
 0x56f   :  { %v5440_v44 = vmax.f32 %v11276_v35, 0.0  ;;  %v5441_v5 = vmax.f32 %v11279_v60, 0.0  ;;  %v5442_v62 = vmax.f32 %v5344_v63, 0.0  ;;  %v5563_v17 = vcombine.low %v5394_v30, %v5395_v46 }
 0x570   :  { %v5564_v42 = vcombine.low %v5396_v45, %v5397_v33  ;;  %v5565_v57 = vcombine.low %v5398_v10, %v5399_v27  ;;  %v5566_v22 = vcombine.low %v5400_v47, %v5401_v20  ;;  %v5567_v0 = vcombine.low %v5402_v7, %v5403_v28 }
 0x571   :  { %v5568_v15 = vcombine.low %v5404_v4, %v5405_v24  ;;  %v5569_v34 = vcombine.low %v5406_v58, %v5407_v1  ;;  %v5570_v3 = vcombine.low %v5408_v25, %v5409_v56  ;;  %v5571_v8 = vcombine.low %v5410_v23, %v5411_v55  ;;  %5660 = vst.msk [vmem:[%s11433_s3 + $0xc8] sm:$0xff] %vm1680_vm5, %v5563_v17 }
 0x572   :  { %5684 = vst.msk [vmem:[%s11433_s3 + $0x188] sm:$0xf] %vm4664_vm13, %v5442_v62  ;;  %v5572_v53 = vcombine.low %v5412_v31, %v5413_v29  ;;  %v5573_v2 = vcombine.low %v5414_v13, %v5415_v19  ;;  %v5574_v39 = vcombine.low %v5416_v14, %v5417_v48  ;;  %v5575_v35 = vcombine.low %v5418_v43, %v5419_v54 }
 0x573   :  { %5661 = vst.msk [vmem:[%s11433_s3 + $0xd0] sm:$0xff] %vm1680_vm5, %v5564_v42  ;;  %5662 = vst.msk [vmem:[%s11433_s3 + $0xd8] sm:$0xff] %vm1680_vm5, %v5565_v57  ;;  %v5576_v60 = vcombine.low %v5420_v38, %v5421_v40  ;;  %v5577_v63 = vcombine.low %v5422_v12, %v5423_v52  ;;  %v5578_v30 = vcombine.low %v5424_v11, %v5425_v61 }
 0x574   :  { %5663 = vst.msk [vmem:[%s11433_s3 + $0xe0] sm:$0xff] %vm1680_vm5, %v5566_v22  ;;  %5664 = vst.msk [vmem:[%s11433_s3 + $0xe8] sm:$0xff] %vm1680_vm5, %v5567_v0  ;;  %v5579_v46 = vcombine.low %v5426_v32, %v5427_v50  ;;  %v5580_v45 = vcombine.low %v5428_v6, %v5429_v59  ;;  %v5581_v33 = vcombine.low %v5430_v36, %v5431_v21 }
 0x575   :  { %5665 = vst.msk [vmem:[%s11433_s3 + $0xf0] sm:$0xff] %vm1680_vm5, %v5568_v15  ;;  %5666 = vst.msk [vmem:[%s11433_s3 + $0xf8] sm:$0xff] %vm1680_vm5, %v5569_v34  ;;  %v5582_v10 = vcombine.low %v5432_v18, %v5433_v16  ;;  %v5583_v27 = vcombine.low %v5434_v26, %v5435_v41  ;;  %v5584_v47 = vcombine.low %v5436_v49, %v5437_v37 }
 0x576   :  { %5667 = vst.msk [vmem:[%s11433_s3 + $0x100] sm:$0xff] %vm1680_vm5, %v5570_v3  ;;  %5668 = vst.msk [vmem:[%s11433_s3 + $0x108] sm:$0xff] %vm1680_vm5, %v5571_v8  ;;  %v5585_v20 = vcombine.low %v5438_v51, %v5439_v9  ;;  %v5586_v7 = vcombine.low %v5440_v44, %v5441_v5 }
 0x577   :  { %5669 = vst.msk [vmem:[%s11433_s3 + $0x110] sm:$0xff] %vm1680_vm5, %v5572_v53  ;;  %5670 = vst.msk [vmem:[%s11433_s3 + $0x118] sm:$0xff] %vm1680_vm5, %v5573_v2 }
 0x578   :  { %5671 = vst.msk [vmem:[%s11433_s3 + $0x120] sm:$0xff] %vm1680_vm5, %v5574_v39  ;;  %5672 = vst.msk [vmem:[%s11433_s3 + $0x128] sm:$0xff] %vm1680_vm5, %v5575_v35 }
 0x579   :  { %5673 = vst.msk [vmem:[%s11433_s3 + $0x130] sm:$0xff] %vm1680_vm5, %v5576_v60  ;;  %5674 = vst.msk [vmem:[%s11433_s3 + $0x138] sm:$0xff] %vm1680_vm5, %v5577_v63 }
 0x57a   :  { %5675 = vst.msk [vmem:[%s11433_s3 + $0x140] sm:$0xff] %vm1680_vm5, %v5578_v30  ;;  %5676 = vst.msk [vmem:[%s11433_s3 + $0x148] sm:$0xff] %vm1680_vm5, %v5579_v46 }
 0x57b   :  { %5677 = vst.msk [vmem:[%s11433_s3 + $0x150] sm:$0xff] %vm1680_vm5, %v5580_v45  ;;  %5678 = vst.msk [vmem:[%s11433_s3 + $0x158] sm:$0xff] %vm1680_vm5, %v5581_v33 }
 0x57c   :  { %5679 = vst.msk [vmem:[%s11433_s3 + $0x160] sm:$0xff] %vm1680_vm5, %v5582_v10  ;;  %5680 = vst.msk [vmem:[%s11433_s3 + $0x168] sm:$0xff] %vm1680_vm5, %v5583_v27 }
 0x57d   :  { %5681 = vst.msk [vmem:[%s11433_s3 + $0x170] sm:$0xff] %vm1680_vm5, %v5584_v47  ;;  %5682 = vst.msk [vmem:[%s11433_s3 + $0x178] sm:$0xff] %vm1680_vm5, %v5585_v20 }
 0x57e   :  { %5683 = vst.msk [vmem:[%s11433_s3 + $0x180] sm:$0xff] %vm1680_vm5, %v5586_v7 }

</bundles_post_ra>
